<compile_context>
chip_gen: v7x
topology: tpu7x:2x2x1
jax: 0.10.0
libtpu: 0.0.40
codegen_flags: <defaults>
</compile_context>

<pallas_src>
import jax
import jax.numpy as jnp
from jax.experimental import pallas as pl
from jax.experimental.pallas import tpu as pltpu


# ----------------------------- fused Pallas kernel -----------------------------

def _make_fused_kernel(n_layers, hid_dim, n_nodes, k_rows):
    """Ref order:
      fixed  : x, adj_stacked [4N,N], sel_a [2K,N], sel_b [2K,N], head_mask [4N,4]
      layers : (lin_w, lin_b, w_out, att_b, w_nbr_rep, cat_w, cat_b) * n_layers
      tail   : sign_w1,b1..sign_w4,b4, dir_w1,b1, dir_w2,b2
      outs   : pred_sign [K,2], pred_direct [2K,2]
    """
    H = hid_dim
    N = n_nodes
    NF = 5
    NL = 7 * n_layers
    n_in = NF + NL + 12

    def kernel(*refs):
        (x_ref, adj_ref, sel_a_ref, sel_b_ref, head_mask_ref) = refs[:NF]
        layer_refs = refs[NF:NF + NL]
        (sw1, sb1, sw2, sb2, sw3, sb3, sw4, sb4,
         dw1, db1, dw2, db2) = refs[NF + NL:n_in]
        sign_out, direct_out = refs[n_in:]

        f32 = jnp.float32
        bf16 = jnp.bfloat16

        adj = adj_ref[...]                      # [4N, N] stacked masked adjacency
        head_mask = head_mask_ref[...]          # [4N, 4] one-hot head id per row block
        sel_a = sel_a_ref[...]                  # [2K, N] rows = [idx1 ; idx2]
        sel_b = sel_b_ref[...]                  # [2K, N] rows = [idx2 ; idx1]
        ones_hn = jnp.ones((4, N), f32)         # loop-invariant broadcast helper

        z = x_ref[...].astype(f32)
        z_parts = []
        for i in range(n_layers):
            lw, lb, w_out, att_b, w_nbr_rep, cw, cb = layer_refs[7 * i:7 * (i + 1)]
            xh = jnp.dot(z, lw[...], preferred_element_type=f32) + lb[...]       # [N, H]
            xh_b = xh.astype(bf16)

            # Neighbour-side scores for ALL 4 heads in one MXU matmul.
            # w_nbr_rep[k*N+i, :] = w_nbr[k, :]  (host-packed, bf16)
            s_nbr = jax.lax.dot_general(                                          # [4N, N]
                w_nbr_rep[...], xh_b, (((1,), (1,)), ((), ())),
                preferred_element_type=f32)

            # Out-node scores [N,4]; broadcast row-wise per head block via
            # (tiled * head_mask) @ ones  -> [4N, N]  (MXU, no XLU lane splats).
            s_out = jnp.dot(xh, w_out[...], preferred_element_type=f32) + att_b[...]
            s_out4 = jnp.concatenate([s_out] * 4, axis=0) * head_mask             # [4N, 4]
            s_out_bc = jnp.dot(s_out4, ones_hn, preferred_element_type=f32)       # [4N, N]

            # One EUP block for all heads; multiplicity-weighted masked attention
            # == scatter_sum over the (deduplicated) edge list.
            att = jnp.exp(jnp.tanh(s_out_bc + s_nbr))                             # [4N, N]
            agg = (adj * att).astype(bf16)
            xx = jnp.dot(agg, xh_b, preferred_element_type=f32)                   # [4N, H]

            # lin_concat applied as 4 chunked matmuls on sublane slices of xx
            # (avoids materializing the [N, 4H] lane concat).
            acc = cb[...]
            for k in range(4):
                acc = acc + jnp.dot(xx[k * N:(k + 1) * N, :],
                                    cw[k * H:(k + 1) * H, :],
                                    preferred_element_type=f32)
            z = jnp.tanh(acc)                                                     # [N, H]
            z_parts.append(z)

        # Lane-dense per-node embedding [N, n_layers*H]; selections run ONCE.
        z_all = z_parts[0] if n_layers == 1 else jnp.concatenate(z_parts, axis=1)
        za = jnp.dot(sel_a, z_all, preferred_element_type=f32)                    # [2K, nL*H]
        zb = jnp.dot(sel_b, z_all, preferred_element_type=f32)                    # [2K, nL*H]
        xcat = jnp.concatenate([za, zb], axis=1)                                  # [2K, 2*nL*H]
        # rows 0:K == x12 = [z[idx1], z[idx2]],  rows K:2K == x21 = [z[idx2], z[idx1]]

        # Sign tail: only the x12 rows are needed.
        x12 = xcat[:k_rows, :]
        h = jnp.maximum(jnp.dot(x12, sw1[...], preferred_element_type=f32) + sb1[...], 0.0)
        h = jnp.maximum(jnp.dot(h, sw2[...], preferred_element_type=f32) + sb2[...], 0.0)
        h = jnp.maximum(jnp.dot(h, sw3[...], preferred_element_type=f32) + sb3[...], 0.0)
        sign_out[...] = (jnp.dot(h, sw4[...], preferred_element_type=f32)
                         + sb4[...]).astype(sign_out.dtype)                        # [K, 2]

        # Direct tail runs on both x12 and x21 rows (one lane-dense matmul).
        hd = jnp.maximum(jnp.dot(xcat, dw1[...], preferred_element_type=f32) + db1[...], 0.0)
        direct_out[...] = (jnp.dot(hd, dw2[...], preferred_element_type=f32)
                           + db2[...]).astype(direct_out.dtype)                    # [2K, 2]

    return kernel


# ----------------------------- forward (single gridless pallas_call) -----------------------------

def sub_sumgnn_forward(packed_weights, x, adj_stacked, sel_a, sel_b, head_mask,
                       n_layers, hid_dim):
    k_rows = sel_a.shape[0] // 2
    n_nodes = x.shape[0]
    inputs = [x, adj_stacked, sel_a, sel_b, head_mask] + list(packed_weights)

    kernel = _make_fused_kernel(n_layers, hid_dim, n_nodes, k_rows)
    vmem = lambda: pl.BlockSpec(memory_space=pltpu.MemorySpace.VMEM)
    pred_sign, pred_direct = pl.pallas_call(
        kernel,
        out_shape=(jax.ShapeDtypeStruct((k_rows, 2), jnp.float32),
                   jax.ShapeDtypeStruct((2 * k_rows, 2), jnp.float32)),
        in_specs=[vmem() for _ in inputs],
        out_specs=(vmem(), vmem()),
    )(*inputs)
    return pred_sign, pred_direct


# ----------------------------- parameters (pre-packed for the kernel) -----------------------------

def init_params(key, attri_dim, hid_dim, hid_dim2, n_layers):
    """nn.Linear-style init, with attention heads pre-split into out/nbr halves."""
    keys = iter(jax.random.split(key, 16 * n_layers + 16))

    def lin_init(din, dout):
        kw, kb = jax.random.split(next(keys))
        bound = float(din) ** -0.5
        w = jax.random.uniform(kw, (din, dout), jnp.float32, -bound, bound)
        b = jax.random.uniform(kb, (1, dout), jnp.float32, -bound, bound)
        return w, b

    H = hid_dim
    params = {"n_layers": n_layers, "hid_dim": hid_dim, "layers": []}
    for i in range(n_layers):
        din = attri_dim if i == 0 else hid_dim
        lin_w, lin_b = lin_init(din, H)
        # 4 attention heads (pos-row, pos-col, neg-row, neg-col), each Linear(2H, 1).
        att = [lin_init(2 * H, 1) for _ in range(4)]
        w_out = jnp.concatenate([w[:H, :] for w, _ in att], axis=1)       # [H, 4]  "out"-node half
        w_nbr_t = jnp.concatenate([w[H:, :].T for w, _ in att], axis=0)   # [4, H]  neighbour half
        att_b = jnp.concatenate([b for _, b in att], axis=1)              # [1, 4]
        cat_w, cat_b = lin_init(4 * H, H)
        params["layers"].append((lin_w, lin_b, w_out, att_b, w_nbr_t, cat_w, cat_b))
    params["sign"] = [lin_init(2 * n_layers * H, H), lin_init(H, H),
                      lin_init(H, hid_dim2), lin_init(hid_dim2, 2)]
    params["direct"] = [lin_init(2 * n_layers * H, H), lin_init(H, 2)]
    return params


def pack_kernel_weights(params, n_nodes):
    """Flat kernel weight list; neighbour-head rows repeated N times (bf16)."""
    packed = []
    for (lin_w, lin_b, w_out, att_b, w_nbr_t, cat_w, cat_b) in params["layers"]:
        w_nbr_rep = jnp.repeat(w_nbr_t, n_nodes, axis=0).astype(jnp.bfloat16)   # [4N, H]
        packed.extend([lin_w, lin_b, w_out, att_b, w_nbr_rep, cat_w, cat_b])
    for w, b in params["sign"]:
        packed.extend([w, b])
    for w, b in params["direct"]:
        packed.extend([w, b])
    return packed


# ----------------------------- pure-JAX reference (edge-list / segment_sum) -----------------------------

def reference_forward(params, x, edges, idx1, idx2):
    n_layers = params["n_layers"]
    N = x.shape[0]
    hp = jax.lax.Precision.HIGHEST

    def lin(v, w, b):
        return jnp.dot(v, w, precision=hp) + b

    concat_emb = []
    z = x
    for i in range(n_layers):
        lin_w, lin_b, w_out, att_b, w_nbr_t, cat_w, cat_b = params["layers"][i]
        xh = lin(z, lin_w, lin_b)
        xx = []
        for e, (row, col) in enumerate(edges):
            for d in range(2):
                k = 2 * e + d
                out_idx, nbr_idx = (row, col) if d == 0 else (col, row)
                score = jnp.exp(jnp.tanh(
                    jnp.dot(xh[out_idx], w_out[:, k], precision=hp)
                    + jnp.dot(xh[nbr_idx], w_nbr_t[k, :], precision=hp)
                    + att_b[0, k]))
                contrib = xh[nbr_idx] * score[:, None]
                xx.append(jax.ops.segment_sum(contrib, out_idx, num_segments=N))
        z = jnp.tanh(lin(jnp.concatenate(xx, axis=1), cat_w, cat_b))
        concat_emb.append(z)

    zc = jnp.concatenate(concat_emb, axis=1)
    z1, z2 = zc[idx1], zc[idx2]
    x12 = jnp.concatenate([z1, z2], axis=1)
    x21 = jnp.concatenate([z2, z1], axis=1)

    def mlp(layers, v, acts):
        for (w, b), a in zip(layers, acts):
            v = lin(v, w, b)
            if a == "relu":
                v = jnp.maximum(v, 0.0)
        return v

    pred_sign = mlp(params["sign"], x12, ["relu", "relu", "relu", None])
    d12 = mlp(params["direct"], x12, ["relu", None])
    d21 = mlp(params["direct"], x21, ["relu", None])
    return pred_sign, jnp.concatenate([d12, d21], axis=0)


# ----------------------------- main -----------------------------

if __name__ == "__main__":
    key = jax.random.PRNGKey(0)
    N = 64
    attri_dim, hid_dim, hid_dim2, n_layers = 32, 32, 16, 2
    E = 96
    k_x, k_e1, k_e2, k_o1, k_o2, k_p = jax.random.split(key, 6)

    # Node features; columns 24 / 25 flag the two target node sets (4 nodes each).
    x = jax.random.normal(k_x, (N, attri_dim), jnp.float32)
    x = x.at[:, 24].set(0.0).at[:, 25].set(0.0)
    x = x.at[0:4, 24].set(1.0)
    x = x.at[4:8, 25].set(1.0)

    def make_edges(kr, ko):
        row = jax.random.randint(kr, (E,), 0, N)
        off = jax.random.randint(ko, (E,), 1, N)
        col = (row + off) % N                       # no self loops by construction
        return row, col

    def densify(row, col):
        adj = jnp.zeros((N, N), jnp.float32).at[row, col].add(1.0)   # keeps edge multiplicity
        return adj * (1.0 - jnp.eye(N, dtype=jnp.float32))           # == remove_self_loops

    edges_pos = make_edges(k_e1, k_o1)
    edges_neg = make_edges(k_e2, k_o2)
    adj_pos = densify(*edges_pos)
    adj_neg = densify(*edges_neg)
    # Stack heads once at data-prep time: k = 2*edge_type + direction
    #   k=0: pos row-agg (A), k=1: pos col-agg (A^T), k=2: neg A, k=3: neg A^T.
    adj_stacked = jnp.concatenate([adj_pos, adj_pos.T, adj_neg, adj_neg.T], axis=0)  # [4N, N]

    idx1 = jnp.nonzero(x[:, 24] == 1)[0]
    idx2 = jnp.nonzero(x[:, 25] == 1)[0]
    sel1 = jax.nn.one_hot(idx1, N, dtype=jnp.float32)
    sel2 = jax.nn.one_hot(idx2, N, dtype=jnp.float32)
    sel_a = jnp.concatenate([sel1, sel2], axis=0)        # [2K, N] rows = [idx1 ; idx2]
    sel_b = jnp.concatenate([sel2, sel1], axis=0)        # [2K, N] rows = [idx2 ; idx1]

    # One-hot head id per stacked row block (used for the out-score broadcast matmul).
    head_mask = jnp.repeat(jnp.eye(4, dtype=jnp.float32), N, axis=0)   # [4N, 4]

    params = init_params(k_p, attri_dim, hid_dim, hid_dim2, n_layers)
    packed_w = pack_kernel_weights(params, N)

    pred_sign, pred_direct = sub_sumgnn_forward(
        packed_w, x, adj_stacked, sel_a, sel_b, head_mask, n_layers, hid_dim)
    pred_sign, pred_direct = jax.block_until_ready((pred_sign, pred_direct))

    assert pred_sign.shape == (4, 2), pred_sign.shape
    assert pred_direct.shape == (8, 2), pred_direct.shape
    assert bool(jnp.all(jnp.isfinite(pred_sign)))
    assert bool(jnp.all(jnp.isfinite(pred_direct)))

    # Independent correctness check vs. a pure-JAX edge-list/segment_sum reference.
    # Kernel uses bf16 MXU operands for the score/aggregation matmuls and default
    # MXU precision elsewhere, vs. a HIGHEST-precision f32 reference; exp(tanh) is
    # bounded, so drift stays well inside a 6e-2 absolute tolerance.
    ref_sign, ref_direct = reference_forward(params, x, [edges_pos, edges_neg], idx1, idx2)
    err_s = float(jnp.max(jnp.abs(pred_sign - ref_sign)))
    err_d = float(jnp.max(jnp.abs(pred_direct - ref_direct)))
    assert err_s < 6e-2 and err_d < 6e-2, (err_s, err_d)

    print("KERNEL_OK")
</pallas_src>

<mosaic_0001>
module attributes {stable_mosaic.version = 11 : i64} {
  func.func @kernel(%arg0: memref<64x32xf32, #tpu.memory_space<vmem>>, %arg1: memref<256x64xf32, #tpu.memory_space<vmem>>, %arg2: memref<8x64xf32, #tpu.memory_space<vmem>>, %arg3: memref<8x64xf32, #tpu.memory_space<vmem>>, %arg4: memref<256x4xf32, #tpu.memory_space<vmem>>, %arg5: memref<32x32xf32, #tpu.memory_space<vmem>>, %arg6: memref<1x32xf32, #tpu.memory_space<vmem>>, %arg7: memref<32x4xf32, #tpu.memory_space<vmem>>, %arg8: memref<1x4xf32, #tpu.memory_space<vmem>>, %arg9: memref<256x32xbf16, #tpu.memory_space<vmem>>, %arg10: memref<128x32xf32, #tpu.memory_space<vmem>>, %arg11: memref<1x32xf32, #tpu.memory_space<vmem>>, %arg12: memref<32x32xf32, #tpu.memory_space<vmem>>, %arg13: memref<1x32xf32, #tpu.memory_space<vmem>>, %arg14: memref<32x4xf32, #tpu.memory_space<vmem>>, %arg15: memref<1x4xf32, #tpu.memory_space<vmem>>, %arg16: memref<256x32xbf16, #tpu.memory_space<vmem>>, %arg17: memref<128x32xf32, #tpu.memory_space<vmem>>, %arg18: memref<1x32xf32, #tpu.memory_space<vmem>>, %arg19: memref<128x32xf32, #tpu.memory_space<vmem>>, %arg20: memref<1x32xf32, #tpu.memory_space<vmem>>, %arg21: memref<32x32xf32, #tpu.memory_space<vmem>>, %arg22: memref<1x32xf32, #tpu.memory_space<vmem>>, %arg23: memref<32x16xf32, #tpu.memory_space<vmem>>, %arg24: memref<1x16xf32, #tpu.memory_space<vmem>>, %arg25: memref<16x2xf32, #tpu.memory_space<vmem>>, %arg26: memref<1x2xf32, #tpu.memory_space<vmem>>, %arg27: memref<128x32xf32, #tpu.memory_space<vmem>>, %arg28: memref<1x32xf32, #tpu.memory_space<vmem>>, %arg29: memref<32x2xf32, #tpu.memory_space<vmem>>, %arg30: memref<1x2xf32, #tpu.memory_space<vmem>>, %arg31: memref<4x2xf32, #tpu.memory_space<vmem>>, %arg32: memref<8x2xf32, #tpu.memory_space<vmem>>) attributes {dimension_semantics = [], scalar_prefetch = 0 : i64, scratch_operands = 0 : i64, tpu.core_type = #tpu.core_type<tc>} {
    %c0 = arith.constant 0 : index
    %c0_0 = arith.constant 0 : index
    %0 = vector.load %arg1[%c0, %c0_0] : memref<256x64xf32, #tpu.memory_space<vmem>>, vector<256x64xf32>
    %c0_1 = arith.constant 0 : index
    %c0_2 = arith.constant 0 : index
    %1 = vector.load %arg4[%c0_1, %c0_2] : memref<256x4xf32, #tpu.memory_space<vmem>>, vector<256x4xf32>
    %c0_3 = arith.constant 0 : index
    %c0_4 = arith.constant 0 : index
    %2 = vector.load %arg2[%c0_3, %c0_4] : memref<8x64xf32, #tpu.memory_space<vmem>>, vector<8x64xf32>
    %c0_5 = arith.constant 0 : index
    %c0_6 = arith.constant 0 : index
    %3 = vector.load %arg3[%c0_5, %c0_6] : memref<8x64xf32, #tpu.memory_space<vmem>>, vector<8x64xf32>
    %cst = arith.constant 1.000000e+00 : f32
    %4 = vector.broadcast %cst : f32 to vector<4x64xf32>
    %c0_7 = arith.constant 0 : index
    %c0_8 = arith.constant 0 : index
    %5 = vector.load %arg0[%c0_7, %c0_8] : memref<64x32xf32, #tpu.memory_space<vmem>>, vector<64x32xf32>
    %c0_9 = arith.constant 0 : index
    %c0_10 = arith.constant 0 : index
    %6 = vector.load %arg5[%c0_9, %c0_10] : memref<32x32xf32, #tpu.memory_space<vmem>>, vector<32x32xf32>
    %cst_11 = arith.constant dense<0.000000e+00> : vector<64x32xf32>
    %7 = tpu.matmul %5, %6, %cst_11 {dimension_numbers = #tpu.dot_dimension_numbers<[1], [0], [0], [1], [0, 0, 1, 1], [], []>} : vector<64x32xf32>, vector<32x32xf32>, vector<64x32xf32> -> vector<64x32xf32>
    %c0_12 = arith.constant 0 : index
    %c0_13 = arith.constant 0 : index
    %8 = vector.load %arg6[%c0_12, %c0_13] : memref<1x32xf32, #tpu.memory_space<vmem>>, vector<1x32xf32>
    %9 = vector.broadcast %8 : vector<1x32xf32> to vector<64x32xf32>
    %10 = arith.addf %7, %9 : vector<64x32xf32>
    %11 = arith.truncf %10 : vector<64x32xf32> to vector<64x32xbf16>
    %c0_14 = arith.constant 0 : index
    %c0_15 = arith.constant 0 : index
    %12 = vector.load %arg9[%c0_14, %c0_15] : memref<256x32xbf16, #tpu.memory_space<vmem>>, vector<256x32xbf16>
    %cst_16 = arith.constant dense<0.000000e+00> : vector<256x64xf32>
    %13 = tpu.matmul %12, %11, %cst_16 {dimension_numbers = #tpu.dot_dimension_numbers<[1], [1], [0], [0], [0, 0, 1, 0], [], []>} : vector<256x32xbf16>, vector<64x32xbf16>, vector<256x64xf32> -> vector<256x64xf32>
    %c0_17 = arith.constant 0 : index
    %c0_18 = arith.constant 0 : index
    %14 = vector.load %arg7[%c0_17, %c0_18] : memref<32x4xf32, #tpu.memory_space<vmem>>, vector<32x4xf32>
    %cst_19 = arith.constant dense<0.000000e+00> : vector<64x4xf32>
    %15 = tpu.matmul %10, %14, %cst_19 {dimension_numbers = #tpu.dot_dimension_numbers<[1], [0], [0], [1], [0, 0, 1, 1], [], []>} : vector<64x32xf32>, vector<32x4xf32>, vector<64x4xf32> -> vector<64x4xf32>
    %c0_20 = arith.constant 0 : index
    %c0_21 = arith.constant 0 : index
    %16 = vector.load %arg8[%c0_20, %c0_21] : memref<1x4xf32, #tpu.memory_space<vmem>>, vector<1x4xf32>
    %17 = vector.broadcast %16 : vector<1x4xf32> to vector<64x4xf32>
    %18 = arith.addf %15, %17 : vector<64x4xf32>
    %19 = tpu.concatenate %18, %18, %18, %18 in 0 : vector<64x4xf32>, vector<64x4xf32>, vector<64x4xf32>, vector<64x4xf32> -> vector<256x4xf32>
    %20 = arith.mulf %19, %1 : vector<256x4xf32>
    %cst_22 = arith.constant dense<0.000000e+00> : vector<256x64xf32>
    %21 = tpu.matmul %20, %4, %cst_22 {dimension_numbers = #tpu.dot_dimension_numbers<[1], [0], [0], [1], [0, 0, 1, 1], [], []>} : vector<256x4xf32>, vector<4x64xf32>, vector<256x64xf32> -> vector<256x64xf32>
    %22 = arith.addf %21, %13 : vector<256x64xf32>
    %23 = math.tanh %22 : vector<256x64xf32>
    %24 = math.exp %23 : vector<256x64xf32>
    %25 = arith.mulf %0, %24 : vector<256x64xf32>
    %26 = arith.truncf %25 : vector<256x64xf32> to vector<256x64xbf16>
    %cst_23 = arith.constant dense<0.000000e+00> : vector<256x32xf32>
    %27 = tpu.matmul %26, %11, %cst_23 {dimension_numbers = #tpu.dot_dimension_numbers<[1], [0], [0], [1], [0, 0, 1, 1], [], []>} : vector<256x64xbf16>, vector<64x32xbf16>, vector<256x32xf32> -> vector<256x32xf32>
    %c0_24 = arith.constant 0 : index
    %c0_25 = arith.constant 0 : index
    %28 = vector.load %arg11[%c0_24, %c0_25] : memref<1x32xf32, #tpu.memory_space<vmem>>, vector<1x32xf32>
    %29 = vector.extract_strided_slice %27 {offsets = [0, 0], sizes = [64, 32], strides = [1, 1]} : vector<256x32xf32> to vector<64x32xf32>
    %c0_26 = arith.constant 0 : index
    %c0_27 = arith.constant 0 : index
    %30 = vector.load %arg10[%c0_26, %c0_27] : memref<128x32xf32, #tpu.memory_space<vmem>>, vector<32x32xf32>
    %cst_28 = arith.constant dense<0.000000e+00> : vector<64x32xf32>
    %31 = tpu.matmul %29, %30, %cst_28 {dimension_numbers = #tpu.dot_dimension_numbers<[1], [0], [0], [1], [0, 0, 1, 1], [], []>} : vector<64x32xf32>, vector<32x32xf32>, vector<64x32xf32> -> vector<64x32xf32>
    %32 = vector.broadcast %28 : vector<1x32xf32> to vector<64x32xf32>
    %33 = arith.addf %32, %31 : vector<64x32xf32>
    %34 = vector.extract_strided_slice %27 {offsets = [64, 0], sizes = [64, 32], strides = [1, 1]} : vector<256x32xf32> to vector<64x32xf32>
    %c32 = arith.constant 32 : index
    %c0_29 = arith.constant 0 : index
    %35 = vector.load %arg10[%c32, %c0_29] : memref<128x32xf32, #tpu.memory_space<vmem>>, vector<32x32xf32>
    %cst_30 = arith.constant dense<0.000000e+00> : vector<64x32xf32>
    %36 = tpu.matmul %34, %35, %cst_30 {dimension_numbers = #tpu.dot_dimension_numbers<[1], [0], [0], [1], [0, 0, 1, 1], [], []>} : vector<64x32xf32>, vector<32x32xf32>, vector<64x32xf32> -> vector<64x32xf32>
    %37 = arith.addf %33, %36 : vector<64x32xf32>
    %38 = vector.extract_strided_slice %27 {offsets = [128, 0], sizes = [64, 32], strides = [1, 1]} : vector<256x32xf32> to vector<64x32xf32>
    %c64 = arith.constant 64 : index
    %c0_31 = arith.constant 0 : index
    %39 = vector.load %arg10[%c64, %c0_31] : memref<128x32xf32, #tpu.memory_space<vmem>>, vector<32x32xf32>
    %cst_32 = arith.constant dense<0.000000e+00> : vector<64x32xf32>
    %40 = tpu.matmul %38, %39, %cst_32 {dimension_numbers = #tpu.dot_dimension_numbers<[1], [0], [0], [1], [0, 0, 1, 1], [], []>} : vector<64x32xf32>, vector<32x32xf32>, vector<64x32xf32> -> vector<64x32xf32>
    %41 = arith.addf %37, %40 : vector<64x32xf32>
    %42 = vector.extract_strided_slice %27 {offsets = [192, 0], sizes = [64, 32], strides = [1, 1]} : vector<256x32xf32> to vector<64x32xf32>
    %c96 = arith.constant 96 : index
    %c0_33 = arith.constant 0 : index
    %43 = vector.load %arg10[%c96, %c0_33] : memref<128x32xf32, #tpu.memory_space<vmem>>, vector<32x32xf32>
    %cst_34 = arith.constant dense<0.000000e+00> : vector<64x32xf32>
    %44 = tpu.matmul %42, %43, %cst_34 {dimension_numbers = #tpu.dot_dimension_numbers<[1], [0], [0], [1], [0, 0, 1, 1], [], []>} : vector<64x32xf32>, vector<32x32xf32>, vector<64x32xf32> -> vector<64x32xf32>
    %45 = arith.addf %41, %44 : vector<64x32xf32>
    %46 = math.tanh %45 : vector<64x32xf32>
    %c0_35 = arith.constant 0 : index
    %c0_36 = arith.constant 0 : index
    %47 = vector.load %arg12[%c0_35, %c0_36] : memref<32x32xf32, #tpu.memory_space<vmem>>, vector<32x32xf32>
    %cst_37 = arith.constant dense<0.000000e+00> : vector<64x32xf32>
    %48 = tpu.matmul %46, %47, %cst_37 {dimension_numbers = #tpu.dot_dimension_numbers<[1], [0], [0], [1], [0, 0, 1, 1], [], []>} : vector<64x32xf32>, vector<32x32xf32>, vector<64x32xf32> -> vector<64x32xf32>
    %c0_38 = arith.constant 0 : index
    %c0_39 = arith.constant 0 : index
    %49 = vector.load %arg13[%c0_38, %c0_39] : memref<1x32xf32, #tpu.memory_space<vmem>>, vector<1x32xf32>
    %50 = vector.broadcast %49 : vector<1x32xf32> to vector<64x32xf32>
    %51 = arith.addf %48, %50 : vector<64x32xf32>
    %52 = arith.truncf %51 : vector<64x32xf32> to vector<64x32xbf16>
    %c0_40 = arith.constant 0 : index
    %c0_41 = arith.constant 0 : index
    %53 = vector.load %arg16[%c0_40, %c0_41] : memref<256x32xbf16, #tpu.memory_space<vmem>>, vector<256x32xbf16>
    %cst_42 = arith.constant dense<0.000000e+00> : vector<256x64xf32>
    %54 = tpu.matmul %53, %52, %cst_42 {dimension_numbers = #tpu.dot_dimension_numbers<[1], [1], [0], [0], [0, 0, 1, 0], [], []>} : vector<256x32xbf16>, vector<64x32xbf16>, vector<256x64xf32> -> vector<256x64xf32>
    %c0_43 = arith.constant 0 : index
    %c0_44 = arith.constant 0 : index
    %55 = vector.load %arg14[%c0_43, %c0_44] : memref<32x4xf32, #tpu.memory_space<vmem>>, vector<32x4xf32>
    %cst_45 = arith.constant dense<0.000000e+00> : vector<64x4xf32>
    %56 = tpu.matmul %51, %55, %cst_45 {dimension_numbers = #tpu.dot_dimension_numbers<[1], [0], [0], [1], [0, 0, 1, 1], [], []>} : vector<64x32xf32>, vector<32x4xf32>, vector<64x4xf32> -> vector<64x4xf32>
    %c0_46 = arith.constant 0 : index
    %c0_47 = arith.constant 0 : index
    %57 = vector.load %arg15[%c0_46, %c0_47] : memref<1x4xf32, #tpu.memory_space<vmem>>, vector<1x4xf32>
    %58 = vector.broadcast %57 : vector<1x4xf32> to vector<64x4xf32>
    %59 = arith.addf %56, %58 : vector<64x4xf32>
    %60 = tpu.concatenate %59, %59, %59, %59 in 0 : vector<64x4xf32>, vector<64x4xf32>, vector<64x4xf32>, vector<64x4xf32> -> vector<256x4xf32>
    %61 = arith.mulf %60, %1 : vector<256x4xf32>
    %cst_48 = arith.constant dense<0.000000e+00> : vector<256x64xf32>
    %62 = tpu.matmul %61, %4, %cst_48 {dimension_numbers = #tpu.dot_dimension_numbers<[1], [0], [0], [1], [0, 0, 1, 1], [], []>} : vector<256x4xf32>, vector<4x64xf32>, vector<256x64xf32> -> vector<256x64xf32>
    %63 = arith.addf %62, %54 : vector<256x64xf32>
    %64 = math.tanh %63 : vector<256x64xf32>
    %65 = math.exp %64 : vector<256x64xf32>
    %66 = arith.mulf %0, %65 : vector<256x64xf32>
    %67 = arith.truncf %66 : vector<256x64xf32> to vector<256x64xbf16>
    %cst_49 = arith.constant dense<0.000000e+00> : vector<256x32xf32>
    %68 = tpu.matmul %67, %52, %cst_49 {dimension_numbers = #tpu.dot_dimension_numbers<[1], [0], [0], [1], [0, 0, 1, 1], [], []>} : vector<256x64xbf16>, vector<64x32xbf16>, vector<256x32xf32> -> vector<256x32xf32>
    %c0_50 = arith.constant 0 : index
    %c0_51 = arith.constant 0 : index
    %69 = vector.load %arg18[%c0_50, %c0_51] : memref<1x32xf32, #tpu.memory_space<vmem>>, vector<1x32xf32>
    %70 = vector.extract_strided_slice %68 {offsets = [0, 0], sizes = [64, 32], strides = [1, 1]} : vector<256x32xf32> to vector<64x32xf32>
    %c0_52 = arith.constant 0 : index
    %c0_53 = arith.constant 0 : index
    %71 = vector.load %arg17[%c0_52, %c0_53] : memref<128x32xf32, #tpu.memory_space<vmem>>, vector<32x32xf32>
    %cst_54 = arith.constant dense<0.000000e+00> : vector<64x32xf32>
    %72 = tpu.matmul %70, %71, %cst_54 {dimension_numbers = #tpu.dot_dimension_numbers<[1], [0], [0], [1], [0, 0, 1, 1], [], []>} : vector<64x32xf32>, vector<32x32xf32>, vector<64x32xf32> -> vector<64x32xf32>
    %73 = vector.broadcast %69 : vector<1x32xf32> to vector<64x32xf32>
    %74 = arith.addf %73, %72 : vector<64x32xf32>
    %75 = vector.extract_strided_slice %68 {offsets = [64, 0], sizes = [64, 32], strides = [1, 1]} : vector<256x32xf32> to vector<64x32xf32>
    %c32_55 = arith.constant 32 : index
    %c0_56 = arith.constant 0 : index
    %76 = vector.load %arg17[%c32_55, %c0_56] : memref<128x32xf32, #tpu.memory_space<vmem>>, vector<32x32xf32>
    %cst_57 = arith.constant dense<0.000000e+00> : vector<64x32xf32>
    %77 = tpu.matmul %75, %76, %cst_57 {dimension_numbers = #tpu.dot_dimension_numbers<[1], [0], [0], [1], [0, 0, 1, 1], [], []>} : vector<64x32xf32>, vector<32x32xf32>, vector<64x32xf32> -> vector<64x32xf32>
    %78 = arith.addf %74, %77 : vector<64x32xf32>
    %79 = vector.extract_strided_slice %68 {offsets = [128, 0], sizes = [64, 32], strides = [1, 1]} : vector<256x32xf32> to vector<64x32xf32>
    %c64_58 = arith.constant 64 : index
    %c0_59 = arith.constant 0 : index
    %80 = vector.load %arg17[%c64_58, %c0_59] : memref<128x32xf32, #tpu.memory_space<vmem>>, vector<32x32xf32>
    %cst_60 = arith.constant dense<0.000000e+00> : vector<64x32xf32>
    %81 = tpu.matmul %79, %80, %cst_60 {dimension_numbers = #tpu.dot_dimension_numbers<[1], [0], [0], [1], [0, 0, 1, 1], [], []>} : vector<64x32xf32>, vector<32x32xf32>, vector<64x32xf32> -> vector<64x32xf32>
    %82 = arith.addf %78, %81 : vector<64x32xf32>
    %83 = vector.extract_strided_slice %68 {offsets = [192, 0], sizes = [64, 32], strides = [1, 1]} : vector<256x32xf32> to vector<64x32xf32>
    %c96_61 = arith.constant 96 : index
    %c0_62 = arith.constant 0 : index
    %84 = vector.load %arg17[%c96_61, %c0_62] : memref<128x32xf32, #tpu.memory_space<vmem>>, vector<32x32xf32>
    %cst_63 = arith.constant dense<0.000000e+00> : vector<64x32xf32>
    %85 = tpu.matmul %83, %84, %cst_63 {dimension_numbers = #tpu.dot_dimension_numbers<[1], [0], [0], [1], [0, 0, 1, 1], [], []>} : vector<64x32xf32>, vector<32x32xf32>, vector<64x32xf32> -> vector<64x32xf32>
    %86 = arith.addf %82, %85 : vector<64x32xf32>
    %87 = math.tanh %86 : vector<64x32xf32>
    %88 = tpu.concatenate %46, %87 in 1 : vector<64x32xf32>, vector<64x32xf32> -> vector<64x64xf32>
    %cst_64 = arith.constant dense<0.000000e+00> : vector<8x64xf32>
    %89 = tpu.matmul %2, %88, %cst_64 {dimension_numbers = #tpu.dot_dimension_numbers<[1], [0], [0], [1], [0, 0, 1, 1], [], []>} : vector<8x64xf32>, vector<64x64xf32>, vector<8x64xf32> -> vector<8x64xf32>
    %cst_65 = arith.constant dense<0.000000e+00> : vector<8x64xf32>
    %90 = tpu.matmul %3, %88, %cst_65 {dimension_numbers = #tpu.dot_dimension_numbers<[1], [0], [0], [1], [0, 0, 1, 1], [], []>} : vector<8x64xf32>, vector<64x64xf32>, vector<8x64xf32> -> vector<8x64xf32>
    %91 = tpu.concatenate %89, %90 in 1 : vector<8x64xf32>, vector<8x64xf32> -> vector<8x128xf32>
    %92 = vector.extract_strided_slice %91 {offsets = [0, 0], sizes = [4, 128], strides = [1, 1]} : vector<8x128xf32> to vector<4x128xf32>
    %c0_66 = arith.constant 0 : index
    %c0_67 = arith.constant 0 : index
    %93 = vector.load %arg19[%c0_66, %c0_67] : memref<128x32xf32, #tpu.memory_space<vmem>>, vector<128x32xf32>
    %cst_68 = arith.constant dense<0.000000e+00> : vector<4x32xf32>
    %94 = tpu.matmul %92, %93, %cst_68 {dimension_numbers = #tpu.dot_dimension_numbers<[1], [0], [0], [1], [0, 0, 1, 1], [], []>} : vector<4x128xf32>, vector<128x32xf32>, vector<4x32xf32> -> vector<4x32xf32>
    %c0_69 = arith.constant 0 : index
    %c0_70 = arith.constant 0 : index
    %95 = vector.load %arg20[%c0_69, %c0_70] : memref<1x32xf32, #tpu.memory_space<vmem>>, vector<1x32xf32>
    %96 = vector.broadcast %95 : vector<1x32xf32> to vector<4x32xf32>
    %97 = arith.addf %94, %96 : vector<4x32xf32>
    %cst_71 = arith.constant 0.000000e+00 : f32
    %98 = vector.broadcast %cst_71 : f32 to vector<4x32xf32>
    %99 = arith.maximumf %97, %98 : vector<4x32xf32>
    %c0_72 = arith.constant 0 : index
    %c0_73 = arith.constant 0 : index
    %100 = vector.load %arg21[%c0_72, %c0_73] : memref<32x32xf32, #tpu.memory_space<vmem>>, vector<32x32xf32>
    %cst_74 = arith.constant dense<0.000000e+00> : vector<4x32xf32>
    %101 = tpu.matmul %99, %100, %cst_74 {dimension_numbers = #tpu.dot_dimension_numbers<[1], [0], [0], [1], [0, 0, 1, 1], [], []>} : vector<4x32xf32>, vector<32x32xf32>, vector<4x32xf32> -> vector<4x32xf32>
    %c0_75 = arith.constant 0 : index
    %c0_76 = arith.constant 0 : index
    %102 = vector.load %arg22[%c0_75, %c0_76] : memref<1x32xf32, #tpu.memory_space<vmem>>, vector<1x32xf32>
    %103 = vector.broadcast %102 : vector<1x32xf32> to vector<4x32xf32>
    %104 = arith.addf %101, %103 : vector<4x32xf32>
    %cst_77 = arith.constant 0.000000e+00 : f32
    %105 = vector.broadcast %cst_77 : f32 to vector<4x32xf32>
    %106 = arith.maximumf %104, %105 : vector<4x32xf32>
    %c0_78 = arith.constant 0 : index
    %c0_79 = arith.constant 0 : index
    %107 = vector.load %arg23[%c0_78, %c0_79] : memref<32x16xf32, #tpu.memory_space<vmem>>, vector<32x16xf32>
    %cst_80 = arith.constant dense<0.000000e+00> : vector<4x16xf32>
    %108 = tpu.matmul %106, %107, %cst_80 {dimension_numbers = #tpu.dot_dimension_numbers<[1], [0], [0], [1], [0, 0, 1, 1], [], []>} : vector<4x32xf32>, vector<32x16xf32>, vector<4x16xf32> -> vector<4x16xf32>
    %c0_81 = arith.constant 0 : index
    %c0_82 = arith.constant 0 : index
    %109 = vector.load %arg24[%c0_81, %c0_82] : memref<1x16xf32, #tpu.memory_space<vmem>>, vector<1x16xf32>
    %110 = vector.broadcast %109 : vector<1x16xf32> to vector<4x16xf32>
    %111 = arith.addf %108, %110 : vector<4x16xf32>
    %cst_83 = arith.constant 0.000000e+00 : f32
    %112 = vector.broadcast %cst_83 : f32 to vector<4x16xf32>
    %113 = arith.maximumf %111, %112 : vector<4x16xf32>
    %c0_84 = arith.constant 0 : index
    %c0_85 = arith.constant 0 : index
    %114 = vector.load %arg25[%c0_84, %c0_85] : memref<16x2xf32, #tpu.memory_space<vmem>>, vector<16x2xf32>
    %cst_86 = arith.constant dense<0.000000e+00> : vector<4x2xf32>
    %115 = tpu.matmul %113, %114, %cst_86 {dimension_numbers = #tpu.dot_dimension_numbers<[1], [0], [0], [1], [0, 0, 1, 1], [], []>} : vector<4x16xf32>, vector<16x2xf32>, vector<4x2xf32> -> vector<4x2xf32>
    %c0_87 = arith.constant 0 : index
    %c0_88 = arith.constant 0 : index
    %116 = vector.load %arg26[%c0_87, %c0_88] : memref<1x2xf32, #tpu.memory_space<vmem>>, vector<1x2xf32>
    %117 = vector.broadcast %116 : vector<1x2xf32> to vector<4x2xf32>
    %118 = arith.addf %115, %117 : vector<4x2xf32>
    %c0_89 = arith.constant 0 : index
    %c0_90 = arith.constant 0 : index
    %119 = vector.load %arg31[%c0_89, %c0_90] : memref<4x2xf32, #tpu.memory_space<vmem>>, vector<4x2xf32>
    tpu.vector_store %arg31[%c0_89, %c0_90], %118 {strides = array<i32>} : memref<4x2xf32, #tpu.memory_space<vmem>>, vector<4x2xf32>,
    %c0_91 = arith.constant 0 : index
    %c0_92 = arith.constant 0 : index
    %120 = vector.load %arg27[%c0_91, %c0_92] : memref<128x32xf32, #tpu.memory_space<vmem>>, vector<128x32xf32>
    %cst_93 = arith.constant dense<0.000000e+00> : vector<8x32xf32>
    %121 = tpu.matmul %91, %120, %cst_93 {dimension_numbers = #tpu.dot_dimension_numbers<[1], [0], [0], [1], [0, 0, 1, 1], [], []>} : vector<8x128xf32>, vector<128x32xf32>, vector<8x32xf32> -> vector<8x32xf32>
    %c0_94 = arith.constant 0 : index
    %c0_95 = arith.constant 0 : index
    %122 = vector.load %arg28[%c0_94, %c0_95] : memref<1x32xf32, #tpu.memory_space<vmem>>, vector<1x32xf32>
    %123 = vector.broadcast %122 : vector<1x32xf32> to vector<8x32xf32>
    %124 = arith.addf %121, %123 : vector<8x32xf32>
    %cst_96 = arith.constant 0.000000e+00 : f32
    %125 = vector.broadcast %cst_96 : f32 to vector<8x32xf32>
    %126 = arith.maximumf %124, %125 : vector<8x32xf32>
    %c0_97 = arith.constant 0 : index
    %c0_98 = arith.constant 0 : index
    %127 = vector.load %arg29[%c0_97, %c0_98] : memref<32x2xf32, #tpu.memory_space<vmem>>, vector<32x2xf32>
    %cst_99 = arith.constant dense<0.000000e+00> : vector<8x2xf32>
    %128 = tpu.matmul %126, %127, %cst_99 {dimension_numbers = #tpu.dot_dimension_numbers<[1], [0], [0], [1], [0, 0, 1, 1], [], []>} : vector<8x32xf32>, vector<32x2xf32>, vector<8x2xf32> -> vector<8x2xf32>
    %c0_100 = arith.constant 0 : index
    %c0_101 = arith.constant 0 : index
    %129 = vector.load %arg30[%c0_100, %c0_101] : memref<1x2xf32, #tpu.memory_space<vmem>>, vector<1x2xf32>
    %130 = vector.broadcast %129 : vector<1x2xf32> to vector<8x2xf32>
    %131 = arith.addf %128, %130 : vector<8x2xf32>
    %c0_102 = arith.constant 0 : index
    %c0_103 = arith.constant 0 : index
    %132 = vector.load %arg32[%c0_102, %c0_103] : memref<8x2xf32, #tpu.memory_space<vmem>>, vector<8x2xf32>
    tpu.vector_store %arg32[%c0_102, %c0_103], %131 {strides = array<i32>} : memref<8x2xf32, #tpu.memory_space<vmem>>, vector<8x2xf32>,
    return
  }
}

</mosaic_0001>

<bundles_post_ra>
// kernel: tpu_custom_call.1
= control target key start
LH: loop header
LB: loop body
LE: loop exit
PB: predicated region body
PF: predicated region fallthrough
CT: control target
= control target key end

     0   :  { %s6773_s3 = smov 5   ;;  %s6774_s10 = smov 7   ;;  %vm219_vm0 = vcmask 261120   ;;  %vm955_vm1 = vcmask 1043456   ;;  %v6775_v20 = vmov 1.0   ;;  %vm858_vm2 = vcmask 31744   ;;  %s7814_s0 = inlined_call_operand.smem [shape: u32[33], index: -1, kind: input, shape index: {}] }
   0x1   :  { %s4751_s6 = sld [smem:[%s7814_s0 + %s6773_s3]]   ;;  %s6776_s14 = smov 9   ;;  %vm1328_vm3 = vcmask 523264   ;;  %vm6792_vm4 = vmmov 0   ;;  %vm4483_vm5 = vcmask 130048   ;;  %vm4557_vm6 = vcmask 11264  }
   0x2   :  { %s6821_s9 = sld [smem:[%s7814_s0]]   ;;  %s6777_s18 = smov 6   ;;  %vm4737_vm7 = vcmask 15360  }
   0x3   :  { %s4753_s13 = sld [smem:[%s7814_s0 + %s6774_s10]]   ;;  %s6778_s22 = smov 8  }
   0x4   :  { %s6847_s17 = sld [smem:[%s7814_s0 + %s6776_s14]]   ;;  %s6779_s26 = smov 4  }
   0x5   :  { %s4752_s21 = sld [smem:[%s7814_s0 + %s6777_s18]]   ;;  %s6780_s30 = smov 10  }
   0x6   :  { %s4754_s25 = sld [smem:[%s7814_s0 + %s6778_s22]]   ;;  %s6781_s4 = smov 1  }
   0x7   :  { %v208_v0 = vld [vmem:[%s4751_s6] sm:$0xff]  ;;  %v209_v1 = vld [vmem:[%s4751_s6 + $0x8] sm:$0xff]  ;;  %v210_v2 = vld [vmem:[%s4751_s6 + $0x10] sm:$0xff]  ;;  %s6933_s29 = sld [smem:[%s7814_s0 + %s6779_s26]]   ;;  %s6782_s8 = smov 12  }
   0x8   :  { %v6063_v3 = vpack.c.bf16 %v209_v1, %v208_v0  ;;  %v211_v4 = vld [vmem:[%s4751_s6 + $0x18] sm:$0xff]  ;;  %v200_v5 = vld [vmem:[%s6821_s9] sm:$0xff]  ;;  %v201_v12 = vld [vmem:[%s6821_s9 + $0x8] sm:$0xff]  ;;  %s7111_s3 = sld [smem:[%s7814_s0 + %s6780_s30]]   ;;  %s6783_s12 = smov 14  }
   0x9   :  { %v6067_v6 = vpack.c.bf16 %v211_v4, %v210_v2  ;;  %5423 = vmatprep.mubr.msk.f32.mxu0 %vm219_vm0, %v200_v5  ;;  %v686_v7 = vld [vmem:[%s4753_s13] sm:$0xff]  ;;  %v687_v8 = vld [vmem:[%s4753_s13 + $0x8] sm:$0xff]  ;;  %v688_v10 = vld [vmem:[%s4753_s13 + $0x10] sm:$0xff]  ;;  %s7125_s7 = sld [smem:[%s7814_s0 + %s6781_s4]]   ;;  %s6784_s16 = smov 11  }
   0xa   :  { %6064 = vmatprep.subr.bf16.mxu0 %v6063_v3  ;;  %v6071_v9 = vpack.c.bf16 %v687_v8, %v686_v7  ;;  %v689_v11 = vld [vmem:[%s4753_s13 + $0x18] sm:$0xff]  ;;  %v202_v13 = vld [vmem:[%s6821_s9 + $0x10] sm:$0xff]  ;;  %v204_v16 = vld [vmem:[%s6821_s9 + $0x20] sm:$0xff]  ;;  %s4758_s11 = sld [smem:[%s7814_s0 + %s6782_s8]]   ;;  %s6785_s20 = smov 16  }
   0xb   :  { %6066 = vmatpush3.bf16.msra.mxu0 %v6063_v3  ;;  %v6075_v14 = vpack.c.bf16 %v689_v11, %v688_v10  ;;  %v203_v15 = vld [vmem:[%s6821_s9 + $0x18] sm:$0xff]  ;;  %v205_v17 = vld [vmem:[%s6821_s9 + $0x28] sm:$0xff]  ;;  %v206_v18 = vld [vmem:[%s6821_s9 + $0x30] sm:$0xff]  ;;  %s4760_s15 = sld [smem:[%s7814_s0 + %s6783_s12]]   ;;  %s6786_s24 = smov 13  }
   0xc   :  { %6068 = vmatprep.subr.bf16.mxu0 %v6067_v6  ;;  %v207_v19 = vld [vmem:[%s6821_s9 + $0x38] sm:$0xff]  ;;  %v6389_v21 = vld [vmem:[%s6847_s17] sm:$0xff]   ;;  %v6390_v47 = vld [vmem:[%s6847_s17 + $0x8] sm:$0xff]   ;;  %s4757_s19 = sld [smem:[%s7814_s0 + %s6784_s16]]   ;;  %s6787_s28 = smov 15  }
   0xd   :  { %5443 = vmatprep.mubr.msk.bf16.mxu1 %vm219_vm0, %v6389_v21  ;;  %v4779_v22 = vld [vmem:[%s4752_s21] ss:$0 sm:$0xff]  ;;  %v6391_v48 = vld [vmem:[%s6847_s17 + $0x10] sm:$0xff]   ;;  %v6392_v49 = vld [vmem:[%s6847_s17 + $0x18] sm:$0xff]   ;;  %s7291_s23 = sld [smem:[%s7814_s0 + %s6785_s20]]   ;;  %s6789_s6 = smov 18  }
   0xe   :  { %v6393_v50 = vld [vmem:[%s6847_s17 + $0x20] sm:$0xff]   ;;  %v6394_v51 = vld [vmem:[%s6847_s17 + $0x28] sm:$0xff]   ;;  %v6395_v52 = vld [vmem:[%s6847_s17 + $0x30] sm:$0xff]   ;;  %s4759_s27 = sld [smem:[%s7814_s0 + %s6786_s24]]   ;;  %s6791_s10 = smov 32  }
   0xf   :  { %6070 = vmatpush3.bf16.msra.mxu0 %v6067_v6  ;;  %v6396_v53 = vld [vmem:[%s6847_s17 + $0x38] sm:$0xff]   ;;  %v6397_v54 = vld [vmem:[%s6847_s17 + $0x40] sm:$0xff]   ;;  %v6398_v55 = vld [vmem:[%s6847_s17 + $0x48] sm:$0xff]   ;;  %s4761_s2 = sld [smem:[%s7814_s0 + %s6787_s28]]   ;;  %s6799_s28 = smov 20  }
  0x10   :  { %6072 = vmatprep.subr.bf16.mxu0 %v6071_v9  ;;  %v6399_v56 = vld [vmem:[%s6847_s17 + $0x50] sm:$0xff]   ;;  %v6400_v57 = vld [vmem:[%s6847_s17 + $0x58] sm:$0xff]   ;;  %v6401_v58 = vld [vmem:[%s6847_s17 + $0x60] sm:$0xff]   ;;  %s4764_s9 = sld [smem:[%s7814_s0 + %s6789_s6]]   ;;  %s6801_s6 = smov 22  }
  0x11   :  { %v6402_v59 = vld [vmem:[%s6847_s17 + $0x68] sm:$0xff]   ;;  %v6403_v60 = vld [vmem:[%s6847_s17 + $0x70] sm:$0xff]   ;;  %v6404_v61 = vld [vmem:[%s6847_s17 + $0x78] sm:$0xff]   ;;  %s4778_s16 = sld [smem:[%s7814_s0 + %s6791_s10]]  }
  0x12   :  { %5424 = vmatmul.mubr.msk.f32.vlgmr.msra.gmra.mrb[0].mxu0 %vm219_vm0, %v201_v12  ;;  %v4820_v62 = vld [vmem:[%s4754_s25] ss:$0 sm:$0xff]  ;;  %v167_v3 = vld [vmem:[%s6933_s29 + $0x8] sm:$0xff]  ;;  %v168_v10 = vld [vmem:[%s6933_s29 + $0x10] sm:$0xff] }
  0x13   :  { %5426 = vmatprep.mubr.msk.f32.mxu0 %vm219_vm0, %v202_v13  ;;  %6074 = vmatpush3.bf16.msra.mxu0 %v6071_v9  ;;  %v166_v2 = vld [vmem:[%s6933_s29] sm:$0xff]  ;;  %v169_v12 = vld [vmem:[%s6933_s29 + $0x18] sm:$0xff]  ;;  %v171_v21 = vld [vmem:[%s6933_s29 + $0x28] sm:$0xff] }
  0x14   :  { %6076 = vmatprep.subr.bf16.mxu0 %v6075_v14 }
  0x16   :  { %5427 = vmatmul.mubr.msk.f32.gmra.mrb[2].mxu0 %vm219_vm0, %v203_v15 }
  0x17   :  { %5429 = vmatprep.mubr.msk.f32.mxu0 %vm219_vm0, %v204_v16  ;;  %6078 = vmatpush3.bf16.msra.mxu0 %v6075_v14 }
  0x18   :  { %5495 = vmatprep.subr.msk.mxu0 %vm955_vm1, %v6775_v20 }
  0x1a   :  { %5430 = vmatmul.mubr.msk.f32.gmra.mrb[4].mxu0 %vm219_vm0, %v205_v17 }
  0x1b   :  { %5432 = vmatprep.mubr.msk.f32.mxu0 %vm219_vm0, %v206_v18  ;;  %v170_v18 = vld [vmem:[%s6933_s29 + $0x20] sm:$0xff] }
  0x1e   :  { %5433 = vmatmul.mubr.msk.f32.gmra.mrb[6].mxu0 %vm219_vm0, %v207_v19 }
  0xe5   :  { %v5425_v23 = vpop.f32.mrb[0].mxu0 }
  0xe6   :  { %v316_v24 = vadd.f32 %v5425_v23, %v4779_v22  ;;  %v310_v25 = vpop.f32.mrb[1].mxu0 }
  0xe7   :  { %v311_v26 = vadd.f32 %v4779_v22, %v310_v25 }
  0xe9   :  { %v6854_v27 = vpack.c.bf16 %v316_v24, %v311_v26  ;;  %v5428_v28 = vpop.f32.mrb[2].mxu0  ;;  %5483 = vmatprep.mubr.msk.f32.mxu0 %vm219_vm0, %v311_v26 }
  0xea   :  { %v326_v29 = vadd.f32 %v5428_v28, %v4779_v22  ;;  %v320_v30 = vpop.f32.mrb[3].mxu0  ;;  %5484 = vmatmul.mubr.msk.f32.vlgmr.msra.gmra.mrb[8].mxu0 %vm219_vm0, %v316_v24 }
  0xeb   :  { %v321_v31 = vadd.f32 %v4779_v22, %v320_v30  ;;  %5496 = vmatpush3.msk.msra.mxu0 %vm955_vm1, %v6775_v20  ;;  %6324 = vmatprep.subr.msk.bf16.mxu1 %vm219_vm0, %v6854_v27  ;;  %v514_v32 = vsel %vm219_vm0, %v6854_v27, 0  ;;  %v174_v30 = vld [vmem:[%s6933_s29 + $0x40] sm:$0xff] }
  0xec   :  { %5545 = vmatprep.subr.bf16.mxu0 %v6854_v27  ;;  %5436 = vmatpush3.bf16.xpose.msra.mxu1 %v514_v32 }
  0xed   :  { %v6865_v33 = vpack.c.bf16 %v326_v29, %v321_v31  ;;  %v5431_v34 = vpop.f32.mrb[4].mxu0  ;;  %5486 = vmatprep.mubr.msk.f32.mxu0 %vm219_vm0, %v321_v31 }
  0xee   :  { %v336_v35 = vadd.f32 %v5431_v34, %v4779_v22  ;;  %v330_v36 = vpop.f32.mrb[5].mxu0  ;;  %5487 = vmatmul.mubr.msk.f32.gmra.mrb[10].mxu0 %vm219_vm0, %v326_v29  ;;  %v173_v29 = vld [vmem:[%s6933_s29 + $0x38] sm:$0xff]  ;;  %v175_v34 = vld [vmem:[%s6933_s29 + $0x48] sm:$0xff] }
  0xef   :  { %v331_v37 = vadd.f32 %v4779_v22, %v330_v36  ;;  %6325 = vmatprep.subr.msk.bf16.mxu1 %vm219_vm0, %v6865_v33  ;;  %v517_v43 = vsel %vm219_vm0, %v6865_v33, 0 }
  0xf1   :  { %v6871_v38 = vpack.c.bf16 %v336_v35, %v331_v37  ;;  %v5434_v39 = vpop.f32.mrb[6].mxu0  ;;  %5489 = vmatprep.mubr.msk.f32.mxu0 %vm219_vm0, %v331_v37 }
  0xf2   :  { %v346_v40 = vadd.f32 %v5434_v39, %v4779_v22  ;;  %v340_v41 = vpop.f32.mrb[7].mxu0  ;;  %5490 = vmatmul.mubr.msk.f32.gmra.mrb[12].mxu0 %vm219_vm0, %v336_v35  ;;  %v176_v35 = vld [vmem:[%s6933_s29 + $0x50] sm:$0xff]  ;;  %v178_v39 = vld [vmem:[%s6933_s29 + $0x60] sm:$0xff] }
  0xf3   :  { %v341_v42 = vadd.f32 %v4779_v22, %v340_v41  ;;  %v520_v45 = vsel %vm219_vm0, %v6871_v38, 0 }
  0xf4   :  { %5438 = vmatpush3.bf16.xpose.msra.mxu1 %v517_v43  ;;  %v180_v43 = vld [vmem:[%s6933_s29 + $0x70] sm:$0xff] }
  0xf5   :  { %v6877_v44 = vpack.c.bf16 %v346_v40, %v341_v42  ;;  %6326 = vmatprep.subr.msk.bf16.mxu1 %vm219_vm0, %v6871_v38  ;;  %5492 = vmatprep.mubr.msk.f32.mxu0 %vm219_vm0, %v341_v42  ;;  %v179_v42 = vld [vmem:[%s6933_s29 + $0x68] sm:$0xff] }
  0xf6   :  { %5493 = vmatmul.mubr.msk.f32.gmra.mrb[14].mxu0 %vm219_vm0, %v346_v40 }
  0xf7   :  { %v523_v46 = vsel %vm219_vm0, %v6877_v44, 0 }
  0xfc   :  { %5440 = vmatpush3.bf16.xpose.msra.mxu1 %v520_v45 }
  0xfd   :  { %6327 = vmatprep.subr.msk.bf16.mxu1 %vm219_vm0, %v6877_v44 }
 0x104   :  { %5442 = vmatpush3.bf16.xpose.msra.mxu1 %v523_v46  ;;  %v181_v46 = vld [vmem:[%s6933_s29 + $0x78] sm:$0xff] }
 0x105   :  { %6252 = vmatprep.subr.bf16.mxu1 %v6854_v27 }
 0x10b   :  { %5444 = vmatmul.mubr.msk.bf16.vlgmr.msra.gmra.mrb[0].mxu1 %vm219_vm0, %v6390_v47  ;;  %v182_v47 = vld [vmem:[%s6933_s29 + $0x80] sm:$0xff] }
 0x10c   :  { %6256 = vmatpush3.bf16.msra.mxu1 %v6854_v27  ;;  %5447 = vmatprep.mubr.msk.bf16.mxu1 %vm219_vm0, %v6391_v48 }
 0x10d   :  { %6253 = vmatprep.subr.bf16.mxu1 %v6865_v33 }
 0x110   :  { %6257 = vmatpush3.bf16.msra.mxu1 %v6865_v33 }
 0x111   :  { %6254 = vmatprep.subr.bf16.mxu1 %v6871_v38 }
 0x113   :  { %5448 = vmatmul.mubr.msk.bf16.gmra.mrb[4].mxu1 %vm219_vm0, %v6392_v49 }
 0x114   :  { %6258 = vmatpush3.bf16.msra.mxu1 %v6871_v38  ;;  %5451 = vmatprep.mubr.msk.bf16.mxu1 %vm219_vm0, %v6393_v50 }
 0x115   :  { %6255 = vmatprep.subr.bf16.mxu1 %v6877_v44 }
 0x118   :  { %6259 = vmatpush3.bf16.msra.mxu1 %v6877_v44 }
 0x11b   :  { %5452 = vmatmul.mubr.msk.bf16.gmra.mrb[8].mxu1 %vm219_vm0, %v6394_v51  ;;  %v183_v51 = vld [vmem:[%s6933_s29 + $0x88] sm:$0xff] }
 0x11c   :  { %5455 = vmatprep.mubr.msk.bf16.mxu1 %vm219_vm0, %v6395_v52 }
 0x123   :  { %5456 = vmatmul.mubr.msk.bf16.gmra.mrb[12].mxu1 %vm219_vm0, %v6396_v53  ;;  %v184_v53 = vld [vmem:[%s6933_s29 + $0x90] sm:$0xff] }
 0x124   :  { %5459 = vmatprep.mubr.msk.bf16.mxu1 %vm219_vm0, %v6397_v54 }
 0x12b   :  { %5460 = vmatmul.mubr.msk.bf16.gmra.mrb[16].mxu1 %vm219_vm0, %v6398_v55 }
 0x12c   :  { %5463 = vmatprep.mubr.msk.bf16.mxu1 %vm219_vm0, %v6399_v56 }
 0x133   :  { %5464 = vmatmul.mubr.msk.bf16.gmra.mrb[20].mxu1 %vm219_vm0, %v6400_v57 }
 0x134   :  { %5467 = vmatprep.mubr.msk.bf16.mxu1 %vm219_vm0, %v6401_v58  ;;  %v185_v58 = vld [vmem:[%s6933_s29 + $0x98] sm:$0xff] }
 0x13b   :  { %5468 = vmatmul.mubr.msk.bf16.gmra.mrb[24].mxu1 %vm219_vm0, %v6402_v59  ;;  %v186_v59 = vld [vmem:[%s6933_s29 + $0xa0] sm:$0xff] }
 0x13c   :  { %5471 = vmatprep.mubr.msk.bf16.mxu1 %vm219_vm0, %v6403_v60 }
 0x143   :  { %5472 = vmatmul.mubr.msk.bf16.gmra.mrb[28].mxu1 %vm219_vm0, %v6404_v61 }
 0x1bd   :  { %v5485_v63 = vpop.f32.mrb[8].mxu0 }
 0x1be   :  { %v6935_v0 = vadd.f32 %v5485_v63, %v4820_v62  ;;  %v787_v1 = vpop.f32.mrb[9].mxu0  ;;  %v188_v63 = vld [vmem:[%s6933_s29 + $0xb0] sm:$0xff] }
 0x1bf   :  { %v6939_v4 = vadd.f32 %v4820_v62, %v787_v1 }
 0x1c0   :  { %v827_v7 = vmul.f32 %v6935_v0, %v167_v3  ;;  %v835_v36 = vmul.f32 %v6935_v0, %v175_v34  ;;  %v843_v56 = vmul.f32 %v6935_v0, %v183_v51  ;;  %v189_v3 = vld [vmem:[%s6933_s29 + $0xb8] sm:$0xff]  ;;  %v1540_v51 = vld [vmem:[%s7111_s3 + $0x8] sm:$0xff] }
 0x1c1   :  { %v5488_v5 = vpop.f32.mrb[10].mxu0  ;;  %v826_v6 = vmul.f32 %v6939_v4, %v166_v2  ;;  %v842_v50 = vmul.f32 %v6939_v4, %v182_v47 }
 0x1c2   :  { %v6943_v8 = vadd.f32 %v5488_v5, %v4820_v62  ;;  %v797_v9 = vpop.f32.mrb[11].mxu0  ;;  %v190_v5 = vld [vmem:[%s6933_s29 + $0xc0] sm:$0xff] }
 0x1c3   :  { %v6946_v11 = vadd.f32 %v4820_v62, %v797_v9  ;;  %5497 = vmatprep.mubr.msk.f32.mxu0 %vm858_vm2, %v826_v6  ;;  %v191_v9 = vld [vmem:[%s6933_s29 + $0xc8] sm:$0xff] }
 0x1c4   :  { %5498 = vmatmul.mubr.msk.f32.vlgmr.msra.gmra.mrb[16].mxu0 %vm858_vm2, %v827_v7  ;;  %v829_v17 = vmul.f32 %v6943_v8, %v169_v12  ;;  %v845_v60 = vmul.f32 %v6943_v8, %v185_v58  ;;  %v850_v7 = vmul.f32 %v6939_v4, %v190_v5  ;;  %v851_v12 = vmul.f32 %v6935_v0, %v191_v9 }
 0x1c5   :  { %5546 = vmatpush3.bf16.msra.mxu0 %v6854_v27  ;;  %v5491_v13 = vpop.f32.mrb[12].mxu0  ;;  %v828_v14 = vmul.f32 %v6946_v11, %v168_v10  ;;  %v172_v27 = vld [vmem:[%s6933_s29 + $0x30] sm:$0xff]  ;;  %v836_v37 = vmul.f32 %v6946_v11, %v176_v35  ;;  %v844_v57 = vmul.f32 %v6946_v11, %v184_v53 }
 0x1c6   :  { %v6953_v15 = vadd.f32 %v5491_v13, %v4820_v62  ;;  %5547 = vmatprep.subr.bf16.mxu0 %v6865_v33  ;;  %v807_v16 = vpop.f32.mrb[13].mxu0  ;;  %v192_v10 = vld [vmem:[%s6933_s29 + $0xd0] sm:$0xff] }
 0x1c7   :  { %v6958_v19 = vadd.f32 %v4820_v62, %v807_v16  ;;  %5500 = vmatprep.mubr.msk.f32.mxu0 %vm858_vm2, %v828_v14  ;;  %v852_v13 = vmul.f32 %v6946_v11, %v192_v10  ;;  %v193_v14 = vld [vmem:[%s6933_s29 + $0xd8] sm:$0xff]  ;;  %v194_v16 = vld [vmem:[%s6933_s29 + $0xe0] sm:$0xff] }
 0x1c8   :  { %5501 = vmatmul.mubr.msk.f32.gmra.mrb[18].mxu0 %vm858_vm2, %v829_v17  ;;  %v831_v26 = vmul.f32 %v6953_v15, %v171_v21  ;;  %v853_v17 = vmul.f32 %v6943_v8, %v193_v14  ;;  %v196_v21 = vld [vmem:[%s6933_s29 + $0xf0] sm:$0xff] }
 0x1c9   :  { %5548 = vmatpush3.bf16.msra.mxu0 %v6865_v33  ;;  %v5494_v22 = vpop.f32.mrb[14].mxu0  ;;  %v830_v23 = vmul.f32 %v6958_v19, %v170_v18  ;;  %v834_v33 = vmul.f32 %v6939_v4, %v174_v30  ;;  %v838_v41 = vmul.f32 %v6958_v19, %v178_v39  ;;  %v846_v61 = vmul.f32 %v6958_v19, %v186_v59  ;;  %v195_v18 = vld [vmem:[%s6933_s29 + $0xe8] sm:$0xff] }
 0x1ca   :  { %v6965_v24 = vadd.f32 %v5494_v22, %v4820_v62  ;;  %5549 = vmatprep.subr.bf16.mxu0 %v6871_v38  ;;  %v817_v25 = vpop.f32.mrb[15].mxu0  ;;  %v854_v4 = vmul.f32 %v6958_v19, %v194_v16  ;;  %v855_v0 = vmul.f32 %v6953_v15, %v195_v18  ;;  %v197_v22 = vld [vmem:[%s6933_s29 + $0xf8] sm:$0xff] }
 0x1cb   :  { %v6970_v28 = vadd.f32 %v4820_v62, %v817_v25  ;;  %5503 = vmatprep.mubr.msk.f32.mxu0 %vm858_vm2, %v830_v23  ;;  %v187_v62 = vld [vmem:[%s6933_s29 + $0xa8] sm:$0xff] }
 0x1cc   :  { %5504 = vmatmul.mubr.msk.f32.gmra.mrb[20].mxu0 %vm858_vm2, %v831_v26  ;;  %v833_v32 = vmul.f32 %v6965_v24, %v173_v29  ;;  %v841_v48 = vmul.f32 %v6965_v24, %v181_v46  ;;  %v847_v1 = vmul.f32 %v6953_v15, %v187_v62  ;;  %v849_v6 = vmul.f32 %v6965_v24, %v189_v3 }
 0x1cd   :  { %5550 = vmatpush3.bf16.msra.mxu0 %v6871_v38  ;;  %v832_v31 = vmul.f32 %v6970_v28, %v172_v27  ;;  %v177_v38 = vld [vmem:[%s6933_s29 + $0x58] sm:$0xff]  ;;  %v840_v45 = vmul.f32 %v6970_v28, %v180_v43  ;;  %v848_v2 = vmul.f32 %v6970_v28, %v188_v63  ;;  %v856_v11 = vmul.f32 %v6970_v28, %v196_v21 }
 0x1ce   :  { %5551 = vmatprep.subr.bf16.mxu0 %v6877_v44  ;;  %v837_v40 = vmul.f32 %v6943_v8, %v177_v38  ;;  %v857_v23 = vmul.f32 %v6965_v24, %v197_v22 }
 0x1cf   :  { %5506 = vmatprep.mubr.msk.f32.mxu0 %vm858_vm2, %v832_v31 }
 0x1d0   :  { %5507 = vmatmul.mubr.msk.f32.gmra.mrb[22].mxu0 %vm858_vm2, %v833_v32 }
 0x1d1   :  { %5552 = vmatpush3.bf16.msra.mxu0 %v6877_v44  ;;  %5509 = vmatprep.mubr.msk.f32.mxu0 %vm858_vm2, %v834_v33  ;;  %v839_v44 = vmul.f32 %v6953_v15, %v179_v42 }
 0x1d4   :  { %5510 = vmatmul.mubr.msk.f32.gmra.mrb[24].mxu0 %vm858_vm2, %v835_v36 }
 0x1d5   :  { %5512 = vmatprep.mubr.msk.f32.mxu0 %vm858_vm2, %v836_v37 }
 0x1d8   :  { %5513 = vmatmul.mubr.msk.f32.gmra.mrb[26].mxu0 %vm858_vm2, %v837_v40 }
 0x1d9   :  { %5515 = vmatprep.mubr.msk.f32.mxu0 %vm858_vm2, %v838_v41 }
 0x1dc   :  { %5516 = vmatmul.mubr.msk.f32.gmra.mrb[28].mxu0 %vm858_vm2, %v839_v44 }
 0x1dd   :  { %5518 = vmatprep.mubr.msk.f32.mxu0 %vm858_vm2, %v840_v45 }
 0x1de   :  { %v7006_v49 = vpop.f32.mrb[0].mxu1 }
 0x1df   :  { %v7010_v52 = vpop.f32.mrb[1].mxu1 }
 0x1e0   :  { %5519 = vmatmul.mubr.msk.f32.gmra.mrb[30].mxu0 %vm858_vm2, %v841_v48  ;;  %v7014_v54 = vpop.f32.mrb[2].mxu1 }
 0x1e1   :  { %5521 = vmatprep.mubr.msk.f32.mxu0 %vm858_vm2, %v842_v50  ;;  %v7017_v55 = vpop.f32.mrb[3].mxu1  ;;  %v1539_v50 = vld [vmem:[%s7111_s3] sm:$0xff] }
 0x1e2   :  { %v7115_v53 = vpack.c.bf16 %v1540_v51, %v1539_v50 }
 0x1e4   :  { %5522 = vmatmul.mubr.msk.f32.gmra.mrb[32].mxu0 %vm858_vm2, %v843_v56  ;;  %6080 = vmatprep.subr.bf16.mxu0 %v7115_v53 }
 0x1e5   :  { %5524 = vmatprep.mubr.msk.f32.mxu0 %vm858_vm2, %v844_v57 }
 0x1e6   :  { %v5449_v8 = vpop.f32.mrb[4].mxu1 }
 0x1e7   :  { %v575_v19 = vpop.f32.mrb[5].mxu1 }
 0x1e8   :  { %5525 = vmatmul.mubr.msk.f32.gmra.mrb[34].mxu0 %vm858_vm2, %v845_v60  ;;  %v5450_v25 = vpop.f32.mrb[6].mxu1 }
 0x1e9   :  { %5527 = vmatprep.mubr.msk.f32.mxu0 %vm858_vm2, %v846_v61  ;;  %v578_v26 = vpop.f32.mrb[7].mxu1 }
 0x1ec   :  { %5528 = vmatmul.mubr.msk.f32.gmra.mrb[36].mxu0 %vm858_vm2, %v847_v1 }
 0x1ed   :  { %5530 = vmatprep.mubr.msk.f32.mxu0 %vm858_vm2, %v848_v2 }
 0x1ee   :  { %v7062_v27 = vpop.f32.mrb[8].mxu1 }
 0x1ef   :  { %v7064_v29 = vpop.f32.mrb[9].mxu1 }
 0x1f0   :  { %5531 = vmatmul.mubr.msk.f32.gmra.mrb[38].mxu0 %vm858_vm2, %v849_v6  ;;  %v7066_v15 = vpop.f32.mrb[10].mxu1 }
 0x1f1   :  { %5533 = vmatprep.mubr.msk.f32.mxu0 %vm858_vm2, %v850_v7  ;;  %v594_v28 = vpop.f32.mrb[11].mxu1 }
 0x1f4   :  { %5534 = vmatmul.mubr.msk.f32.gmra.mrb[40].mxu0 %vm858_vm2, %v851_v12 }
 0x1f5   :  { %5536 = vmatprep.mubr.msk.f32.mxu0 %vm858_vm2, %v852_v13 }
 0x1f6   :  { %v7068_v30 = vpop.f32.mrb[12].mxu1 }
 0x1f7   :  { %v7070_v31 = vpop.f32.mrb[13].mxu1 }
 0x1f8   :  { %5537 = vmatmul.mubr.msk.f32.gmra.mrb[42].mxu0 %vm858_vm2, %v853_v17  ;;  %v7072_v32 = vpop.f32.mrb[14].mxu1 }
 0x1f9   :  { %5539 = vmatprep.mubr.msk.f32.mxu0 %vm858_vm2, %v854_v4  ;;  %v7074_v24 = vpop.f32.mrb[15].mxu1 }
 0x1fc   :  { %5540 = vmatmul.mubr.msk.f32.gmra.mrb[44].mxu0 %vm858_vm2, %v855_v0 }
 0x1fd   :  { %5542 = vmatprep.mubr.msk.f32.mxu0 %vm858_vm2, %v856_v11 }
 0x1fe   :  { %v7076_v33 = vpop.f32.mrb[16].mxu1 }
 0x1ff   :  { %v7078_v34 = vpop.f32.mrb[17].mxu1 }
 0x200   :  { %5543 = vmatmul.mubr.msk.f32.gmra.mrb[46].mxu0 %vm858_vm2, %v857_v23  ;;  %v7080_v35 = vpop.f32.mrb[18].mxu1 }
 0x201   :  { %v7082_v36 = vpop.f32.mrb[19].mxu1 }
 0x206   :  { %v7084_v37 = vpop.f32.mrb[20].mxu1 }
 0x207   :  { %v7086_v38 = vpop.f32.mrb[21].mxu1 }
 0x208   :  { %v7088_v39 = vpop.f32.mrb[22].mxu1 }
 0x209   :  { %v7090_v40 = vpop.f32.mrb[23].mxu1 }
 0x20e   :  { %v7092_v41 = vpop.f32.mrb[24].mxu1 }
 0x20f   :  { %v7094_v42 = vpop.f32.mrb[25].mxu1 }
 0x210   :  { %v7096_v43 = vpop.f32.mrb[26].mxu1 }
 0x211   :  { %v7098_v44 = vpop.f32.mrb[27].mxu1 }
 0x216   :  { %v7100_v45 = vpop.f32.mrb[28].mxu1 }
 0x217   :  { %v7102_v46 = vpop.f32.mrb[29].mxu1 }
 0x218   :  { %v7104_v47 = vpop.f32.mrb[30].mxu1 }
 0x219   :  { %v7106_v48 = vpop.f32.mrb[31].mxu1 }
 0x297   :  { %v5499_v56 = vpop.f32.mrb[16].mxu0 }
 0x298   :  { %v1031_v57 = vadd.f32 %v5499_v56, %v7017_v55  ;;  %v1025_v58 = vpop.f32.mrb[17].mxu0 }
 0x299   :  { %v1026_v59 = vadd.f32 %v1025_v58, %v7010_v52 }
 0x29a   :  { %6421 = vtanh.f32 %v1031_v57  ;;  %v134_v57 = vld [vmem:[%s7125_s7] sm:$0xff] }
 0x29b   :  { %6423 = vtanh.f32 %v1026_v59  ;;  %v5502_v60 = vpop.f32.mrb[18].mxu0 }
 0x29c   :  { %v1041_v61 = vadd.f32 %v5502_v60, %v7014_v54  ;;  %v1035_v62 = vpop.f32.mrb[19].mxu0 }
 0x29d   :  { %v1036_v63 = vadd.f32 %v7006_v49, %v1035_v62  ;;  %v137_v62 = vld [vmem:[%s7125_s7 + $0x18] sm:$0xff] }
 0x29e   :  { %6425 = vtanh.f32 %v1041_v61 }
 0x29f   :  { %6427 = vtanh.f32 %v1036_v63  ;;  %v5505_v1 = vpop.f32.mrb[20].mxu0 }
 0x2a0   :  { %v1051_v2 = vadd.f32 %v5505_v1, %v578_v26  ;;  %v1045_v3 = vpop.f32.mrb[21].mxu0 }
 0x2a1   :  { %v1046_v5 = vadd.f32 %v1045_v3, %v575_v19  ;;  %v136_v3 = vld [vmem:[%s7125_s7 + $0x10] sm:$0xff] }
 0x2a2   :  { %6429 = vtanh.f32 %v1051_v2 }
 0x2a3   :  { %6431 = vtanh.f32 %v1046_v5  ;;  %v5508_v55 = vpop.f32.mrb[22].mxu0 }
 0x2a4   :  { %v6422_v6 = vpop.eup %6421  ;;  %v1061_v7 = vadd.f32 %v5508_v55, %v5450_v25  ;;  %v1055_v52 = vpop.f32.mrb[23].mxu0 }
 0x2a5   :  { %v6424_v9 = vpop.eup %6423  ;;  %v1218_v10 = vmul.f32 1.442695, %v6422_v6  ;;  %v1056_v12 = vadd.f32 %v5449_v8, %v1055_v52 }
 0x2a6   :  { %v1216_v13 = vmul.f32 1.442695, %v6424_v9  ;;  %6433 = vtanh.f32 %v1061_v7 }
 0x2a7   :  { %6435 = vpow2.f32 %v1218_v10  ;;  %v5511_v49 = vpop.f32.mrb[24].mxu0 }
 0x2a8   :  { %v6426_v54 = vpop.eup %6425  ;;  %6437 = vpow2.f32 %v1216_v13  ;;  %v1071_v14 = vadd.f32 %v5511_v49, %v594_v28  ;;  %v1065_v16 = vpop.f32.mrb[25].mxu0  ;;  %v135_v28 = vld [vmem:[%s7125_s7 + $0x8] sm:$0xff] }
 0x2a9   :  { %v6428_v17 = vpop.eup %6427  ;;  %v1222_v4 = vmul.f32 1.442695, %v6426_v54  ;;  %6439 = vtanh.f32 %v1056_v12  ;;  %v1066_v18 = vadd.f32 %v1065_v16, %v7064_v29  ;;  %v139_v54 = vld [vmem:[%s7125_s7 + $0x28] sm:$0xff] }
 0x2aa   :  { %v1220_v21 = vmul.f32 1.442695, %v6428_v17  ;;  %6441 = vtanh.f32 %v1071_v14 }
 0x2ab   :  { %6443 = vpow2.f32 %v1222_v4  ;;  %v5514_v0 = vpop.f32.mrb[26].mxu0 }
 0x2ac   :  { %v6430_v11 = vpop.eup %6429  ;;  %6445 = vpow2.f32 %v1220_v21  ;;  %v1081_v22 = vadd.f32 %v5514_v0, %v7066_v15  ;;  %v1075_v23 = vpop.f32.mrb[27].mxu0 }
 0x2ad   :  { %v6432_v8 = vpop.eup %6431  ;;  %v1226_v19 = vmul.f32 1.442695, %v6430_v11  ;;  %6447 = vtanh.f32 %v1066_v18  ;;  %v1076_v25 = vadd.f32 %v7062_v27, %v1075_v23 }
 0x2ae   :  { %v1224_v26 = vmul.f32 1.442695, %v6432_v8  ;;  %6449 = vtanh.f32 %v1081_v22 }
 0x2af   :  { %6451 = vpow2.f32 %v1226_v19  ;;  %v5517_v29 = vpop.f32.mrb[28].mxu0 }
 0x2b0   :  { %v6434_v50 = vpop.eup %6433  ;;  %6453 = vpow2.f32 %v1224_v26  ;;  %v1091_v51 = vadd.f32 %v5517_v29, %v7074_v24  ;;  %v1085_v56 = vpop.f32.mrb[29].mxu0 }
 0x2b1   :  { %v6436_v15 = vpop.eup %6435  ;;  %v1230_v58 = vmul.f32 1.442695, %v6434_v50  ;;  %6455 = vtanh.f32 %v1076_v25  ;;  %v1086_v59 = vadd.f32 %v1085_v56, %v7070_v31  ;;  %v141_v25 = vld [vmem:[%s7125_s7 + $0x38] sm:$0xff] }
 0x2b2   :  { %v6438_v60 = vpop.eup %6437  ;;  %6457 = vtanh.f32 %v1091_v51  ;;  %v1281_v27 = vmul.f32 %v6436_v15, %v135_v28  ;;  %v140_v15 = vld [vmem:[%s7125_s7 + $0x30] sm:$0xff] }
 0x2b3   :  { %v6440_v61 = vpop.eup %6439  ;;  %6459 = vpow2.f32 %v1230_v58  ;;  %v5520_v63 = vpop.f32.mrb[30].mxu0  ;;  %v1280_v1 = vmul.f32 %v6438_v60, %v134_v57 }
 0x2b4   :  { %v6442_v2 = vpop.eup %6441  ;;  %v1228_v5 = vmul.f32 1.442695, %v6440_v61  ;;  %6461 = vtanh.f32 %v1086_v59  ;;  %v1101_v24 = vadd.f32 %v5520_v63, %v7072_v32  ;;  %v1095_v55 = vpop.f32.mrb[31].mxu0  ;;  %v143_v61 = vld [vmem:[%s7125_s7 + $0x48] sm:$0xff] }
 0x2b5   :  { %v6444_v6 = vpop.eup %6443  ;;  %v1234_v7 = vmul.f32 1.442695, %v6442_v2  ;;  %v1096_v31 = vadd.f32 %v7068_v30, %v1095_v55  ;;  %v1312_v52 = vpack.c.bf16 %v1281_v27, %v1280_v1  ;;  %v138_v30 = vld [vmem:[%s7125_s7 + $0x20] sm:$0xff] }
 0x2b6   :  { %v6446_v9 = vpop.eup %6445  ;;  %v1283_v10 = vmul.f32 %v6444_v6, %v137_v62  ;;  %6463 = vpow2.f32 %v1228_v5  ;;  %v142_v2 = vld [vmem:[%s7125_s7 + $0x40] sm:$0xff] }
 0x2b7   :  { %v6448_v12 = vpop.eup %6447  ;;  %v1282_v13 = vmul.f32 %v6446_v9, %v136_v3  ;;  %6465 = vpow2.f32 %v1234_v7  ;;  %v5523_v49 = vpop.f32.mrb[32].mxu0  ;;  %5553 = vmatprep.mubr.msk.bf16.mxu0 %vm1328_vm3, %v1312_v52  ;;  %v145_v9 = vld [vmem:[%s7125_s7 + $0x58] sm:$0xff] }
 0x2b8   :  { %v6450_v14 = vpop.eup %6449  ;;  %v1232_v32 = vmul.f32 1.442695, %v6448_v12  ;;  %6467 = vtanh.f32 %v1101_v24  ;;  %v1111_v16 = vadd.f32 %v5523_v49, %v7082_v36  ;;  %v1105_v17 = vpop.f32.mrb[33].mxu0  ;;  %v144_v49 = vld [vmem:[%s7125_s7 + $0x50] sm:$0xff] }
 0x2b9   :  { %v6452_v4 = vpop.eup %6451  ;;  %v1313_v18 = vpack.c.bf16 %v1283_v10, %v1282_v13  ;;  %v1238_v21 = vmul.f32 1.442695, %v6450_v14  ;;  %6469 = vtanh.f32 %v1096_v31  ;;  %v1106_v0 = vadd.f32 %v1105_v17, %v7078_v34  ;;  %v147_v17 = vld [vmem:[%s7125_s7 + $0x68] sm:$0xff] }
 0x2ba   :  { %v6454_v11 = vpop.eup %6453  ;;  %6471 = vpow2.f32 %v1232_v32  ;;  %v1285_v22 = vmul.f32 %v6452_v4, %v139_v54 }
 0x2bb   :  { %v6456_v23 = vpop.eup %6455  ;;  %6473 = vpow2.f32 %v1238_v21  ;;  %v5526_v8 = vpop.f32.mrb[34].mxu0  ;;  %5554 = vmatmul.mubr.msk.bf16.vlgmr.msra.gmra.mrb[48].mxu0 %vm1328_vm3, %v1313_v18  ;;  %v1284_v19 = vmul.f32 %v6454_v11, %v138_v30 }
 0x2bc   :  { %v6458_v36 = vpop.eup %6457  ;;  %v1236_v26 = vmul.f32 1.442695, %v6456_v23  ;;  %6475 = vtanh.f32 %v1111_v16  ;;  %v1121_v29 = vadd.f32 %v5526_v8, %v7080_v35  ;;  %v1115_v28 = vpop.f32.mrb[35].mxu0  ;;  %6082 = vmatpush3.bf16.msra.mxu0 %v7115_v53 }
 0x2bd   :  { %v6460_v34 = vpop.eup %6459  ;;  %v1242_v50 = vmul.f32 1.442695, %v6458_v36  ;;  %6477 = vtanh.f32 %v1106_v0  ;;  %v1116_v51 = vadd.f32 %v7076_v33, %v1115_v28  ;;  %v1314_v56 = vpack.c.bf16 %v1285_v22, %v1284_v19  ;;  %v146_v22 = vld [vmem:[%s7125_s7 + $0x60] sm:$0xff] }
 0x2be   :  { %v6462_v57 = vpop.eup %6461  ;;  %6479 = vpow2.f32 %v1236_v26  ;;  %v1287_v58 = vmul.f32 %v6460_v34, %v141_v25 }
 0x2bf   :  { %6481 = vpow2.f32 %v1242_v50  ;;  %v1240_v59 = vmul.f32 1.442695, %v6462_v57  ;;  %v5529_v60 = vpop.f32.mrb[36].mxu0  ;;  %5557 = vmatprep.mubr.msk.bf16.mxu1 %vm1328_vm3, %v1314_v56  ;;  %v149_v56 = vld [vmem:[%s7125_s7 + $0x78] sm:$0xff] }
 0x2c0   :  { %v6464_v35 = vpop.eup %6463  ;;  %6483 = vtanh.f32 %v1121_v29  ;;  %v1131_v53 = vadd.f32 %v5529_v60, %v7090_v40  ;;  %v1125_v27 = vpop.f32.mrb[37].mxu0 }
 0x2c1   :  { %v6466_v62 = vpop.eup %6465  ;;  %v1286_v63 = vmul.f32 %v6464_v35, %v140_v15  ;;  %6485 = vpow2.f32 %v1240_v59  ;;  %v1126_v33 = vadd.f32 %v1125_v27, %v7086_v38  ;;  %v148_v59 = vld [vmem:[%s7125_s7 + $0x70] sm:$0xff] }
 0x2c2   :  { %v6468_v1 = vpop.eup %6467  ;;  %6487 = vtanh.f32 %v1116_v51  ;;  %v1289_v6 = vmul.f32 %v6466_v62, %v143_v61 }
 0x2c3   :  { %v6470_v3 = vpop.eup %6469  ;;  %v1315_v5 = vpack.c.bf16 %v1287_v58, %v1286_v63  ;;  %v1246_v24 = vmul.f32 1.442695, %v6468_v1  ;;  %6489 = vtanh.f32 %v1131_v53  ;;  %v5532_v55 = vpop.f32.mrb[38].mxu0  ;;  %v151_v1 = vld [vmem:[%s7125_s7 + $0x88] sm:$0xff] }
 0x2c4   :  { %v6472_v7 = vpop.eup %6471  ;;  %v1244_v40 = vmul.f32 1.442695, %v6470_v3  ;;  %6491 = vtanh.f32 %v1126_v33  ;;  %v1141_v31 = vadd.f32 %v5532_v55, %v7088_v39  ;;  %v1135_v52 = vpop.f32.mrb[39].mxu0 }
 0x2c5   :  { %v6474_v10 = vpop.eup %6473  ;;  %6493 = vpow2.f32 %v1246_v24  ;;  %5558 = vmatmul.mubr.msk.bf16.vlgmr.msra.gmra.mrb[32].mxu1 %vm1328_vm3, %v1315_v5  ;;  %v1136_v38 = vadd.f32 %v7084_v37, %v1135_v52  ;;  %v1288_v12 = vmul.f32 %v6472_v7, %v142_v2  ;;  %v150_v5 = vld [vmem:[%s7125_s7 + $0x80] sm:$0xff] }
 0x2c6   :  { %v6476_v13 = vpop.eup %6475  ;;  %6495 = vpow2.f32 %v1244_v40  ;;  %v1291_v39 = vmul.f32 %v6474_v10, %v145_v9 }
 0x2c7   :  { %v6478_v54 = vpop.eup %6477  ;;  %v1250_v14 = vmul.f32 1.442695, %v6476_v13  ;;  %6497 = vtanh.f32 %v1141_v31  ;;  %v5535_v32 = vpop.f32.mrb[40].mxu0  ;;  %v1316_v16 = vpack.c.bf16 %v1289_v6, %v1288_v12 }
 0x2c8   :  { %v6480_v30 = vpop.eup %6479  ;;  %v1248_v4 = vmul.f32 1.442695, %v6478_v54  ;;  %6499 = vtanh.f32 %v1136_v38  ;;  %v1151_v18 = vadd.f32 %v5535_v32, %v7098_v44  ;;  %v1145_v21 = vpop.f32.mrb[41].mxu0  ;;  %v153_v38 = vld [vmem:[%s7125_s7 + $0x98] sm:$0xff] }
 0x2c9   :  { %v6482_v0 = vpop.eup %6481  ;;  %6501 = vpow2.f32 %v1250_v14  ;;  %5561 = vmatprep.mubr.msk.bf16.mxu1 %vm1328_vm3, %v1316_v16  ;;  %v1146_v37 = vadd.f32 %v1145_v21, %v7094_v42  ;;  %v1290_v11 = vmul.f32 %v6480_v30, %v144_v49  ;;  %v152_v14 = vld [vmem:[%s7125_s7 + $0x90] sm:$0xff]  ;;  %v154_v30 = vld [vmem:[%s7125_s7 + $0xa0] sm:$0xff] }
 0x2ca   :  { %v6484_v23 = vpop.eup %6483  ;;  %6503 = vpow2.f32 %v1248_v4  ;;  %v1293_v8 = vmul.f32 %v6482_v0, %v147_v17 }
 0x2cb   :  { %v6486_v19 = vpop.eup %6485  ;;  %v1254_v36 = vmul.f32 1.442695, %v6484_v23  ;;  %6505 = vtanh.f32 %v1151_v18  ;;  %v5538_v25 = vpop.f32.mrb[42].mxu0  ;;  %v1317_v26 = vpack.c.bf16 %v1291_v39, %v1290_v11  ;;  %v155_v39 = vld [vmem:[%s7125_s7 + $0xa8] sm:$0xff]  ;;  %v157_v23 = vld [vmem:[%s7125_s7 + $0xb8] sm:$0xff] }
 0x2cc   :  { %v6488_v44 = vpop.eup %6487  ;;  %6507 = vtanh.f32 %v1146_v37  ;;  %v1161_v29 = vadd.f32 %v5538_v25, %v7096_v43  ;;  %v1155_v28 = vpop.f32.mrb[43].mxu0  ;;  %v1292_v34 = vmul.f32 %v6486_v19, %v146_v22 }
 0x2cd   :  { %v6490_v50 = vpop.eup %6489  ;;  %6509 = vpow2.f32 %v1254_v36  ;;  %v1252_v42 = vmul.f32 1.442695, %v6488_v44  ;;  %5562 = vmatmul.mubr.msk.bf16.gmra.mrb[36].mxu1 %vm1328_vm3, %v1317_v26  ;;  %v1156_v51 = vadd.f32 %v7092_v41, %v1155_v28  ;;  %v156_v36 = vld [vmem:[%s7125_s7 + $0xb0] sm:$0xff] }
 0x2ce   :  { %v6492_v57 = vpop.eup %6491  ;;  %v1258_v15 = vmul.f32 1.442695, %v6490_v50  ;;  %6511 = vtanh.f32 %v1161_v29  ;;  %v1318_v58 = vpack.c.bf16 %v1293_v8, %v1292_v34 }
 0x2cf   :  { %v6494_v60 = vpop.eup %6493  ;;  %6513 = vpow2.f32 %v1252_v42  ;;  %v1256_v35 = vmul.f32 1.442695, %v6492_v57  ;;  %v5541_v43 = vpop.f32.mrb[44].mxu0  ;;  %v159_v42 = vld [vmem:[%s7125_s7 + $0xc8] sm:$0xff]  ;;  %v158_v57 = vld [vmem:[%s7125_s7 + $0xc0] sm:$0xff] }
 0x2d0   :  { %v6496_v53 = vpop.eup %6495  ;;  %6515 = vpow2.f32 %v1258_v15  ;;  %v1171_v27 = vadd.f32 %v5541_v43, %v7106_v48  ;;  %5565 = vmatprep.mubr.msk.bf16.mxu1 %vm1328_vm3, %v1318_v58  ;;  %v1165_v61 = vpop.f32.mrb[45].mxu0  ;;  %v1295_v41 = vmul.f32 %v6494_v60, %v149_v56 }
 0x2d1   :  { %v6498_v62 = vpop.eup %6497  ;;  %6517 = vpow2.f32 %v1256_v35  ;;  %v1166_v63 = vadd.f32 %v1165_v61, %v7102_v46  ;;  %v1294_v33 = vmul.f32 %v6496_v53, %v148_v59 }
 0x2d2   :  { %v6500_v2 = vpop.eup %6499  ;;  %v1262_v3 = vmul.f32 1.442695, %v6498_v62  ;;  %6519 = vtanh.f32 %v1156_v51 }
 0x2d3   :  { %v6502_v24 = vpop.eup %6501  ;;  %v1260_v55 = vmul.f32 1.442695, %v6500_v2  ;;  %6521 = vtanh.f32 %v1171_v27  ;;  %v5544_v6 = vpop.f32.mrb[46].mxu0  ;;  %v1319_v48 = vpack.c.bf16 %v1295_v41, %v1294_v33  ;;  %v161_v41 = vld [vmem:[%s7125_s7 + $0xd8] sm:$0xff]  ;;  %v163_v2 = vld [vmem:[%s7125_s7 + $0xe8] sm:$0xff] }
 0x2d4   :  { %v6504_v7 = vpop.eup %6503  ;;  %6523 = vpow2.f32 %v1262_v3  ;;  %v1181_v40 = vadd.f32 %v5544_v6, %v7104_v47  ;;  %v1175_v31 = vpop.f32.mrb[47].mxu0  ;;  %v1297_v52 = vmul.f32 %v6502_v24, %v151_v1  ;;  %v162_v24 = vld [vmem:[%s7125_s7 + $0xe0] sm:$0xff] }
 0x2d5   :  { %v6506_v46 = vpop.eup %6505  ;;  %6525 = vpow2.f32 %v1260_v55  ;;  %5566 = vmatmul.mubr.msk.bf16.gmra.mrb[40].mxu1 %vm1328_vm3, %v1319_v48  ;;  %v1176_v9 = vadd.f32 %v7100_v45, %v1175_v31  ;;  %v1296_v10 = vmul.f32 %v6504_v7, %v150_v5  ;;  %v165_v7 = vld [vmem:[%s7125_s7 + $0xf8] sm:$0xff] }
 0x2d6   :  { %v6508_v12 = vpop.eup %6507  ;;  %v1266_v13 = vmul.f32 1.442695, %v6506_v46  ;;  %6527 = vtanh.f32 %v1166_v63  ;;  %v160_v63 = vld [vmem:[%s7125_s7 + $0xd0] sm:$0xff] }
 0x2d7   :  { %v6510_v49 = vpop.eup %6509  ;;  %v1264_v54 = vmul.f32 1.442695, %v6508_v12  ;;  %6529 = vtanh.f32 %v1181_v40  ;;  %v1320_v47 = vpack.c.bf16 %v1297_v52, %v1296_v10  ;;  %v164_v52 = vld [vmem:[%s7125_s7 + $0xf0] sm:$0xff] }
 0x2d8   :  { %v6512_v32 = vpop.eup %6511  ;;  %6531 = vpow2.f32 %v1266_v13  ;;  %v1299_v16 = vmul.f32 %v6510_v49, %v153_v38  ;;  %v1541_v13 = vld [vmem:[%s7111_s3 + $0x10] sm:$0xff]  ;;  %v1542_v49 = vld [vmem:[%s7111_s3 + $0x18] sm:$0xff] }
 0x2d9   :  { %v6514_v17 = vpop.eup %6513  ;;  %6533 = vpow2.f32 %v1264_v54  ;;  %v1270_v45 = vmul.f32 1.442695, %v6512_v32  ;;  %5569 = vmatprep.mubr.msk.bf16.mxu1 %vm1328_vm3, %v1320_v47  ;;  %v6083_v54 = vpack.c.bf16 %v1542_v49, %v1541_v13  ;;  %v1686_v47 = vld [vmem:[%s7111_s3 + $0x20] sm:$0xff] }
 0x2da   :  { %v6516_v4 = vpop.eup %6515  ;;  %6535 = vtanh.f32 %v1176_v9  ;;  %v1298_v18 = vmul.f32 %v6514_v17, %v152_v14  ;;  %v1687_v14 = vld [vmem:[%s7111_s3 + $0x28] sm:$0xff]  ;;  %v2119_v17 = vld [vmem:[%s4758_s11 + $0x10] sm:$0xff] }
 0x2db   :  { %v6518_v21 = vpop.eup %6517  ;;  %6537 = vpow2.f32 %v1270_v45  ;;  %v1301_v0 = vmul.f32 %v6516_v4, %v155_v39  ;;  %6084 = vmatprep.subr.bf16.mxu0 %v6083_v54  ;;  %v6087_v32 = vpack.c.bf16 %v1687_v14, %v1686_v47  ;;  %v2118_v39 = vld [vmem:[%s4758_s11 + $0x8] sm:$0xff] }
 0x2dc   :  { %v6520_v37 = vpop.eup %6519  ;;  %v1321_v11 = vpack.c.bf16 %v1299_v16, %v1298_v18  ;;  %v1300_v22 = vmul.f32 %v6518_v21, %v154_v30  ;;  %6086 = vmatpush3.bf16.msra.mxu0 %v6083_v54  ;;  %v2117_v16 = vld [vmem:[%s4758_s11] sm:$0xff]  ;;  %v2120_v30 = vld [vmem:[%s4758_s11 + $0x18] sm:$0xff]  ;;  %v1688_v18 = vld [vmem:[%s7111_s3 + $0x30] sm:$0xff]  ;;  %s6794_s11 = smov 3  }
 0x2dd   :  { %v6522_v8 = vpop.eup %6521  ;;  %v1268_v19 = vmul.f32 1.442695, %v6520_v37  ;;  %6088 = vmatprep.subr.bf16.mxu0 %v6087_v32  ;;  %v6111_v45 = vpack.c.bf16 %v2118_v39, %v2117_v16  ;;  %v6115_v4 = vpack.c.bf16 %v2120_v30, %v2119_v17  ;;  %v1689_v21 = vld [vmem:[%s7111_s3 + $0x38] sm:$0xff]  ;;  %s4749_s14 = sld [smem:[%s7814_s0 + %s6794_s11]]   ;;  %s6802_s11 = smov 25  }
 0x2de   :  { %v6524_v25 = vpop.eup %6523  ;;  %v1274_v26 = vmul.f32 1.442695, %v6522_v8  ;;  %5570 = vmatmul.mubr.msk.bf16.gmra.mrb[44].mxu1 %vm1328_vm3, %v1321_v11  ;;  %v1322_v44 = vpack.c.bf16 %v1301_v0, %v1300_v22  ;;  %v6091_v22 = vpack.c.bf16 %v1689_v21, %v1688_v18  ;;  %v1827_v8 = vld [vmem:[%s7111_s3 + $0x40] sm:$0xff]  ;;  %v2596_v18 = vld [vmem:[%s4760_s15 + $0x10] sm:$0xff]  ;;  %v2597_v21 = vld [vmem:[%s4760_s15 + $0x18] sm:$0xff] }
 0x2df   :  { %v6526_v29 = vpop.eup %6525  ;;  %6539 = vpow2.f32 %v1268_v19  ;;  %v1303_v28 = vmul.f32 %v6524_v25, %v157_v23  ;;  %6112 = vmatprep.subr.bf16.mxu1 %v6111_v45  ;;  %v1828_v19 = vld [vmem:[%s7111_s3 + $0x48] sm:$0xff] }
 0x2e0   :  { %v6528_v34 = vpop.eup %6527  ;;  %6541 = vpow2.f32 %v1274_v26  ;;  %5573 = vmatprep.mubr.msk.bf16.mxu1 %vm1328_vm3, %v1322_v44  ;;  %v1302_v50 = vmul.f32 %v6526_v29, %v156_v36  ;;  %6114 = vmatpush3.bf16.msra.mxu1 %v6111_v45  ;;  %v6095_v36 = vpack.c.bf16 %v1828_v19, %v1827_v8  ;;  %v6123_v8 = vpack.c.bf16 %v2597_v21, %v2596_v18  ;;  %v6710_v18 = vld [vmem:[%s6933_s29 + $0x8] sm:$0xff] }
 0x2e1   :  { %v6530_v51 = vpop.eup %6529  ;;  %v1272_v56 = vmul.f32 1.442695, %v6528_v34  ;;  %6116 = vmatprep.subr.bf16.mxu1 %v6115_v4  ;;  %v1830_v34 = vld [vmem:[%s7111_s3 + $0x58] sm:$0xff] }
 0x2e2   :  { %v6532_v15 = vpop.eup %6531  ;;  %v1278_v58 = vmul.f32 1.442695, %v6530_v51  ;;  %v1323_v59 = vpack.c.bf16 %v1303_v28, %v1302_v50  ;;  %v1829_v28 = vld [vmem:[%s7111_s3 + $0x50] sm:$0xff] }
 0x2e3   :  { %v6534_v60 = vpop.eup %6533  ;;  %6543 = vpow2.f32 %v1272_v56  ;;  %v1305_v35 = vmul.f32 %v6532_v15, %v159_v42  ;;  %v6099_v56 = vpack.c.bf16 %v1830_v34, %v1829_v28  ;;  %v1968_v15 = vld [vmem:[%s7111_s3 + $0x60] sm:$0xff] }
 0x2e4   :  { %v6536_v43 = vpop.eup %6535  ;;  %6545 = vpow2.f32 %v1278_v58  ;;  %v1304_v53 = vmul.f32 %v6534_v60, %v158_v57  ;;  %6118 = vmatpush3.bf16.msra.mxu1 %v6115_v4  ;;  %v1969_v58 = vld [vmem:[%s7111_s3 + $0x68] sm:$0xff]  ;;  %v6405_v34 = vld [vmem:[%s7291_s23] sm:$0xff]  }
 0x2e5   :  { %v6538_v27 = vpop.eup %6537  ;;  %v1276_v61 = vmul.f32 1.442695, %v6536_v43 }
 0x2e6   :  { %5574 = vmatmul.mubr.msk.bf16.gmra.mrb[48].mxu1 %vm1328_vm3, %v1323_v59  ;;  %v1324_v62 = vpack.c.bf16 %v1305_v35, %v1304_v53  ;;  %v1307_v33 = vmul.f32 %v6538_v27, %v161_v41  ;;  %v6103_v59 = vpack.c.bf16 %v1969_v58, %v1968_v15  ;;  %v1970_v27 = vld [vmem:[%s7111_s3 + $0x70] sm:$0xff] }
 0x2e7   :  { %6547 = vpow2.f32 %v1276_v61  ;;  %v1971_v61 = vld [vmem:[%s7111_s3 + $0x78] sm:$0xff] }
 0x2e8   :  { %5577 = vmatprep.mubr.msk.bf16.mxu1 %vm1328_vm3, %v1324_v62 }
 0x2e9   :  { %v6540_v1 = vpop.eup %6539 }
 0x2ea   :  { %v6542_v3 = vpop.eup %6541  ;;  %v1306_v5 = vmul.f32 %v6540_v1, %v160_v63 }
 0x2eb   :  { %v1309_v6 = vmul.f32 %v6542_v3, %v163_v2 }
 0x2ec   :  { %v1325_v55 = vpack.c.bf16 %v1307_v33, %v1306_v5  ;;  %v6107_v33 = vpack.c.bf16 %v1971_v61, %v1970_v27 }
 0x2ed   :  { %v6544_v48 = vpop.eup %6543 }
 0x2ee   :  { %v6546_v40 = vpop.eup %6545  ;;  %5578 = vmatmul.mubr.msk.bf16.gmra.mrb[52].mxu1 %vm1328_vm3, %v1325_v55  ;;  %v1308_v31 = vmul.f32 %v6544_v48, %v162_v24 }
 0x2ef   :  { %v1311_v9 = vmul.f32 %v6546_v40, %v165_v7 }
 0x2f0   :  { %v1326_v46 = vpack.c.bf16 %v1309_v6, %v1308_v31 }
 0x2f1   :  { %v6548_v10 = vpop.eup %6547 }
 0x2f2   :  { %5581 = vmatprep.mubr.msk.bf16.mxu1 %vm1328_vm3, %v1326_v46  ;;  %v1310_v38 = vmul.f32 %v6548_v10, %v164_v52  ;;  %v2595_v10 = vld [vmem:[%s4760_s15 + $0x8] sm:$0xff] }
 0x2f4   :  { %v1327_v12 = vpack.c.bf16 %v1311_v9, %v1310_v38  ;;  %v2594_v9 = vld [vmem:[%s4760_s15] sm:$0xff]  ;;  %s6795_s15 = smov 2  }
 0x2f5   :  { %v6119_v38 = vpack.c.bf16 %v2595_v10, %v2594_v9  ;;  %v6413_v9 = vld [vmem:[%s7291_s23 + $0x40] sm:$0xff]   ;;  %v6414_v10 = vld [vmem:[%s7291_s23 + $0x48] sm:$0xff]   ;;  %s4748_s18 = sld [smem:[%s7814_s0 + %s6795_s15]]   ;;  %s6803_s15 = smov 24  }
 0x2f6   :  { %5582 = vmatmul.mubr.msk.bf16.gmra.mrb[56].mxu1 %vm1328_vm3, %v1327_v12  ;;  %v4886_v12 = vld [vmem:[%s4757_s19] ss:$0 sm:$0xff]  ;;  %s6796_s19 = smov 19  }
 0x2f7   :  { %6120 = vmatprep.subr.bf16.mxu1 %v6119_v38  ;;  %s7701_s22 = sld [smem:[%s7814_s0 + %s6796_s19]]   ;;  %s6804_s19 = smov 27  }
 0x38e   :  { %v5555_v0 = vpop.f32.mrb[48].mxu0 }
 0x38f   :  { %v1411_v37 = vpop.f32.mrb[49].mxu0 }
 0x390   :  { %v5556_v11 = vpop.f32.mrb[50].mxu0  ;;  %5593 = vmatprep.mubr.msk.f32.mxu0 %vm219_vm0, %v1411_v37 }
 0x391   :  { %v1414_v23 = vpop.f32.mrb[51].mxu0 }
 0x392   :  { %5594 = vmatmul.mubr.msk.f32.vlgmr.msra.gmra.mrb[52].mxu0 %vm219_vm0, %v1414_v23 }
 0x393   :  { %5596 = vmatprep.mubr.msk.f32.mxu0 %vm219_vm0, %v5555_v0  ;;  %6090 = vmatpush3.bf16.msra.mxu0 %v6087_v32 }
 0x394   :  { %6092 = vmatprep.subr.bf16.mxu0 %v6091_v22 }
 0x396   :  { %5597 = vmatmul.mubr.msk.f32.gmra.mrb[54].mxu0 %vm219_vm0, %v5556_v11 }
 0x397   :  { %6094 = vmatpush3.bf16.msra.mxu0 %v6091_v22 }
 0x398   :  { %v5559_v25 = vpop.f32.mrb[32].mxu1  ;;  %6096 = vmatprep.subr.bf16.mxu0 %v6095_v36 }
 0x399   :  { %v1427_v26 = vpop.f32.mrb[33].mxu1 }
 0x39a   :  { %v5560_v44 = vpop.f32.mrb[34].mxu1  ;;  %5599 = vmatprep.mubr.msk.f32.mxu0 %vm219_vm0, %v1427_v26 }
 0x39b   :  { %v1430_v29 = vpop.f32.mrb[35].mxu1 }
 0x39c   :  { %5600 = vmatmul.mubr.msk.f32.gmra.mrb[56].mxu0 %vm219_vm0, %v1430_v29 }
 0x39d   :  { %5602 = vmatprep.mubr.msk.f32.mxu0 %vm219_vm0, %v5559_v25 }
 0x3a0   :  { %v5563_v50 = vpop.f32.mrb[36].mxu1  ;;  %5603 = vmatmul.mubr.msk.f32.gmra.mrb[58].mxu0 %vm219_vm0, %v5560_v44 }
 0x3a1   :  { %v1443_v42 = vpop.f32.mrb[37].mxu1 }
 0x3a2   :  { %v5564_v51 = vpop.f32.mrb[38].mxu1  ;;  %5613 = vmatprep.mubr.msk.f32.mxu0 %vm219_vm0, %v1443_v42 }
 0x3a3   :  { %v1446_v57 = vpop.f32.mrb[39].mxu1 }
 0x3a4   :  { %5614 = vmatmul.mubr.msk.f32.vlgmr.msra.gmra.mrb[52].mxu0 %vm219_vm0, %v1446_v57 }
 0x3a5   :  { %5616 = vmatprep.mubr.msk.f32.mxu0 %vm219_vm0, %v5563_v50  ;;  %6098 = vmatpush3.bf16.msra.mxu0 %v6095_v36  ;;  %v4911_v50 = vld [vmem:[%s4759_s27] ss:$0 sm:$0xff]  ;;  %s6798_s27 = smov 64  }
 0x3a6   :  { %6100 = vmatprep.subr.bf16.mxu0 %v6099_v56 }
 0x3a8   :  { %v5567_v60 = vpop.f32.mrb[40].mxu1  ;;  %5617 = vmatmul.mubr.msk.f32.gmra.mrb[54].mxu0 %vm219_vm0, %v5564_v51 }
 0x3a9   :  { %v1459_v35 = vpop.f32.mrb[41].mxu1  ;;  %6102 = vmatpush3.bf16.msra.mxu0 %v6099_v56 }
 0x3aa   :  { %v5568_v43 = vpop.f32.mrb[42].mxu1  ;;  %5619 = vmatprep.mubr.msk.f32.mxu0 %vm219_vm0, %v1459_v35  ;;  %6104 = vmatprep.subr.bf16.mxu0 %v6103_v59 }
 0x3ab   :  { %v1462_v53 = vpop.f32.mrb[43].mxu1 }
 0x3ac   :  { %5620 = vmatmul.mubr.msk.f32.gmra.mrb[56].mxu0 %vm219_vm0, %v1462_v53 }
 0x3ad   :  { %5622 = vmatprep.mubr.msk.f32.mxu0 %vm219_vm0, %v5567_v60 }
 0x3b0   :  { %5623 = vmatmul.mubr.msk.f32.gmra.mrb[58].mxu0 %vm219_vm0, %v5568_v43 }
 0x3b1   :  { %v5571_v41 = vpop.f32.mrb[44].mxu1 }
 0x3b2   :  { %v1475_v62 = vpop.f32.mrb[45].mxu1 }
 0x3b3   :  { %v5572_v63 = vpop.f32.mrb[46].mxu1  ;;  %5633 = vmatprep.mubr.msk.f32.mxu0 %vm219_vm0, %v1475_v62 }
 0x3b4   :  { %v1478_v1 = vpop.f32.mrb[47].mxu1 }
 0x3b5   :  { %5634 = vmatmul.mubr.msk.f32.vlgmr.msra.gmra.mrb[52].mxu0 %vm219_vm0, %v1478_v1 }
 0x3b6   :  { %5636 = vmatprep.mubr.msk.f32.mxu0 %vm219_vm0, %v5571_v41  ;;  %6106 = vmatpush3.bf16.msra.mxu0 %v6103_v59 }
 0x3b7   :  { %6108 = vmatprep.subr.bf16.mxu0 %v6107_v33 }
 0x3b9   :  { %v5575_v2 = vpop.f32.mrb[48].mxu1  ;;  %5637 = vmatmul.mubr.msk.f32.gmra.mrb[54].mxu0 %vm219_vm0, %v5572_v63 }
 0x3ba   :  { %v1491_v3 = vpop.f32.mrb[49].mxu1  ;;  %6110 = vmatpush3.bf16.msra.mxu0 %v6107_v33 }
 0x3bb   :  { %v5576_v5 = vpop.f32.mrb[50].mxu1  ;;  %5639 = vmatprep.mubr.msk.f32.mxu0 %vm219_vm0, %v1491_v3 }
 0x3bc   :  { %v1494_v24 = vpop.f32.mrb[51].mxu1 }
 0x3bd   :  { %5640 = vmatmul.mubr.msk.f32.gmra.mrb[56].mxu0 %vm219_vm0, %v1494_v24 }
 0x3be   :  { %5642 = vmatprep.mubr.msk.f32.mxu0 %vm219_vm0, %v5575_v2 }
 0x3c1   :  { %v5579_v55 = vpop.f32.mrb[52].mxu1  ;;  %5643 = vmatmul.mubr.msk.f32.gmra.mrb[58].mxu0 %vm219_vm0, %v5576_v5 }
 0x3c2   :  { %v1507_v6 = vpop.f32.mrb[53].mxu1 }
 0x3c3   :  { %v5580_v48 = vpop.f32.mrb[54].mxu1  ;;  %5653 = vmatprep.mubr.msk.f32.mxu0 %vm219_vm0, %v1507_v6  ;;  %v6406_v6 = vld [vmem:[%s7291_s23 + $0x8] sm:$0xff]  }
 0x3c4   :  { %v1510_v7 = vpop.f32.mrb[55].mxu1 }
 0x3c5   :  { %5654 = vmatmul.mubr.msk.f32.vlgmr.msra.gmra.mrb[52].mxu0 %vm219_vm0, %v1510_v7  ;;  %v6408_v7 = vld [vmem:[%s7291_s23 + $0x18] sm:$0xff]  }
 0x3c6   :  { %5656 = vmatprep.mubr.msk.f32.mxu0 %vm219_vm0, %v5579_v55 }
 0x3c9   :  { %v5583_v40 = vpop.f32.mrb[56].mxu1  ;;  %5657 = vmatmul.mubr.msk.f32.gmra.mrb[54].mxu0 %vm219_vm0, %v5580_v48  ;;  %v6407_v48 = vld [vmem:[%s7291_s23 + $0x10] sm:$0xff]  }
 0x3ca   :  { %v1523_v31 = vpop.f32.mrb[57].mxu1 }
 0x3cb   :  { %v5584_v52 = vpop.f32.mrb[58].mxu1  ;;  %5659 = vmatprep.mubr.msk.f32.mxu0 %vm219_vm0, %v1523_v31  ;;  %v6410_v31 = vld [vmem:[%s7291_s23 + $0x28] sm:$0xff]  }
 0x3cc   :  { %v1526_v46 = vpop.f32.mrb[59].mxu1 }
 0x3cd   :  { %5660 = vmatmul.mubr.msk.f32.gmra.mrb[56].mxu0 %vm219_vm0, %v1526_v46  ;;  %v6412_v46 = vld [vmem:[%s7291_s23 + $0x38] sm:$0xff]  }
 0x3ce   :  { %5662 = vmatprep.mubr.msk.f32.mxu0 %vm219_vm0, %v5583_v40  ;;  %v6409_v40 = vld [vmem:[%s7291_s23 + $0x20] sm:$0xff]  }
 0x3d1   :  { %5663 = vmatmul.mubr.msk.f32.gmra.mrb[58].mxu0 %vm219_vm0, %v5584_v52  ;;  %v6411_v52 = vld [vmem:[%s7291_s23 + $0x30] sm:$0xff]  }
 0x3d2   :  { %5693 = vmatprep.mubr.msk.bf16.mxu0 %vm219_vm0, %v6405_v34 }
 0x498   :  { %v5655_v13 = vpop.f32.mrb[52].mxu0 }
 0x499   :  { %v6260_v49 = vadd.f32 %v5655_v13, %v4886_v12  ;;  %v2062_v54 = vpop.f32.mrb[53].mxu0  ;;  %v6417_v13 = vld [vmem:[%s7291_s23 + $0x60] sm:$0xff]  }
 0x49a   :  { %v6261_v47 = vadd.f32 %v4886_v12, %v2062_v54  ;;  %v6419_v54 = vld [vmem:[%s7291_s23 + $0x70] sm:$0xff]  }
 0x49c   :  { %6549 = vtanh.f32 %v6261_v47  ;;  %v5658_v14 = vpop.f32.mrb[54].mxu0  ;;  %v6420_v47 = vld [vmem:[%s7291_s23 + $0x78] sm:$0xff]  }
 0x49d   :  { %6551 = vtanh.f32 %v6260_v49  ;;  %v6262_v32 = vadd.f32 %v5658_v14, %v4886_v12  ;;  %v2072_v16 = vpop.f32.mrb[55].mxu0  ;;  %v6418_v49 = vld [vmem:[%s7291_s23 + $0x68] sm:$0xff]   ;;  %v4952_v14 = vld [vmem:[%s4761_s2] ss:$0 sm:$0xff]  ;;  %s4766_s2 = sld [smem:[%s7814_s0 + %s6799_s28]]  }
 0x49e   :  { %v6263_v39 = vadd.f32 %v4886_v12, %v2072_v16 }
 0x4a0   :  { %6553 = vtanh.f32 %v6263_v39  ;;  %v5661_v17 = vpop.f32.mrb[56].mxu0 }
 0x4a1   :  { %6555 = vtanh.f32 %v6262_v32  ;;  %v6264_v45 = vadd.f32 %v5661_v17, %v4886_v12  ;;  %v2082_v30 = vpop.f32.mrb[57].mxu0 }
 0x4a2   :  { %v6265_v4 = vadd.f32 %v4886_v12, %v2082_v30  ;;  %v6709_v30 = vld [vmem:[%s6933_s29] sm:$0xff] }
 0x4a4   :  { %6557 = vtanh.f32 %v6265_v4  ;;  %v5664_v0 = vpop.f32.mrb[58].mxu0 }
 0x4a5   :  { %6559 = vtanh.f32 %v6264_v45  ;;  %v6266_v37 = vadd.f32 %v5664_v0, %v4886_v12  ;;  %v2092_v11 = vpop.f32.mrb[59].mxu0 }
 0x4a6   :  { %v7254_v22 = vpop.eup %6549  ;;  %v6267_v23 = vadd.f32 %v4886_v12, %v2092_v11  ;;  %v6416_v12 = vld [vmem:[%s7291_s23 + $0x58] sm:$0xff]  }
 0x4a7   :  { %v7256_v19 = vpop.eup %6551  ;;  %5673 = vmatprep.mubr.msk.f32.mxu1 %vm219_vm0, %v7254_v22 }
 0x4a8   :  { %6561 = vtanh.f32 %v6267_v23  ;;  %5674 = vmatmul.mubr.msk.f32.vlgmr.msra.gmra.mrb[60].mxu1 %vm219_vm0, %v7256_v19 }
 0x4a9   :  { %6563 = vtanh.f32 %v6266_v37  ;;  %6122 = vmatpush3.bf16.msra.mxu1 %v6119_v38  ;;  %v6415_v38 = vld [vmem:[%s7291_s23 + $0x50] sm:$0xff]   ;;  %s6797_s23 = smov 21  }
 0x4aa   :  { %v7262_v36 = vpop.eup %6553  ;;  %6124 = vmatprep.subr.bf16.mxu1 %v6123_v8  ;;  %s4767_s26 = sld [smem:[%s7814_s0 + %s6797_s23]]   ;;  %s6805_s23 = smov 29  }
 0x4ab   :  { %v7264_v25 = vpop.eup %6555  ;;  %5676 = vmatprep.mubr.msk.f32.mxu1 %vm219_vm0, %v7262_v36 }
 0x4ac   :  { %5677 = vmatmul.mubr.msk.f32.gmra.mrb[62].mxu1 %vm219_vm0, %v7264_v25 }
 0x4ad   :  { %6126 = vmatpush3.bf16.msra.mxu1 %v6123_v8  ;;  %v6711_v8 = vld [vmem:[%s6933_s29 + $0x10] sm:$0xff] }
 0x4ae   :  { %v7270_v26 = vpop.eup %6557  ;;  %5745 = vmatprep.subr.msk.mxu1 %vm955_vm1, %v6775_v20 }
 0x4af   :  { %v7274_v44 = vpop.eup %6559  ;;  %5679 = vmatprep.mubr.msk.f32.mxu1 %vm219_vm0, %v7270_v26 }
 0x4b0   :  { %5680 = vmatmul.mubr.msk.f32.gmra.mrb[64].mxu1 %vm219_vm0, %v7274_v44 }
 0x4b2   :  { %v7280_v29 = vpop.eup %6561 }
 0x4b3   :  { %v7282_v28 = vpop.eup %6563  ;;  %5682 = vmatprep.mubr.msk.f32.mxu1 %vm219_vm0, %v7280_v29 }
 0x4b4   :  { %5683 = vmatmul.mubr.msk.f32.gmra.mrb[66].mxu1 %vm219_vm0, %v7282_v28 }
 0x57b   :  { %v5675_v42 = vpop.f32.mrb[60].mxu1 }
 0x57c   :  { %v2224_v51 = vadd.f32 %v5675_v42, %v4911_v50  ;;  %v2218_v56 = vpop.f32.mrb[61].mxu1 }
 0x57d   :  { %v2219_v57 = vadd.f32 %v4911_v50, %v2218_v56 }
 0x57f   :  { %v2257_v15 = vpack.c.bf16 %v2224_v51, %v2219_v57  ;;  %v5678_v58 = vpop.f32.mrb[62].mxu1  ;;  %5733 = vmatprep.mubr.msk.f32.mxu1 %vm219_vm0, %v2219_v57 }
 0x580   :  { %v2234_v59 = vadd.f32 %v5678_v58, %v4911_v50  ;;  %v2228_v60 = vpop.f32.mrb[63].mxu1  ;;  %5734 = vmatmul.mubr.msk.f32.vlgmr.msra.gmra.mrb[68].mxu1 %vm219_vm0, %v2224_v51  ;;  %v6712_v51 = vld [vmem:[%s6933_s29 + $0x18] sm:$0xff]  ;;  %v6713_v58 = vld [vmem:[%s6933_s29 + $0x20] sm:$0xff] }
 0x581   :  { %v2229_v35 = vadd.f32 %v4911_v50, %v2228_v60  ;;  %6328 = vmatprep.subr.msk.bf16.mxu0 %vm219_vm0, %v2257_v15  ;;  %v2422_v43 = vsel %vm219_vm0, %v2257_v15, 0  ;;  %5746 = vmatpush3.msk.msra.mxu1 %vm955_vm1, %v6775_v20 }
 0x582   :  { %5686 = vmatpush3.bf16.xpose.msra.mxu0 %v2422_v43  ;;  %v6714_v43 = vld [vmem:[%s6933_s29 + $0x28] sm:$0xff] }
 0x583   :  { %v2258_v53 = vpack.c.bf16 %v2234_v59, %v2229_v35  ;;  %v5681_v27 = vpop.f32.mrb[64].mxu1  ;;  %5736 = vmatprep.mubr.msk.f32.mxu1 %vm219_vm0, %v2229_v35 }
 0x584   :  { %v2244_v61 = vadd.f32 %v5681_v27, %v4911_v50  ;;  %v2238_v41 = vpop.f32.mrb[65].mxu1  ;;  %5737 = vmatmul.mubr.msk.f32.gmra.mrb[70].mxu1 %vm219_vm0, %v2234_v59 }
 0x585   :  { %v2239_v62 = vadd.f32 %v4911_v50, %v2238_v41  ;;  %6329 = vmatprep.subr.msk.bf16.mxu0 %vm219_vm0, %v2258_v53  ;;  %v2425_v3 = vsel %vm219_vm0, %v2258_v53, 0 }
 0x587   :  { %v2259_v63 = vpack.c.bf16 %v2244_v61, %v2239_v62  ;;  %v5684_v33 = vpop.f32.mrb[66].mxu1  ;;  %5739 = vmatprep.mubr.msk.f32.mxu1 %vm219_vm0, %v2239_v62  ;;  %v6716_v62 = vld [vmem:[%s6933_s29 + $0x38] sm:$0xff] }
 0x588   :  { %v2254_v1 = vadd.f32 %v5684_v33, %v4911_v50  ;;  %v2248_v2 = vpop.f32.mrb[67].mxu1  ;;  %5740 = vmatmul.mubr.msk.f32.gmra.mrb[72].mxu1 %vm219_vm0, %v2244_v61  ;;  %v6715_v61 = vld [vmem:[%s6933_s29 + $0x30] sm:$0xff]  ;;  %v6717_v33 = vld [vmem:[%s6933_s29 + $0x40] sm:$0xff] }
 0x589   :  { %v2249_v20 = vadd.f32 %v4911_v50, %v2248_v2  ;;  %v2428_v24 = vsel %vm219_vm0, %v2259_v63, 0  ;;  %v6718_v2 = vld [vmem:[%s6933_s29 + $0x48] sm:$0xff] }
 0x58a   :  { %5688 = vmatpush3.bf16.xpose.msra.mxu0 %v2425_v3  ;;  %v6719_v3 = vld [vmem:[%s6933_s29 + $0x50] sm:$0xff] }
 0x58b   :  { %v2260_v5 = vpack.c.bf16 %v2254_v1, %v2249_v20  ;;  %6330 = vmatprep.subr.msk.bf16.mxu0 %vm219_vm0, %v2259_v63  ;;  %5742 = vmatprep.mubr.msk.f32.mxu1 %vm219_vm0, %v2249_v20 }
 0x58c   :  { %5743 = vmatmul.mubr.msk.f32.gmra.mrb[74].mxu1 %vm219_vm0, %v2254_v1 }
 0x58d   :  { %v2431_v55 = vsel %vm219_vm0, %v2260_v5, 0 }
 0x592   :  { %5690 = vmatpush3.bf16.xpose.msra.mxu0 %v2428_v24  ;;  %v6720_v24 = vld [vmem:[%s6933_s29 + $0x58] sm:$0xff] }
 0x593   :  { %6331 = vmatprep.subr.msk.bf16.mxu0 %vm219_vm0, %v2260_v5 }
 0x59a   :  { %5692 = vmatpush3.bf16.xpose.msra.mxu0 %v2431_v55 }
 0x59b   :  { %5795 = vmatprep.subr.bf16.mxu0 %v2257_v15 }
 0x5a1   :  { %5694 = vmatmul.mubr.msk.bf16.vlgmr.msra.gmra.mrb[60].mxu0 %vm219_vm0, %v6406_v6  ;;  %v6721_v6 = vld [vmem:[%s6933_s29 + $0x60] sm:$0xff] }
 0x5a2   :  { %5796 = vmatpush3.bf16.msra.mxu0 %v2257_v15  ;;  %5697 = vmatprep.mubr.msk.bf16.mxu0 %vm219_vm0, %v6407_v48 }
 0x5a3   :  { %5797 = vmatprep.subr.bf16.mxu0 %v2258_v53 }
 0x5a6   :  { %5798 = vmatpush3.bf16.msra.mxu0 %v2258_v53 }
 0x5a7   :  { %5799 = vmatprep.subr.bf16.mxu0 %v2259_v63 }
 0x5a9   :  { %5698 = vmatmul.mubr.msk.bf16.gmra.mrb[64].mxu0 %vm219_vm0, %v6408_v7  ;;  %v6722_v7 = vld [vmem:[%s6933_s29 + $0x68] sm:$0xff] }
 0x5aa   :  { %5800 = vmatpush3.bf16.msra.mxu0 %v2259_v63  ;;  %5701 = vmatprep.mubr.msk.bf16.mxu0 %vm219_vm0, %v6409_v40 }
 0x5ab   :  { %5801 = vmatprep.subr.bf16.mxu0 %v2260_v5 }
 0x5ae   :  { %5802 = vmatpush3.bf16.msra.mxu0 %v2260_v5 }
 0x5b1   :  { %5702 = vmatmul.mubr.msk.bf16.gmra.mrb[68].mxu0 %vm219_vm0, %v6410_v31  ;;  %v6723_v31 = vld [vmem:[%s6933_s29 + $0x70] sm:$0xff] }
 0x5b2   :  { %5705 = vmatprep.mubr.msk.bf16.mxu0 %vm219_vm0, %v6411_v52 }
 0x5b9   :  { %5706 = vmatmul.mubr.msk.bf16.gmra.mrb[72].mxu0 %vm219_vm0, %v6412_v46  ;;  %v6724_v46 = vld [vmem:[%s6933_s29 + $0x78] sm:$0xff] }
 0x5ba   :  { %5709 = vmatprep.mubr.msk.bf16.mxu0 %vm219_vm0, %v6413_v9 }
 0x5c1   :  { %5710 = vmatmul.mubr.msk.bf16.gmra.mrb[76].mxu0 %vm219_vm0, %v6414_v10 }
 0x5c2   :  { %5713 = vmatprep.mubr.msk.bf16.mxu0 %vm219_vm0, %v6415_v38  ;;  %v6725_v38 = vld [vmem:[%s6933_s29 + $0x80] sm:$0xff] }
 0x5c9   :  { %5714 = vmatmul.mubr.msk.bf16.gmra.mrb[80].mxu0 %vm219_vm0, %v6416_v12 }
 0x5ca   :  { %5717 = vmatprep.mubr.msk.bf16.mxu0 %vm219_vm0, %v6417_v13 }
 0x5d1   :  { %5718 = vmatmul.mubr.msk.bf16.gmra.mrb[84].mxu0 %vm219_vm0, %v6418_v49 }
 0x5d2   :  { %5721 = vmatprep.mubr.msk.bf16.mxu0 %vm219_vm0, %v6419_v54 }
 0x5d9   :  { %5722 = vmatmul.mubr.msk.bf16.gmra.mrb[88].mxu0 %vm219_vm0, %v6420_v47  ;;  %v6726_v47 = vld [vmem:[%s6933_s29 + $0x88] sm:$0xff] }
 0x653   :  { %v5735_v32 = vpop.f32.mrb[68].mxu1 }
 0x654   :  { %v7349_v16 = vadd.f32 %v5735_v32, %v4952_v14  ;;  %v2695_v39 = vpop.f32.mrb[69].mxu1  ;;  %v6727_v32 = vld [vmem:[%s6933_s29 + $0x90] sm:$0xff] }
 0x655   :  { %v7351_v17 = vadd.f32 %v4952_v14, %v2695_v39 }
 0x656   :  { %v2735_v21 = vmul.f32 %v6710_v18, %v7349_v16  ;;  %v2743_v20 = vmul.f32 %v6718_v2, %v7349_v16 }
 0x657   :  { %v5738_v45 = vpop.f32.mrb[70].mxu1  ;;  %v2734_v4 = vmul.f32 %v6709_v30, %v7351_v17  ;;  %v2742_v1 = vmul.f32 %v6717_v33, %v7351_v17  ;;  %v2750_v12 = vmul.f32 %v6725_v38, %v7351_v17 }
 0x658   :  { %v7357_v0 = vadd.f32 %v5738_v45, %v4952_v14  ;;  %v2705_v37 = vpop.f32.mrb[71].mxu1  ;;  %v6728_v45 = vld [vmem:[%s6933_s29 + $0x98] sm:$0xff] }
 0x659   :  { %v7359_v11 = vadd.f32 %v4952_v14, %v2705_v37  ;;  %5747 = vmatprep.mubr.msk.f32.mxu1 %vm858_vm2, %v2734_v4  ;;  %v6729_v4 = vld [vmem:[%s6933_s29 + $0xa0] sm:$0xff] }
 0x65a   :  { %5748 = vmatmul.mubr.msk.f32.vlgmr.msra.gmra.mrb[76].mxu1 %vm858_vm2, %v2735_v21  ;;  %v2737_v56 = vmul.f32 %v6712_v51, %v7357_v0  ;;  %v2745_v55 = vmul.f32 %v6720_v24, %v7357_v0  ;;  %v2753_v30 = vmul.f32 %v6728_v45, %v7357_v0  ;;  %v6730_v21 = vld [vmem:[%s6933_s29 + $0xa8] sm:$0xff]  ;;  %v6733_v51 = vld [vmem:[%s6933_s29 + $0xc0] sm:$0xff] }
 0x65b   :  { %v5741_v23 = vpop.f32.mrb[72].mxu1  ;;  %v2736_v34 = vmul.f32 %v6711_v8, %v7359_v11  ;;  %v2744_v5 = vmul.f32 %v6719_v3, %v7359_v11  ;;  %v2752_v39 = vmul.f32 %v6727_v32, %v7359_v11 }
 0x65c   :  { %v7365_v50 = vadd.f32 %v5741_v23, %v4952_v14  ;;  %v2715_v42 = vpop.f32.mrb[73].mxu1  ;;  %v6731_v23 = vld [vmem:[%s6933_s29 + $0xb0] sm:$0xff] }
 0x65d   :  { %v7369_v57 = vadd.f32 %v4952_v14, %v2715_v42  ;;  %5750 = vmatprep.mubr.msk.f32.mxu1 %vm858_vm2, %v2736_v34  ;;  %v6732_v34 = vld [vmem:[%s6933_s29 + $0xb8] sm:$0xff] }
 0x65e   :  { %5751 = vmatmul.mubr.msk.f32.gmra.mrb[78].mxu1 %vm858_vm2, %v2737_v56  ;;  %v2739_v53 = vmul.f32 %v6714_v43, %v7365_v50  ;;  %v2747_v40 = vmul.f32 %v6722_v7, %v7365_v50  ;;  %v2755_v37 = vmul.f32 %v6730_v21, %v7365_v50  ;;  %v2758_v56 = vmul.f32 %v6733_v51, %v7351_v17  ;;  %v6736_v43 = vld [vmem:[%s6933_s29 + $0xd8] sm:$0xff]  ;;  %v6737_v17 = vld [vmem:[%s6933_s29 + $0xe0] sm:$0xff] }
 0x65f   :  { %v5744_v15 = vpop.f32.mrb[74].mxu1  ;;  %v2738_v59 = vmul.f32 %v6713_v58, %v7369_v57  ;;  %v2746_v48 = vmul.f32 %v6721_v6, %v7369_v57  ;;  %v2754_v18 = vmul.f32 %v6729_v4, %v7369_v57 }
 0x660   :  { %v7375_v60 = vadd.f32 %v5744_v15, %v4952_v14  ;;  %v2725_v35 = vpop.f32.mrb[75].mxu1  ;;  %v6734_v15 = vld [vmem:[%s6933_s29 + $0xc8] sm:$0xff] }
 0x661   :  { %v7379_v27 = vadd.f32 %v4952_v14, %v2725_v35  ;;  %5753 = vmatprep.mubr.msk.f32.mxu1 %vm858_vm2, %v2738_v59  ;;  %v2751_v14 = vmul.f32 %v6726_v47, %v7349_v16  ;;  %v2759_v58 = vmul.f32 %v6734_v15, %v7349_v16  ;;  %v6735_v59 = vld [vmem:[%s6933_s29 + $0xd0] sm:$0xff] }
 0x662   :  { %5754 = vmatmul.mubr.msk.f32.gmra.mrb[80].mxu1 %vm858_vm2, %v2739_v53  ;;  %v2741_v63 = vmul.f32 %v6716_v62, %v7375_v60  ;;  %v2749_v9 = vmul.f32 %v6724_v46, %v7375_v60  ;;  %v2757_v42 = vmul.f32 %v6732_v34, %v7375_v60  ;;  %v2760_v35 = vmul.f32 %v6735_v59, %v7359_v11  ;;  %v6739_v62 = vld [vmem:[%s6933_s29 + $0xf0] sm:$0xff] }
 0x663   :  { %v2740_v41 = vmul.f32 %v6715_v61, %v7379_v27  ;;  %v2748_v52 = vmul.f32 %v6723_v31, %v7379_v27  ;;  %v2756_v8 = vmul.f32 %v6731_v23, %v7379_v27  ;;  %v2761_v53 = vmul.f32 %v6736_v43, %v7357_v0 }
 0x664   :  { %v2762_v61 = vmul.f32 %v6737_v17, %v7369_v57  ;;  %v2764_v11 = vmul.f32 %v6739_v62, %v7379_v27 }
 0x665   :  { %5756 = vmatprep.mubr.msk.f32.mxu1 %vm858_vm2, %v2740_v41  ;;  %v6738_v41 = vld [vmem:[%s6933_s29 + $0xe8] sm:$0xff] }
 0x666   :  { %5757 = vmatmul.mubr.msk.f32.gmra.mrb[82].mxu1 %vm858_vm2, %v2741_v63  ;;  %v2763_v16 = vmul.f32 %v6738_v41, %v7365_v50  ;;  %v6740_v63 = vld [vmem:[%s6933_s29 + $0xf8] sm:$0xff]  ;;  %s6788_s29 = smov 17  }
 0x667   :  { %5759 = vmatprep.mubr.msk.f32.mxu1 %vm858_vm2, %v2742_v1  ;;  %v2765_v0 = vmul.f32 %v6740_v63, %v7375_v60  ;;  %s7522_s5 = sld [smem:[%s7814_s0 + %s6788_s29]]   ;;  %s6800_s29 = smov 23  }
 0x66a   :  { %5760 = vmatmul.mubr.msk.f32.gmra.mrb[84].mxu1 %vm858_vm2, %v2743_v20 }
 0x66b   :  { %5762 = vmatprep.mubr.msk.f32.mxu1 %vm858_vm2, %v2744_v5 }
 0x66d   :  { %v3441_v4 = vld [vmem:[%s7522_s5] sm:$0xff]  ;;  %v3443_v21 = vld [vmem:[%s7522_s5 + $0x10] sm:$0xff]  ;;  %v3444_v23 = vld [vmem:[%s7522_s5 + $0x18] sm:$0xff] }
 0x66e   :  { %5763 = vmatmul.mubr.msk.f32.gmra.mrb[86].mxu1 %vm858_vm2, %v2745_v55 }
 0x66f   :  { %5765 = vmatprep.mubr.msk.f32.mxu1 %vm858_vm2, %v2746_v48 }
 0x672   :  { %5766 = vmatmul.mubr.msk.f32.gmra.mrb[88].mxu1 %vm858_vm2, %v2747_v40 }
 0x673   :  { %5768 = vmatprep.mubr.msk.f32.mxu1 %vm858_vm2, %v2748_v52 }
 0x674   :  { %v7412_v10 = vpop.f32.mrb[60].mxu0 }
 0x675   :  { %v7416_v13 = vpop.f32.mrb[61].mxu0 }
 0x676   :  { %5769 = vmatmul.mubr.msk.f32.gmra.mrb[90].mxu1 %vm858_vm2, %v2749_v9  ;;  %v7419_v49 = vpop.f32.mrb[62].mxu0 }
 0x677   :  { %5771 = vmatprep.mubr.msk.f32.mxu1 %vm858_vm2, %v2750_v12  ;;  %v7422_v54 = vpop.f32.mrb[63].mxu0 }
 0x67a   :  { %5772 = vmatmul.mubr.msk.f32.gmra.mrb[92].mxu1 %vm858_vm2, %v2751_v14 }
 0x67b   :  { %5774 = vmatprep.mubr.msk.f32.mxu1 %vm858_vm2, %v2752_v39 }
 0x67c   :  { %v7469_v57 = vpop.f32.mrb[64].mxu0 }
 0x67d   :  { %v2483_v33 = vpop.f32.mrb[65].mxu0 }
 0x67e   :  { %5775 = vmatmul.mubr.msk.f32.gmra.mrb[94].mxu1 %vm858_vm2, %v2753_v30  ;;  %v5700_v1 = vpop.f32.mrb[66].mxu0 }
 0x67f   :  { %5777 = vmatprep.mubr.msk.f32.mxu1 %vm858_vm2, %v2754_v18  ;;  %v2486_v2 = vpop.f32.mrb[67].mxu0  ;;  %v3442_v18 = vld [vmem:[%s7522_s5 + $0x8] sm:$0xff] }
 0x682   :  { %5778 = vmatmul.mubr.msk.f32.gmra.mrb[96].mxu1 %vm858_vm2, %v2755_v37  ;;  %v6127_v37 = vpack.c.bf16 %v3442_v18, %v3441_v4 }
 0x683   :  { %5780 = vmatprep.mubr.msk.f32.mxu1 %vm858_vm2, %v2756_v8  ;;  %v6131_v8 = vpack.c.bf16 %v3444_v23, %v3443_v21 }
 0x684   :  { %v7471_v20 = vpop.f32.mrb[68].mxu0  ;;  %6128 = vmatprep.subr.bf16.mxu1 %v6127_v37 }
 0x685   :  { %v7473_v50 = vpop.f32.mrb[69].mxu0  ;;  %6130 = vmatpush3.bf16.msra.mxu1 %v6127_v37 }
 0x686   :  { %5781 = vmatmul.mubr.msk.f32.gmra.mrb[98].mxu1 %vm858_vm2, %v2757_v42  ;;  %v7475_v3 = vpop.f32.mrb[70].mxu0  ;;  %6132 = vmatprep.subr.bf16.mxu1 %v6131_v8 }
 0x687   :  { %5783 = vmatprep.mubr.msk.f32.mxu1 %vm858_vm2, %v2758_v56  ;;  %v7477_v27 = vpop.f32.mrb[71].mxu0 }
 0x689   :  { %6134 = vmatpush3.bf16.msra.mxu1 %v6131_v8 }
 0x68a   :  { %5784 = vmatmul.mubr.msk.f32.gmra.mrb[100].mxu1 %vm858_vm2, %v2759_v58 }
 0x68b   :  { %5786 = vmatprep.mubr.msk.f32.mxu1 %vm858_vm2, %v2760_v35 }
 0x68c   :  { %v7479_v5 = vpop.f32.mrb[72].mxu0 }
 0x68d   :  { %v7481_v24 = vpop.f32.mrb[73].mxu0 }
 0x68e   :  { %5787 = vmatmul.mubr.msk.f32.gmra.mrb[102].mxu1 %vm858_vm2, %v2761_v53  ;;  %v7483_v60 = vpop.f32.mrb[74].mxu0 }
 0x68f   :  { %5789 = vmatprep.mubr.msk.f32.mxu1 %vm858_vm2, %v2762_v61  ;;  %v7485_v55 = vpop.f32.mrb[75].mxu0 }
 0x692   :  { %5790 = vmatmul.mubr.msk.f32.gmra.mrb[104].mxu1 %vm858_vm2, %v2763_v16 }
 0x693   :  { %5792 = vmatprep.mubr.msk.f32.mxu1 %vm858_vm2, %v2764_v11 }
 0x694   :  { %v7487_v6 = vpop.f32.mrb[76].mxu0 }
 0x695   :  { %v7489_v48 = vpop.f32.mrb[77].mxu0 }
 0x696   :  { %5793 = vmatmul.mubr.msk.f32.gmra.mrb[106].mxu1 %vm858_vm2, %v2765_v0  ;;  %v7491_v7 = vpop.f32.mrb[78].mxu0 }
 0x697   :  { %v7493_v40 = vpop.f32.mrb[79].mxu0 }
 0x69c   :  { %v7495_v31 = vpop.f32.mrb[80].mxu0 }
 0x69d   :  { %v7497_v52 = vpop.f32.mrb[81].mxu0 }
 0x69e   :  { %v7499_v46 = vpop.f32.mrb[82].mxu0 }
 0x69f   :  { %v7501_v9 = vpop.f32.mrb[83].mxu0 }
 0x6a4   :  { %v7503_v38 = vpop.f32.mrb[84].mxu0 }
 0x6a5   :  { %v7505_v12 = vpop.f32.mrb[85].mxu0 }
 0x6a6   :  { %v7507_v47 = vpop.f32.mrb[86].mxu0 }
 0x6a7   :  { %v7509_v14 = vpop.f32.mrb[87].mxu0 }
 0x6ac   :  { %v7511_v32 = vpop.f32.mrb[88].mxu0 }
 0x6ad   :  { %v7513_v39 = vpop.f32.mrb[89].mxu0 }
 0x6ae   :  { %v7515_v45 = vpop.f32.mrb[90].mxu0 }
 0x6af   :  { %v7517_v30 = vpop.f32.mrb[91].mxu0 }
 0x72d   :  { %v5749_v34 = vpop.f32.mrb[76].mxu1 }
 0x72e   :  { %v2934_v42 = vadd.f32 %v5749_v34, %v7422_v54  ;;  %v2928_v51 = vpop.f32.mrb[77].mxu1 }
 0x72f   :  { %v2929_v56 = vadd.f32 %v2928_v51, %v7416_v13 }
 0x730   :  { %6565 = vtanh.f32 %v2934_v42 }
 0x731   :  { %6567 = vtanh.f32 %v2929_v56  ;;  %v5752_v15 = vpop.f32.mrb[78].mxu1 }
 0x732   :  { %v2944_v58 = vadd.f32 %v5752_v15, %v7419_v49  ;;  %v2938_v59 = vpop.f32.mrb[79].mxu1 }
 0x733   :  { %v2939_v35 = vadd.f32 %v7412_v10, %v2938_v59 }
 0x734   :  { %6569 = vtanh.f32 %v2944_v58 }
 0x735   :  { %6571 = vtanh.f32 %v2939_v35  ;;  %v5755_v43 = vpop.f32.mrb[80].mxu1 }
 0x736   :  { %v2954_v53 = vadd.f32 %v5755_v43, %v2486_v2  ;;  %v2948_v17 = vpop.f32.mrb[81].mxu1 }
 0x737   :  { %v2949_v61 = vadd.f32 %v2948_v17, %v2483_v33 }
 0x738   :  { %6573 = vtanh.f32 %v2954_v53  ;;  %v6741_v53 = vld [vmem:[%s7125_s7 + $0x8] sm:$0xff] }
 0x739   :  { %6575 = vtanh.f32 %v2949_v61  ;;  %v5758_v54 = vpop.f32.mrb[82].mxu1 }
 0x73a   :  { %v6566_v41 = vpop.eup %6565  ;;  %v2964_v16 = vadd.f32 %v5758_v54, %v5700_v1  ;;  %v2958_v13 = vpop.f32.mrb[83].mxu1  ;;  %v6742_v54 = vld [vmem:[%s7125_s7] sm:$0xff] }
 0x73b   :  { %v6568_v62 = vpop.eup %6567  ;;  %v3121_v11 = vmul.f32 1.442695, %v6566_v41  ;;  %v2959_v63 = vadd.f32 %v7469_v57, %v2958_v13 }
 0x73c   :  { %v3119_v49 = vmul.f32 1.442695, %v6568_v62  ;;  %6577 = vtanh.f32 %v2964_v16 }
 0x73d   :  { %6579 = vpow2.f32 %v3121_v11  ;;  %v5761_v10 = vpop.f32.mrb[84].mxu1 }
 0x73e   :  { %v6570_v0 = vpop.eup %6569  ;;  %6581 = vpow2.f32 %v3119_v49  ;;  %v2974_v2 = vadd.f32 %v5761_v10, %v7477_v27  ;;  %v2968_v4 = vpop.f32.mrb[85].mxu1 }
 0x73f   :  { %v6572_v33 = vpop.eup %6571  ;;  %v3125_v18 = vmul.f32 1.442695, %v6570_v0  ;;  %6583 = vtanh.f32 %v2959_v63  ;;  %v2969_v21 = vadd.f32 %v2968_v4, %v7473_v50  ;;  %v6743_v0 = vld [vmem:[%s7125_s7 + $0x18] sm:$0xff] }
 0x740   :  { %v3123_v1 = vmul.f32 1.442695, %v6572_v33  ;;  %6585 = vtanh.f32 %v2974_v2  ;;  %v6744_v33 = vld [vmem:[%s7125_s7 + $0x10] sm:$0xff] }
 0x741   :  { %6587 = vpow2.f32 %v3125_v18  ;;  %v5764_v37 = vpop.f32.mrb[86].mxu1 }
 0x742   :  { %v6574_v23 = vpop.eup %6573  ;;  %6589 = vpow2.f32 %v3123_v1  ;;  %v2984_v57 = vadd.f32 %v5764_v37, %v7475_v3  ;;  %v2978_v8 = vpop.f32.mrb[87].mxu1 }
 0x743   :  { %v6576_v34 = vpop.eup %6575  ;;  %v3129_v42 = vmul.f32 1.442695, %v6574_v23  ;;  %6591 = vtanh.f32 %v2969_v21  ;;  %v2979_v27 = vadd.f32 %v7471_v20, %v2978_v8 }
 0x744   :  { %v3127_v51 = vmul.f32 1.442695, %v6576_v34  ;;  %6593 = vtanh.f32 %v2984_v57 }
 0x745   :  { %6595 = vpow2.f32 %v3129_v42  ;;  %v5767_v56 = vpop.f32.mrb[88].mxu1 }
 0x746   :  { %v6578_v50 = vpop.eup %6577  ;;  %6597 = vpow2.f32 %v3127_v51  ;;  %v2994_v15 = vadd.f32 %v5767_v56, %v7485_v55  ;;  %v2988_v58 = vpop.f32.mrb[89].mxu1 }
 0x747   :  { %v6580_v59 = vpop.eup %6579  ;;  %v3133_v35 = vmul.f32 1.442695, %v6578_v50  ;;  %6599 = vtanh.f32 %v2979_v27  ;;  %v2989_v3 = vadd.f32 %v2988_v58, %v7481_v24  ;;  %v6745_v27 = vld [vmem:[%s7125_s7 + $0x28] sm:$0xff] }
 0x748   :  { %v6582_v43 = vpop.eup %6581  ;;  %6601 = vtanh.f32 %v2994_v15  ;;  %v3184_v17 = vmul.f32 %v6741_v53, %v6580_v59  ;;  %v6746_v15 = vld [vmem:[%s7125_s7 + $0x20] sm:$0xff] }
 0x749   :  { %v6584_v20 = vpop.eup %6583  ;;  %6603 = vpow2.f32 %v3133_v35  ;;  %v5770_v61 = vpop.f32.mrb[90].mxu1  ;;  %v3183_v41 = vmul.f32 %v6742_v54, %v6582_v43 }
 0x74a   :  { %v6586_v16 = vpop.eup %6585  ;;  %v3131_v13 = vmul.f32 1.442695, %v6584_v20  ;;  %6605 = vtanh.f32 %v2989_v3  ;;  %v3004_v55 = vadd.f32 %v5770_v61, %v7483_v60  ;;  %v2998_v62 = vpop.f32.mrb[91].mxu1 }
 0x74b   :  { %v6588_v11 = vpop.eup %6587  ;;  %v3137_v63 = vmul.f32 1.442695, %v6586_v16  ;;  %v2999_v24 = vadd.f32 %v7479_v5, %v2998_v62  ;;  %v3215_v49 = vpack.c.bf16 %v3184_v17, %v3183_v41  ;;  %v6747_v41 = vld [vmem:[%s7125_s7 + $0x38] sm:$0xff] }
 0x74c   :  { %v6590_v10 = vpop.eup %6589  ;;  %v3186_v2 = vmul.f32 %v6743_v0, %v6588_v11  ;;  %6607 = vpow2.f32 %v3131_v13  ;;  %v6748_v11 = vld [vmem:[%s7125_s7 + $0x30] sm:$0xff] }
 0x74d   :  { %v6592_v4 = vpop.eup %6591  ;;  %v3185_v18 = vmul.f32 %v6744_v33, %v6590_v10  ;;  %6609 = vpow2.f32 %v3137_v63  ;;  %v5773_v21 = vpop.f32.mrb[92].mxu1  ;;  %5803 = vmatprep.mubr.msk.bf16.mxu0 %vm1328_vm3, %v3215_v49 }
 0x74e   :  { %v6594_v1 = vpop.eup %6593  ;;  %v3135_v60 = vmul.f32 1.442695, %v6592_v4  ;;  %6611 = vtanh.f32 %v3004_v55  ;;  %v3014_v37 = vadd.f32 %v5773_v21, %v7493_v40  ;;  %v3008_v5 = vpop.f32.mrb[93].mxu1  ;;  %v6749_v4 = vld [vmem:[%s7125_s7 + $0x48] sm:$0xff] }
 0x74f   :  { %v6596_v23 = vpop.eup %6595  ;;  %v3216_v57 = vpack.c.bf16 %v3186_v2, %v3185_v18  ;;  %v3141_v8 = vmul.f32 1.442695, %v6594_v1  ;;  %6613 = vtanh.f32 %v2999_v24  ;;  %v3009_v34 = vadd.f32 %v3008_v5, %v7489_v48 }
 0x750   :  { %v6598_v42 = vpop.eup %6597  ;;  %6615 = vpow2.f32 %v3135_v60  ;;  %v3188_v51 = vmul.f32 %v6745_v27, %v6596_v23  ;;  %v6751_v27 = vld [vmem:[%s7125_s7 + $0x58] sm:$0xff] }
 0x751   :  { %v6600_v56 = vpop.eup %6599  ;;  %6617 = vpow2.f32 %v3141_v8  ;;  %v5776_v50 = vpop.f32.mrb[94].mxu1  ;;  %5804 = vmatmul.mubr.msk.bf16.vlgmr.msra.gmra.mrb[92].mxu0 %vm1328_vm3, %v3216_v57  ;;  %v3187_v58 = vmul.f32 %v6746_v15, %v6598_v42 }
 0x752   :  { %v6602_v59 = vpop.eup %6601  ;;  %v3139_v40 = vmul.f32 1.442695, %v6600_v56  ;;  %6619 = vtanh.f32 %v3014_v37  ;;  %v3024_v35 = vadd.f32 %v5776_v50, %v7491_v7  ;;  %v3018_v3 = vpop.f32.mrb[95].mxu1  ;;  %v6750_v37 = vld [vmem:[%s7125_s7 + $0x40] sm:$0xff] }
 0x753   :  { %v6604_v43 = vpop.eup %6603  ;;  %v3145_v48 = vmul.f32 1.442695, %v6602_v59  ;;  %6621 = vtanh.f32 %v3009_v34  ;;  %v3019_v53 = vadd.f32 %v7487_v6, %v3018_v3  ;;  %v3217_v17 = vpack.c.bf16 %v3188_v51, %v3187_v58  ;;  %v6752_v59 = vld [vmem:[%s7125_s7 + $0x50] sm:$0xff]  ;;  %v6753_v3 = vld [vmem:[%s7125_s7 + $0x68] sm:$0xff] }
 0x754   :  { %v6606_v20 = vpop.eup %6605  ;;  %6623 = vpow2.f32 %v3139_v40  ;;  %v3190_v16 = vmul.f32 %v6747_v41, %v6604_v43  ;;  %v6754_v41 = vld [vmem:[%s7125_s7 + $0x60] sm:$0xff] }
 0x755   :  { %6625 = vpow2.f32 %v3145_v48  ;;  %v3143_v61 = vmul.f32 1.442695, %v6606_v20  ;;  %v5779_v54 = vpop.f32.mrb[96].mxu1  ;;  %5807 = vmatprep.mubr.msk.bf16.mxu0 %vm1328_vm3, %v3217_v17 }
 0x756   :  { %v6608_v13 = vpop.eup %6607  ;;  %6627 = vtanh.f32 %v3024_v35  ;;  %v3034_v7 = vadd.f32 %v5779_v54, %v7501_v9  ;;  %v3028_v55 = vpop.f32.mrb[97].mxu1 }
 0x757   :  { %v6610_v62 = vpop.eup %6609  ;;  %6629 = vpow2.f32 %v3143_v61  ;;  %v3029_v6 = vadd.f32 %v3028_v55, %v7497_v52  ;;  %v3189_v63 = vmul.f32 %v6748_v11, %v6608_v13 }
 0x758   :  { %v6612_v24 = vpop.eup %6611  ;;  %6631 = vtanh.f32 %v3019_v53  ;;  %v3192_v33 = vmul.f32 %v6749_v4, %v6610_v62 }
 0x759   :  { %v6614_v49 = vpop.eup %6613  ;;  %v3149_v10 = vmul.f32 1.442695, %v6612_v24  ;;  %6633 = vtanh.f32 %v3034_v7  ;;  %v5782_v0 = vpop.f32.mrb[98].mxu1  ;;  %v3218_v2 = vpack.c.bf16 %v3190_v16, %v3189_v63 }
 0x75a   :  { %v6616_v18 = vpop.eup %6615  ;;  %v3147_v21 = vmul.f32 1.442695, %v6614_v49  ;;  %6635 = vtanh.f32 %v3029_v6  ;;  %v3044_v9 = vadd.f32 %v5782_v0, %v7499_v46  ;;  %v3038_v1 = vpop.f32.mrb[99].mxu1  ;;  %v6755_v0 = vld [vmem:[%s7125_s7 + $0x78] sm:$0xff] }
 0x75b   :  { %v6618_v52 = vpop.eup %6617  ;;  %6637 = vpow2.f32 %v3149_v10  ;;  %5808 = vmatmul.mubr.msk.bf16.gmra.mrb[96].mxu0 %vm1328_vm3, %v3218_v2  ;;  %v3039_v60 = vadd.f32 %v7495_v31, %v3038_v1  ;;  %v3191_v5 = vmul.f32 %v6750_v37, %v6616_v18 }
 0x75c   :  { %v6620_v23 = vpop.eup %6619  ;;  %6639 = vpow2.f32 %v3147_v21  ;;  %v3194_v46 = vmul.f32 %v6751_v27, %v6618_v52 }
 0x75d   :  { %v6622_v57 = vpop.eup %6621  ;;  %v3153_v8 = vmul.f32 1.442695, %v6620_v23  ;;  %6641 = vtanh.f32 %v3044_v9  ;;  %v5785_v34 = vpop.f32.mrb[100].mxu1  ;;  %v3219_v42 = vpack.c.bf16 %v3192_v33, %v3191_v5  ;;  %v6756_v33 = vld [vmem:[%s7125_s7 + $0x70] sm:$0xff] }
 0x75e   :  { %v6624_v51 = vpop.eup %6623  ;;  %v3151_v56 = vmul.f32 1.442695, %v6622_v57  ;;  %6643 = vtanh.f32 %v3039_v60  ;;  %v3054_v50 = vadd.f32 %v5785_v34, %v7509_v14  ;;  %v3048_v15 = vpop.f32.mrb[101].mxu1  ;;  %v6757_v57 = vld [vmem:[%s7125_s7 + $0x88] sm:$0xff] }
 0x75f   :  { %v6626_v31 = vpop.eup %6625  ;;  %6645 = vpow2.f32 %v3153_v8  ;;  %5811 = vmatprep.mubr.msk.bf16.mxu0 %vm1328_vm3, %v3219_v42  ;;  %v3049_v58 = vadd.f32 %v3048_v15, %v7505_v12  ;;  %v3193_v40 = vmul.f32 %v6752_v59, %v6624_v51  ;;  %v6758_v42 = vld [vmem:[%s7125_s7 + $0x80] sm:$0xff] }
 0x760   :  { %v6628_v35 = vpop.eup %6627  ;;  %6647 = vpow2.f32 %v3151_v56  ;;  %v3196_v43 = vmul.f32 %v6753_v3, %v6626_v31  ;;  %v6759_v31 = vld [vmem:[%s7125_s7 + $0x98] sm:$0xff] }
 0x761   :  { %v6630_v48 = vpop.eup %6629  ;;  %v3157_v53 = vmul.f32 1.442695, %v6628_v35  ;;  %6649 = vtanh.f32 %v3054_v50  ;;  %v5788_v17 = vpop.f32.mrb[102].mxu1  ;;  %v3220_v20 = vpack.c.bf16 %v3194_v46, %v3193_v40  ;;  %v6760_v35 = vld [vmem:[%s7125_s7 + $0x90] sm:$0xff] }
 0x762   :  { %v6632_v14 = vpop.eup %6631  ;;  %6651 = vtanh.f32 %v3049_v58  ;;  %v3064_v61 = vadd.f32 %v5788_v17, %v7507_v47  ;;  %v3058_v54 = vpop.f32.mrb[103].mxu1  ;;  %v3195_v16 = vmul.f32 %v6754_v41, %v6630_v48  ;;  %v6761_v48 = vld [vmem:[%s7125_s7 + $0xa8] sm:$0xff] }
 0x763   :  { %v6634_v12 = vpop.eup %6633  ;;  %6653 = vpow2.f32 %v3157_v53  ;;  %v3155_v13 = vmul.f32 1.442695, %v6632_v14  ;;  %5812 = vmatmul.mubr.msk.bf16.gmra.mrb[100].mxu0 %vm1328_vm3, %v3220_v20  ;;  %v3059_v7 = vadd.f32 %v7503_v38, %v3058_v54  ;;  %v6762_v14 = vld [vmem:[%s7125_s7 + $0xa0] sm:$0xff] }
 0x764   :  { %v6636_v55 = vpop.eup %6635  ;;  %v3161_v62 = vmul.f32 1.442695, %v6634_v12  ;;  %6655 = vtanh.f32 %v3064_v61  ;;  %v3221_v6 = vpack.c.bf16 %v3196_v43, %v3195_v16 }
 0x765   :  { %v6638_v11 = vpop.eup %6637  ;;  %6657 = vpow2.f32 %v3155_v13  ;;  %v3159_v63 = vmul.f32 1.442695, %v6636_v55  ;;  %v5791_v47 = vpop.f32.mrb[104].mxu1  ;;  %v6763_v55 = vld [vmem:[%s7125_s7 + $0xb8] sm:$0xff] }
 0x766   :  { %v6640_v24 = vpop.eup %6639  ;;  %6659 = vpow2.f32 %v3161_v62  ;;  %v3074_v49 = vadd.f32 %v5791_v47, %v7517_v30  ;;  %5815 = vmatprep.mubr.msk.bf16.mxu0 %vm1328_vm3, %v3221_v6  ;;  %v3068_v10 = vpop.f32.mrb[105].mxu1  ;;  %v3198_v2 = vmul.f32 %v6755_v0, %v6638_v11  ;;  %v6764_v11 = vld [vmem:[%s7125_s7 + $0xb0] sm:$0xff] }
 0x767   :  { %v6642_v4 = vpop.eup %6641  ;;  %6661 = vpow2.f32 %v3159_v63  ;;  %v3069_v38 = vadd.f32 %v3068_v10, %v7513_v39  ;;  %v3197_v18 = vmul.f32 %v6756_v33, %v6640_v24 }
 0x768   :  { %v6644_v21 = vpop.eup %6643  ;;  %v3165_v9 = vmul.f32 1.442695, %v6642_v4  ;;  %6663 = vtanh.f32 %v3059_v7  ;;  %v6765_v4 = vld [vmem:[%s7125_s7 + $0xc8] sm:$0xff] }
 0x769   :  { %v6646_v1 = vpop.eup %6645  ;;  %v3163_v52 = vmul.f32 1.442695, %v6644_v21  ;;  %6665 = vtanh.f32 %v3074_v49  ;;  %v5794_v30 = vpop.f32.mrb[106].mxu1  ;;  %v3222_v60 = vpack.c.bf16 %v3198_v2, %v3197_v18  ;;  %v6766_v18 = vld [vmem:[%s7125_s7 + $0xc0] sm:$0xff] }
 0x76a   :  { %v6648_v37 = vpop.eup %6647  ;;  %6667 = vpow2.f32 %v3165_v9  ;;  %v3084_v5 = vadd.f32 %v5794_v30, %v7515_v45  ;;  %v3078_v23 = vpop.f32.mrb[107].mxu1  ;;  %v3200_v8 = vmul.f32 %v6757_v57, %v6646_v1  ;;  %v6767_v30 = vld [vmem:[%s7125_s7 + $0xd8] sm:$0xff] }
 0x76b   :  { %v6650_v39 = vpop.eup %6649  ;;  %6669 = vpow2.f32 %v3163_v52  ;;  %5816 = vmatmul.mubr.msk.bf16.gmra.mrb[104].mxu0 %vm1328_vm3, %v3222_v60  ;;  %v3079_v34 = vadd.f32 %v7511_v32, %v3078_v23  ;;  %v3199_v27 = vmul.f32 %v6758_v42, %v6648_v37  ;;  %v6768_v23 = vld [vmem:[%s7125_s7 + $0xd0] sm:$0xff] }
 0x76c   :  { %v6652_v46 = vpop.eup %6651  ;;  %v3169_v51 = vmul.f32 1.442695, %v6650_v39  ;;  %6671 = vtanh.f32 %v3069_v38  ;;  %v6769_v39 = vld [vmem:[%s7125_s7 + $0xe8] sm:$0xff] }
 0x76d   :  { %v6654_v56 = vpop.eup %6653  ;;  %v3167_v50 = vmul.f32 1.442695, %v6652_v46  ;;  %6673 = vtanh.f32 %v3084_v5  ;;  %v3223_v45 = vpack.c.bf16 %v3200_v8, %v3199_v27  ;;  %v6770_v46 = vld [vmem:[%s7125_s7 + $0xe0] sm:$0xff] }
 0x76e   :  { %v6656_v15 = vpop.eup %6655  ;;  %6675 = vpow2.f32 %v3169_v51  ;;  %v3202_v58 = vmul.f32 %v6759_v31, %v6654_v56  ;;  %v6772_v31 = vld [vmem:[%s7125_s7 + $0xf0] sm:$0xff] }
 0x76f   :  { %v6658_v59 = vpop.eup %6657  ;;  %6677 = vpow2.f32 %v3167_v50  ;;  %v3173_v40 = vmul.f32 1.442695, %v6656_v15  ;;  %5819 = vmatprep.mubr.msk.bf16.mxu0 %vm1328_vm3, %v3223_v45  ;;  %v6771_v50 = vld [vmem:[%s7125_s7 + $0xf8] sm:$0xff] }
 0x770   :  { %v6660_v32 = vpop.eup %6659  ;;  %6679 = vtanh.f32 %v3079_v34  ;;  %v3201_v3 = vmul.f32 %v6760_v35, %v6658_v59 }
 0x771   :  { %v6662_v43 = vpop.eup %6661  ;;  %6681 = vpow2.f32 %v3173_v40  ;;  %v3204_v53 = vmul.f32 %v6761_v48, %v6660_v32  ;;  %v3588_v40 = vld [vmem:[%s7522_s5 + $0x20] sm:$0xff]  ;;  %v3589_v32 = vld [vmem:[%s7522_s5 + $0x28] sm:$0xff] }
 0x772   :  { %v6664_v17 = vpop.eup %6663  ;;  %v3224_v20 = vpack.c.bf16 %v3202_v58, %v3201_v3  ;;  %v3203_v61 = vmul.f32 %v6762_v14, %v6662_v43  ;;  %v6135_v35 = vpack.c.bf16 %v3589_v32, %v3588_v40  ;;  %v3590_v3 = vld [vmem:[%s7522_s5 + $0x30] sm:$0xff]  ;;  %v3591_v43 = vld [vmem:[%s7522_s5 + $0x38] sm:$0xff] }
 0x773   :  { %v6666_v54 = vpop.eup %6665  ;;  %v3171_v41 = vmul.f32 1.442695, %v6664_v17 }
 0x774   :  { %v6668_v16 = vpop.eup %6667  ;;  %v3177_v12 = vmul.f32 1.442695, %v6666_v54  ;;  %5820 = vmatmul.mubr.msk.bf16.gmra.mrb[108].mxu0 %vm1328_vm3, %v3224_v20  ;;  %v3225_v13 = vpack.c.bf16 %v3204_v53, %v3203_v61  ;;  %6136 = vmatprep.subr.bf16.mxu1 %v6135_v35  ;;  %v6139_v20 = vpack.c.bf16 %v3591_v43, %v3590_v3  ;;  %v3729_v61 = vld [vmem:[%s7522_s5 + $0x40] sm:$0xff]  ;;  %v3730_v54 = vld [vmem:[%s7522_s5 + $0x48] sm:$0xff]  ;;  %v6790_v43 = vmov 0.0|0.0  }
 0x775   :  { %v6670_v7 = vpop.eup %6669  ;;  %6683 = vpow2.f32 %v3171_v41  ;;  %v3206_v62 = vmul.f32 %v6763_v55, %v6668_v16  ;;  %v6143_v41 = vpack.c.bf16 %v3730_v54, %v3729_v61  ;;  %v3731_v55 = vld [vmem:[%s7522_s5 + $0x50] sm:$0xff]  ;;  %6159 = vmatprep.subr.bf16.mxu0 %v6790_v43 }
 0x776   :  { %v6672_v6 = vpop.eup %6671  ;;  %6685 = vpow2.f32 %v3177_v12  ;;  %5823 = vmatprep.mubr.msk.bf16.mxu0 %vm1328_vm3, %v3225_v13  ;;  %v3205_v63 = vmul.f32 %v6764_v11, %v6670_v7 }
 0x777   :  { %v6674_v47 = vpop.eup %6673  ;;  %v3175_v24 = vmul.f32 1.442695, %v6672_v6 }
 0x778   :  { %v6676_v49 = vpop.eup %6675  ;;  %v3181_v10 = vmul.f32 1.442695, %v6674_v47  ;;  %v3226_v0 = vpack.c.bf16 %v3206_v62, %v3205_v63  ;;  %v3732_v62 = vld [vmem:[%s7522_s5 + $0x58] sm:$0xff] }
 0x779   :  { %v6678_v2 = vpop.eup %6677  ;;  %6687 = vpow2.f32 %v3175_v24  ;;  %v3208_v38 = vmul.f32 %v6765_v4, %v6676_v49  ;;  %v6147_v47 = vpack.c.bf16 %v3732_v62, %v3731_v55  ;;  %v3870_v49 = vld [vmem:[%s7522_s5 + $0x60] sm:$0xff] }
 0x77a   :  { %v6680_v33 = vpop.eup %6679  ;;  %6689 = vpow2.f32 %v3181_v10  ;;  %v3207_v21 = vmul.f32 %v6766_v18, %v6678_v2  ;;  %v3871_v10 = vld [vmem:[%s7522_s5 + $0x68] sm:$0xff]  ;;  %v3872_v18 = vld [vmem:[%s7522_s5 + $0x70] sm:$0xff] }
 0x77b   :  { %v6682_v9 = vpop.eup %6681  ;;  %v3179_v1 = vmul.f32 1.442695, %v6680_v33 }
 0x77c   :  { %5824 = vmatmul.mubr.msk.bf16.gmra.mrb[112].mxu0 %vm1328_vm3, %v3226_v0  ;;  %v3227_v52 = vpack.c.bf16 %v3208_v38, %v3207_v21  ;;  %v3210_v60 = vmul.f32 %v6767_v30, %v6682_v9  ;;  %v6151_v0 = vpack.c.bf16 %v3871_v10, %v3870_v49  ;;  %v3873_v21 = vld [vmem:[%s7522_s5 + $0x78] sm:$0xff]  ;;  %s4769_s5 = sld [smem:[%s7814_s0 + %s6800_s29]]  }
 0x77d   :  { %6691 = vpow2.f32 %v3179_v1  ;;  %v6155_v30 = vpack.c.bf16 %v3873_v21, %v3872_v18 }
 0x77e   :  { %5827 = vmatprep.mubr.msk.bf16.mxu0 %vm1328_vm3, %v3227_v52 }
 0x77f   :  { %v6684_v37 = vpop.eup %6683 }
 0x780   :  { %v6686_v5 = vpop.eup %6685  ;;  %v3209_v57 = vmul.f32 %v6768_v23, %v6684_v37 }
 0x781   :  { %v3212_v34 = vmul.f32 %v6769_v39, %v6686_v5 }
 0x782   :  { %v3228_v8 = vpack.c.bf16 %v3210_v60, %v3209_v57 }
 0x783   :  { %v6688_v42 = vpop.eup %6687 }
 0x784   :  { %v6690_v27 = vpop.eup %6689  ;;  %5828 = vmatmul.mubr.msk.bf16.gmra.mrb[116].mxu0 %vm1328_vm3, %v3228_v8  ;;  %v3211_v51 = vmul.f32 %v6770_v46, %v6688_v42 }
 0x785   :  { %v3214_v45 = vmul.f32 %v6771_v50, %v6690_v27  ;;  %v5018_v50 = vld [vmem:[%s4764_s9] ss:$0 sm:$0xff]  ;;  %s4768_s9 = sld [smem:[%s7814_s0 + %s6801_s6]]  }
 0x786   :  { %v3229_v56 = vpack.c.bf16 %v3212_v34, %v3211_v51 }
 0x787   :  { %v6692_v15 = vpop.eup %6691 }
 0x788   :  { %5831 = vmatprep.mubr.msk.bf16.mxu0 %vm1328_vm3, %v3229_v56  ;;  %v3213_v58 = vmul.f32 %v6772_v31, %v6692_v15 }
 0x78a   :  { %v3230_v59 = vpack.c.bf16 %v3214_v45, %v3213_v58 }
 0x78c   :  { %5832 = vmatmul.mubr.msk.bf16.gmra.mrb[120].mxu0 %vm1328_vm3, %v3230_v59 }
 0x824   :  { %v5805_v48 = vpop.f32.mrb[92].mxu0 }
 0x825   :  { %v3313_v53 = vpop.f32.mrb[93].mxu0 }
 0x826   :  { %v5806_v17 = vpop.f32.mrb[94].mxu0  ;;  %5843 = vmatprep.mubr.msk.f32.mxu1 %vm219_vm0, %v3313_v53 }
 0x827   :  { %v3316_v14 = vpop.f32.mrb[95].mxu0 }
 0x828   :  { %5844 = vmatmul.mubr.msk.f32.vlgmr.msra.gmra.mrb[108].mxu1 %vm219_vm0, %v3316_v14 }
 0x829   :  { %5846 = vmatprep.mubr.msk.f32.mxu1 %vm219_vm0, %v5805_v48  ;;  %6138 = vmatpush3.bf16.msra.mxu1 %v6135_v35 }
 0x82a   :  { %6140 = vmatprep.subr.bf16.mxu1 %v6139_v20 }
 0x82c   :  { %5847 = vmatmul.mubr.msk.f32.gmra.mrb[110].mxu1 %vm219_vm0, %v5806_v17 }
 0x82d   :  { %6142 = vmatpush3.bf16.msra.mxu1 %v6139_v20 }
 0x82e   :  { %v5809_v16 = vpop.f32.mrb[96].mxu0  ;;  %6144 = vmatprep.subr.bf16.mxu1 %v6143_v41 }
 0x82f   :  { %v3329_v12 = vpop.f32.mrb[97].mxu0 }
 0x830   :  { %v5810_v13 = vpop.f32.mrb[98].mxu0  ;;  %5849 = vmatprep.mubr.msk.f32.mxu1 %vm219_vm0, %v3329_v12 }
 0x831   :  { %v3332_v7 = vpop.f32.mrb[99].mxu0 }
 0x832   :  { %5850 = vmatmul.mubr.msk.f32.gmra.mrb[112].mxu1 %vm219_vm0, %v3332_v7 }
 0x833   :  { %5852 = vmatprep.mubr.msk.f32.mxu1 %vm219_vm0, %v5809_v16 }
 0x836   :  { %v5813_v6 = vpop.f32.mrb[100].mxu0  ;;  %5853 = vmatmul.mubr.msk.f32.gmra.mrb[114].mxu1 %vm219_vm0, %v5810_v13 }
 0x837   :  { %v3345_v11 = vpop.f32.mrb[101].mxu0 }
 0x838   :  { %v5814_v63 = vpop.f32.mrb[102].mxu0  ;;  %5863 = vmatprep.mubr.msk.f32.mxu1 %vm219_vm0, %v3345_v11  ;;  %v6793_v11 = vmov 0.0  }
 0x839   :  { %v3348_v24 = vpop.f32.mrb[103].mxu0  ;;  %5931 = vmatprep.mubr.msk.f32.mxu0 %vm6792_vm4, %v6793_v11 }
 0x83a   :  { %5864 = vmatmul.mubr.msk.f32.vlgmr.msra.gmra.mrb[108].mxu1 %vm219_vm0, %v3348_v24 }
 0x83b   :  { %5866 = vmatprep.mubr.msk.f32.mxu1 %vm219_vm0, %v5813_v6  ;;  %6146 = vmatpush3.bf16.msra.mxu1 %v6143_v41 }
 0x83c   :  { %6148 = vmatprep.subr.bf16.mxu1 %v6147_v47 }
 0x83e   :  { %v5817_v2 = vpop.f32.mrb[104].mxu0  ;;  %5867 = vmatmul.mubr.msk.f32.gmra.mrb[110].mxu1 %vm219_vm0, %v5814_v63 }
 0x83f   :  { %v3361_v4 = vpop.f32.mrb[105].mxu0  ;;  %6150 = vmatpush3.bf16.msra.mxu1 %v6147_v47 }
 0x840   :  { %v5818_v38 = vpop.f32.mrb[106].mxu0  ;;  %5869 = vmatprep.mubr.msk.f32.mxu1 %vm219_vm0, %v3361_v4  ;;  %6152 = vmatprep.subr.bf16.mxu1 %v6151_v0 }
 0x841   :  { %v3364_v33 = vpop.f32.mrb[107].mxu0 }
 0x842   :  { %5870 = vmatmul.mubr.msk.f32.gmra.mrb[112].mxu1 %vm219_vm0, %v3364_v33 }
 0x843   :  { %5872 = vmatprep.mubr.msk.f32.mxu1 %vm219_vm0, %v5817_v2 }
 0x846   :  { %5873 = vmatmul.mubr.msk.f32.gmra.mrb[114].mxu1 %vm219_vm0, %v5818_v38 }
 0x847   :  { %v5821_v9 = vpop.f32.mrb[108].mxu0 }
 0x848   :  { %v3377_v1 = vpop.f32.mrb[109].mxu0 }
 0x849   :  { %v5822_v52 = vpop.f32.mrb[110].mxu0  ;;  %5883 = vmatprep.mubr.msk.f32.mxu1 %vm219_vm0, %v3377_v1 }
 0x84a   :  { %v3380_v60 = vpop.f32.mrb[111].mxu0 }
 0x84b   :  { %5884 = vmatmul.mubr.msk.f32.vlgmr.msra.gmra.mrb[108].mxu1 %vm219_vm0, %v3380_v60 }
 0x84c   :  { %5886 = vmatprep.mubr.msk.f32.mxu1 %vm219_vm0, %v5821_v9  ;;  %6154 = vmatpush3.bf16.msra.mxu1 %v6151_v0 }
 0x84d   :  { %6156 = vmatprep.subr.bf16.mxu1 %v6155_v30 }
 0x84f   :  { %v5825_v37 = vpop.f32.mrb[112].mxu0  ;;  %5887 = vmatmul.mubr.msk.f32.gmra.mrb[110].mxu1 %vm219_vm0, %v5822_v52 }
 0x850   :  { %v3393_v5 = vpop.f32.mrb[113].mxu0  ;;  %6158 = vmatpush3.bf16.msra.mxu1 %v6155_v30 }
 0x851   :  { %v5826_v23 = vpop.f32.mrb[114].mxu0  ;;  %5889 = vmatprep.mubr.msk.f32.mxu1 %vm219_vm0, %v3393_v5  ;;  %6171 = vmatprep.subr.bf16.mxu1 %v6790_v43 }
 0x852   :  { %v3396_v57 = vpop.f32.mrb[115].mxu0 }
 0x853   :  { %5890 = vmatmul.mubr.msk.f32.gmra.mrb[112].mxu1 %vm219_vm0, %v3396_v57 }
 0x854   :  { %5892 = vmatprep.mubr.msk.f32.mxu1 %vm219_vm0, %v5825_v37 }
 0x857   :  { %v5829_v8 = vpop.f32.mrb[116].mxu0  ;;  %5893 = vmatmul.mubr.msk.f32.gmra.mrb[114].mxu1 %vm219_vm0, %v5826_v23 }
 0x858   :  { %v3409_v39 = vpop.f32.mrb[117].mxu0 }
 0x859   :  { %v5830_v34 = vpop.f32.mrb[118].mxu0  ;;  %5903 = vmatprep.mubr.msk.f32.mxu1 %vm219_vm0, %v3409_v39 }
 0x85a   :  { %v3412_v42 = vpop.f32.mrb[119].mxu0 }
 0x85b   :  { %5904 = vmatmul.mubr.msk.f32.vlgmr.msra.gmra.mrb[108].mxu1 %vm219_vm0, %v3412_v42  ;;  %v4212_v42 = vld [vmem:[%s7701_s22 + $0x10] sm:$0xff] }
 0x85c   :  { %5906 = vmatprep.mubr.msk.f32.mxu1 %vm219_vm0, %v5829_v8 }
 0x85f   :  { %v5833_v27 = vpop.f32.mrb[120].mxu0  ;;  %5907 = vmatmul.mubr.msk.f32.gmra.mrb[110].mxu1 %vm219_vm0, %v5830_v34  ;;  %v198_v34 = vld [vmem:[%s4748_s18] sm:$0xff]  ;;  %s4770_s18 = sld [smem:[%s7814_s0 + %s6803_s15]]  }
 0x860   :  { %v3425_v46 = vpop.f32.mrb[121].mxu0 }
 0x861   :  { %v5834_v51 = vpop.f32.mrb[122].mxu0  ;;  %5909 = vmatprep.mubr.msk.f32.mxu1 %vm219_vm0, %v3425_v46  ;;  %v4213_v46 = vld [vmem:[%s7701_s22 + $0x18] sm:$0xff] }
 0x862   :  { %v3428_v56 = vpop.f32.mrb[123].mxu0 }
 0x863   :  { %5910 = vmatmul.mubr.msk.f32.gmra.mrb[112].mxu1 %vm219_vm0, %v3428_v56  ;;  %v4214_v56 = vld [vmem:[%s7701_s22 + $0x20] sm:$0xff] }
 0x864   :  { %5912 = vmatprep.mubr.msk.f32.mxu1 %vm219_vm0, %v5833_v27 }
 0x867   :  { %5913 = vmatmul.mubr.msk.f32.gmra.mrb[114].mxu1 %vm219_vm0, %v5834_v51  ;;  %v6187_v51 = vpack.c.bf16 %v4213_v46, %v4212_v42 }
 0x868   :  { %5950 = vmatprep.mubr.msk.f32.mxu1 %vm6792_vm4, %v6793_v11 }
 0x92e   :  { %v5905_v45 = vpop.f32.mrb[108].mxu1 }
 0x92f   :  { %v6268_v15 = vadd.f32 %v5905_v45, %v5018_v50  ;;  %v3964_v31 = vpop.f32.mrb[109].mxu1 }
 0x930   :  { %v6269_v58 = vadd.f32 %v5018_v50, %v3964_v31  ;;  %v4217_v31 = vld [vmem:[%s7701_s22 + $0x38] sm:$0xff] }
 0x931   :  { %6693 = vtanh.f32 %v6268_v15  ;;  %v4216_v15 = vld [vmem:[%s7701_s22 + $0x30] sm:$0xff] }
 0x932   :  { %6695 = vtanh.f32 %v6269_v58  ;;  %v5908_v59 = vpop.f32.mrb[110].mxu1  ;;  %v6193_v58 = vpack.c.bf16 %v4217_v31, %v4216_v15 }
 0x933   :  { %v6270_v40 = vadd.f32 %v5908_v59, %v5018_v50  ;;  %v3974_v32 = vpop.f32.mrb[111].mxu1  ;;  %v4218_v59 = vld [vmem:[%s7701_s22 + $0x40] sm:$0xff] }
 0x934   :  { %v6271_v35 = vadd.f32 %v5018_v50, %v3974_v32 }
 0x935   :  { %6697 = vtanh.f32 %v6270_v40  ;;  %v4219_v40 = vld [vmem:[%s7701_s22 + $0x48] sm:$0xff] }
 0x936   :  { %6699 = vtanh.f32 %v6271_v35  ;;  %v5911_v3 = vpop.f32.mrb[112].mxu1  ;;  %v6196_v32 = vpack.c.bf16 %v4219_v40, %v4218_v59  ;;  %v4220_v35 = vld [vmem:[%s7701_s22 + $0x50] sm:$0xff] }
 0x937   :  { %v6272_v48 = vadd.f32 %v5911_v3, %v5018_v50  ;;  %v3984_v53 = vpop.f32.mrb[113].mxu1  ;;  %v4221_v3 = vld [vmem:[%s7701_s22 + $0x58] sm:$0xff] }
 0x938   :  { %v6273_v17 = vadd.f32 %v5018_v50, %v3984_v53  ;;  %v4222_v53 = vld [vmem:[%s7701_s22 + $0x60] sm:$0xff] }
 0x939   :  { %6701 = vtanh.f32 %v6272_v48  ;;  %v6199_v48 = vpack.c.bf16 %v4221_v3, %v4220_v35 }
 0x93a   :  { %6703 = vtanh.f32 %v6273_v17  ;;  %v5914_v20 = vpop.f32.mrb[114].mxu1  ;;  %v4223_v17 = vld [vmem:[%s7701_s22 + $0x68] sm:$0xff] }
 0x93b   :  { %v6694_v14 = vpop.eup %6693  ;;  %v6274_v61 = vadd.f32 %v5914_v20, %v5018_v50  ;;  %v3994_v54 = vpop.f32.mrb[115].mxu1  ;;  %v6202_v20 = vpack.c.bf16 %v4223_v17, %v4222_v53 }
 0x93c   :  { %v6696_v41 = vpop.eup %6695  ;;  %v6275_v16 = vadd.f32 %v5018_v50, %v3994_v54  ;;  %v4215_v50 = vld [vmem:[%s7701_s22 + $0x28] sm:$0xff] }
 0x93d   :  { %6705 = vtanh.f32 %v6274_v61  ;;  %v6369_v12 = vpack.i.bf16 %v6694_v14, %v6696_v41  ;;  %v6190_v45 = vpack.c.bf16 %v4215_v50, %v4214_v56  ;;  %v4224_v14 = vld [vmem:[%s7701_s22 + $0x70] sm:$0xff]  ;;  %v4225_v61 = vld [vmem:[%s7701_s22 + $0x78] sm:$0xff]  ;;  %v4304_v41 = vld [vmem:[%s4767_s26] sm:$0xff] }
 0x93e   :  { %6707 = vtanh.f32 %v6275_v16  ;;  %v6205_v54 = vpack.c.bf16 %v4225_v61, %v4224_v14  ;;  %v4305_v16 = vld [vmem:[%s4767_s26 + $0x8] sm:$0xff] }
 0x93f   :  { %v6698_v13 = vpop.eup %6697  ;;  %6370 = vrot.lane.b32.xlu0 %v6369_v12, %s6791_s10  ;;  %v6208_v12 = vpack.c.bf16 %v4305_v16, %v4304_v41 }
 0x940   :  { %v6700_v7 = vpop.eup %6699 }
 0x941   :  { %v6374_v55 = vpack.i.bf16 %v6698_v13, %v6700_v7 }
 0x943   :  { %v6702_v62 = vpop.eup %6701  ;;  %6375 = vrot.lane.b32.xlu0 %v6374_v55, %s6791_s10 }
 0x944   :  { %v6704_v6 = vpop.eup %6703 }
 0x945   :  { %v6379_v63 = vpack.i.bf16 %v6702_v62, %v6704_v6 }
 0x947   :  { %v6706_v47 = vpop.eup %6705  ;;  %6380 = vrot.lane.b32.xlu1 %v6379_v63, %s6791_s10 }
 0x948   :  { %v6708_v24 = vpop.eup %6707 }
 0x949   :  { %v6384_v49 = vpack.i.bf16 %v6706_v47, %v6708_v24  ;;  %v4306_v47 = vld [vmem:[%s4767_s26 + $0x10] sm:$0xff]  ;;  %v4307_v24 = vld [vmem:[%s4767_s26 + $0x18] sm:$0xff]  ;;  %s4775_s26 = sld [smem:[%s7814_s0 + %s6805_s23]]  }
 0x94b   :  { %6385 = vrot.lane.b32.xlu1 %v6384_v49, %s6791_s10  ;;  %v6211_v49 = vpack.c.bf16 %v4307_v24, %v4306_v47 }
 0x94f   :  { %v4653_v14 = vld [vmem:[%s4775_s26] sm:$0xff]  ;;  %v4654_v61 = vld [vmem:[%s4775_s26 + $0x8] sm:$0xff]  ;;  %v4655_v41 = vld [vmem:[%s4775_s26 + $0x10] sm:$0xff] }
 0x950   :  { %v4656_v16 = vld [vmem:[%s4775_s26 + $0x18] sm:$0xff] }
 0x9b1   :  { %v6371_v10 = vpop.permute.xlu0 %6370 }
 0x9b2   :  { %v6373_v0 = vunpack.i.h.bf16 %v6371_v10  ;;  %v6372_v2 = vunpack.i.l.bf16 %v6371_v10  ;;  %v5045_v10 = vld [vmem:[%s4766_s2] ss:$0 sm:$0xff]  ;;  %s6807_s2 = smov 31  }
 0x9b3   :  { %s4777_s4 = sld [smem:[%s7814_s0 + %s6807_s2]]  }
 0x9b4   :  { %v4052_v4 = vsel %vm219_vm0, %v7256_v19, %v6373_v0  ;;  %v4051_v38 = vsel %vm219_vm0, %v7254_v22, %v6372_v2  ;;  %v4389_v0 = vld [vmem:[%s4769_s5] sm:$0xff]  ;;  %v4390_v2 = vld [vmem:[%s4769_s5 + $0x8] sm:$0xff] }
 0x9b5   :  { %v6160_v33 = vpack.c.bf16 %v4052_v4, %v4051_v38  ;;  %v6376_v18 = vpop.permute.xlu0 %6375 }
 0x9b6   :  { %v6378_v21 = vunpack.i.h.bf16 %v6376_v18  ;;  %v6377_v9 = vunpack.i.l.bf16 %v6376_v18  ;;  %v6214_v18 = vpack.c.bf16 %v4390_v2, %v4389_v0 }
 0x9b7   :  { %6161 = vmatpush3.bf16.msra.mxu0 %v6160_v33  ;;  %6173 = vmatpush3.bf16.msra.mxu1 %v6160_v33 }
 0x9b8   :  { %v4054_v1 = vsel %vm219_vm0, %v7264_v25, %v6378_v21  ;;  %v4053_v52 = vsel %vm219_vm0, %v7262_v36, %v6377_v9  ;;  %6162 = vmatprep.subr.bf16.mxu0 %v6790_v43  ;;  %6174 = vmatprep.subr.bf16.mxu1 %v6790_v43  ;;  %v4391_v9 = vld [vmem:[%s4769_s5 + $0x10] sm:$0xff] }
 0x9b9   :  { %v6163_v19 = vpack.c.bf16 %v4054_v1, %v4053_v52  ;;  %v6381_v30 = vpop.permute.xlu1 %6380  ;;  %v4392_v1 = vld [vmem:[%s4769_s5 + $0x18] sm:$0xff]  ;;  %s6808_s5 = smov 28  }
 0x9ba   :  { %v6383_v60 = vunpack.i.h.bf16 %v6381_v30  ;;  %v6382_v22 = vunpack.i.l.bf16 %v6381_v30  ;;  %v6217_v52 = vpack.c.bf16 %v4392_v1, %v4391_v9  ;;  %s4774_s8 = sld [smem:[%s7814_s0 + %s6808_s5]]  }
 0x9bb   :  { %6164 = vmatpush3.bf16.msra.mxu0 %v6163_v19  ;;  %6176 = vmatpush3.bf16.msra.mxu1 %v6163_v19  ;;  %v5046_v19 = vld [vmem:[%s4768_s9] ss:$0 sm:$0xff]  ;;  %s6809_s9 = smov 30  }
 0x9bc   :  { %v4056_v36 = vsel %vm219_vm0, %v7274_v44, %v6383_v60  ;;  %v4055_v25 = vsel %vm219_vm0, %v7270_v26, %v6382_v22  ;;  %6165 = vmatprep.subr.bf16.mxu0 %v6790_v43  ;;  %6177 = vmatprep.subr.bf16.mxu1 %v6790_v43  ;;  %v199_v44 = vld [vmem:[%s4749_s14] sm:$0xff]  ;;  %s4771_s14 = sld [smem:[%s7814_s0 + %s6802_s11]]  }
 0x9bd   :  { %v6166_v37 = vpack.c.bf16 %v4056_v36, %v4055_v25  ;;  %v6386_v5 = vpop.permute.xlu1 %6385  ;;  %s4776_s13 = sld [smem:[%s7814_s0 + %s6809_s9]]  }
 0x9be   :  { %v6388_v23 = vunpack.i.h.bf16 %v6386_v5  ;;  %v6387_v57 = vunpack.i.l.bf16 %v6386_v5 }
 0x9bf   :  { %6167 = vmatpush3.bf16.msra.mxu0 %v6166_v37  ;;  %6179 = vmatpush3.bf16.msra.mxu1 %v6166_v37 }
 0x9c0   :  { %v4058_v8 = vsel %vm219_vm0, %v7282_v28, %v6388_v23  ;;  %v4057_v39 = vsel %vm219_vm0, %v7280_v29, %v6387_v57  ;;  %6168 = vmatprep.subr.bf16.mxu0 %v6790_v43  ;;  %6180 = vmatprep.subr.bf16.mxu1 %v6790_v43  ;;  %v4210_v29 = vld [vmem:[%s7701_s22] sm:$0xff]  ;;  %v4211_v28 = vld [vmem:[%s7701_s22 + $0x8] sm:$0xff]  ;;  %s7765_s22 = sld [smem:[%s7814_s0 + %s6804_s19]]  }
 0x9c1   :  { %v6169_v26 = vpack.c.bf16 %v4058_v8, %v4057_v39  ;;  %v6184_v27 = vpack.c.bf16 %v4211_v28, %v4210_v29  ;;  %v5048_v23 = vld [vmem:[%s4770_s18] ss:$0 sm:$0xff] }
 0x9c2   :  { %v4474_v25 = vld [vmem:[%s4771_s14] sm:$0xff]  ;;  %v4475_v37 = vld [vmem:[%s4771_s14 + $0x8] sm:$0xff] }
 0x9c3   :  { %6170 = vmatpush3.bf16.msra.mxu0 %v6169_v26  ;;  %6182 = vmatpush3.bf16.msra.mxu1 %v6169_v26  ;;  %v6220_v5 = vpack.c.bf16 %v4475_v37, %v4474_v25 }
 0x9c4   :  { %6183 = vmatprep.subr.bf16.mxu0 %v6790_v43  ;;  %6207 = vmatprep.subr.bf16.mxu1 %v6790_v43 }
 0x9c6   :  { %5951 = vmatmul.mubr.msk.f32.vlgmr.msra.gmra.mrb[116].mxu1 %vm1328_vm3, %v199_v44  ;;  %5932 = vmatmul.mubr.msk.f32.vlgmr.msra.gmra.mrb[124].mxu0 %vm1328_vm3, %v198_v34  ;;  %v4559_v57 = vld [vmem:[%s7765_s22] sm:$0xff]  ;;  %v4560_v8 = vld [vmem:[%s7765_s22 + $0x8] sm:$0xff]  ;;  %v4561_v28 = vld [vmem:[%s7765_s22 + $0x10] sm:$0xff] }
 0x9c7   :  { %5985 = vmatprep.mubr.msk.f32.mxu0 %vm6792_vm4, %v6793_v11  ;;  %5996 = vmatprep.mubr.msk.f32.mxu1 %vm6792_vm4, %v6793_v11  ;;  %v6223_v34 = vpack.c.bf16 %v4560_v8, %v4559_v57  ;;  %v4562_v42 = vld [vmem:[%s7765_s22 + $0x18] sm:$0xff]  ;;  %v4563_v46 = vld [vmem:[%s7765_s22 + $0x20] sm:$0xff]  ;;  %v4565_v50 = vld [vmem:[%s7765_s22 + $0x30] sm:$0xff] }
 0x9c8   :  { %6185 = vmatpush3.bf16.msra.mxu0 %v6184_v27  ;;  %6209 = vmatpush3.bf16.msra.mxu1 %v6208_v12  ;;  %v6226_v27 = vpack.c.bf16 %v4562_v42, %v4561_v28  ;;  %v4568_v31 = vld [vmem:[%s7765_s22 + $0x48] sm:$0xff]  ;;  %v4569_v59 = vld [vmem:[%s7765_s22 + $0x50] sm:$0xff]  ;;  %v4570_v40 = vld [vmem:[%s7765_s22 + $0x58] sm:$0xff]  ;;  %v6250_v12 = vpack.c.bf16 %v4656_v16, %v4655_v41 }
 0x9c9   :  { %6186 = vmatprep.subr.bf16.mxu0 %v6790_v43  ;;  %6210 = vmatprep.subr.bf16.mxu1 %v6790_v43  ;;  %v4571_v35 = vld [vmem:[%s7765_s22 + $0x60] sm:$0xff]  ;;  %v4572_v3 = vld [vmem:[%s7765_s22 + $0x68] sm:$0xff]  ;;  %v4573_v53 = vld [vmem:[%s7765_s22 + $0x70] sm:$0xff] }
 0x9ca   :  { %v4574_v17 = vld [vmem:[%s7765_s22 + $0x78] sm:$0xff] }
 0x9cc   :  { %6188 = vmatpush3.bf16.msra.mxu0 %v6187_v51  ;;  %6212 = vmatpush3.bf16.msra.mxu1 %v6211_v49  ;;  %v4564_v51 = vld [vmem:[%s7765_s22 + $0x28] sm:$0xff]  ;;  %v5053_v49 = vld [vmem:[%s4776_s13] ss:$0 sm:$0xff] }
 0x9cd   :  { %6189 = vmatprep.subr.bf16.mxu0 %v6790_v43  ;;  %6213 = vmatprep.subr.bf16.mxu1 %v6790_v43  ;;  %v6229_v56 = vpack.c.bf16 %v4564_v51, %v4563_v46 }
 0x9d0   :  { %6191 = vmatpush3.bf16.msra.mxu0 %v6190_v45  ;;  %v4566_v45 = vld [vmem:[%s7765_s22 + $0x38] sm:$0xff] }
 0x9d1   :  { %6192 = vmatprep.subr.bf16.mxu0 %v6790_v43  ;;  %v6232_v15 = vpack.c.bf16 %v4566_v45, %v4565_v50 }
 0x9d4   :  { %6194 = vmatpush3.bf16.msra.mxu0 %v6193_v58 }
 0x9d5   :  { %6195 = vmatprep.subr.bf16.mxu0 %v6790_v43 }
 0x9d8   :  { %6197 = vmatpush3.bf16.msra.mxu0 %v6196_v32  ;;  %v6238_v32 = vpack.c.bf16 %v4570_v40, %v4569_v59 }
 0x9d9   :  { %6198 = vmatprep.subr.bf16.mxu0 %v6790_v43 }
 0x9dc   :  { %6200 = vmatpush3.bf16.msra.mxu0 %v6199_v48  ;;  %v6241_v48 = vpack.c.bf16 %v4572_v3, %v4571_v35 }
 0x9dd   :  { %6201 = vmatprep.subr.bf16.mxu0 %v6790_v43 }
 0x9e0   :  { %6203 = vmatpush3.bf16.msra.mxu0 %v6202_v20  ;;  %v6244_v20 = vpack.c.bf16 %v4574_v17, %v4573_v53 }
 0x9e1   :  { %6204 = vmatprep.subr.bf16.mxu0 %v6790_v43 }
 0x9e4   :  { %6206 = vmatpush3.bf16.msra.mxu0 %v6205_v54  ;;  %v6247_v54 = vpack.c.bf16 %v4654_v61, %v4653_v14 }
 0x9e5   :  { %6246 = vmatprep.subr.bf16.mxu0 %v6790_v43 }
 0xa99   :  { %v4201_v13 = vpop.f32.mrb[116].mxu1  ;;  %v4128_v7 = vpop.f32.mrb[124].mxu0 }
 0xa9a   :  { %4206 = vrot.lane.b32.xlu0 %v4201_v13, %s6798_s27  ;;  %v5952_v55 = vpop.f32.mrb[117].mxu1  ;;  %v5933_v62 = vpop.f32.mrb[125].mxu0  ;;  %s6806_s27 = smov 26  }
 0xa9b   :  { %s4772_s1 = sld [smem:[%s7814_s0 + %s6806_s27]]  }
 0xaa1   :  { %v5050_v13 = vld [vmem:[%s4772_s1] ss:$0 sm:$0xff] }
 0xb0c   :  { %v4207_v6 = vpop.permute.xlu0 %4206 }
 0xb0d   :  { %v7732_v63 = vsel %vm1328_vm3, %v4128_v7, %v4207_v6 }
 0xb0e   :  { %5986 = vmatmul.mubr.f32.vlgmr.msra.gmra.mrb[126].mxu0 %v7732_v63 }
 0xb0f   :  { %6060 = vmatprep.mubr.msk.f32.mxu0 %vm6792_vm4, %v6793_v11  ;;  %6248 = vmatpush3.bf16.msra.mxu0 %v6247_v54 }
 0xb10   :  { %6249 = vmatprep.subr.bf16.mxu0 %v6790_v43 }
 0xb13   :  { %6251 = vmatpush3.bf16.msra.mxu0 %v6250_v12 }
 0xbe1   :  { %v4299_v4 = vpop.f32.mrb[126].mxu0 }
 0xbe2   :  { %v4300_v38 = vadd.f32 %v5045_v10, %v4299_v4  ;;  %v5987_v33 = vpop.f32.mrb[127].mxu0 }
 0xbe4   :  { %v4303_v21 = vmax.f32 %v4300_v38, 0.0 }
 0xbe6   :  { %5997 = vmatmul.mubr.msk.f32.vlgmr.msra.gmra.mrb[118].mxu1 %vm219_vm0, %v4303_v21 }
 0xbe7   :  { %6215 = vmatpush3.bf16.msra.mxu1 %v6214_v18  ;;  %6007 = vmatprep.mubr.msk.f32.mxu1 %vm6792_vm4, %v6793_v11 }
 0xbe8   :  { %6216 = vmatprep.subr.bf16.mxu1 %v6790_v43 }
 0xbeb   :  { %6218 = vmatpush3.bf16.msra.mxu1 %v6217_v52 }
 0xbec   :  { %6219 = vmatprep.subr.bf16.mxu1 %v6790_v43 }
 0xcb9   :  { %v4384_v30 = vpop.f32.mrb[118].mxu1 }
 0xcba   :  { %v4385_v60 = vadd.f32 %v5046_v19, %v4384_v30  ;;  %v5998_v22 = vpop.f32.mrb[119].mxu1 }
 0xcbc   :  { %v4388_v36 = vmax.f32 %v4385_v60, 0.0 }
 0xcbe   :  { %6008 = vmatmul.mubr.msk.f32.vlgmr.msra.gmra.mrb[120].mxu1 %vm219_vm0, %v4388_v36 }
 0xcbf   :  { %6014 = vmatprep.mubr.msk.f32.mxu1 %vm6792_vm4, %v6793_v11  ;;  %6221 = vmatpush3.bf16.msra.mxu1 %v6220_v5 }
 0xcc0   :  { %6222 = vmatprep.subr.bf16.mxu1 %v6790_v43 }
 0xd91   :  { %v4469_v39 = vpop.f32.mrb[120].mxu1 }
 0xd92   :  { %v4470_v26 = vadd.f32 %v5048_v23, %v4469_v39  ;;  %v6009_v44 = vpop.f32.mrb[121].mxu1 }
 0xd94   :  { %v4473_v29 = vmax.f32 %v4470_v26, 0.0 }
 0xd96   :  { %6015 = vmatmul.mubr.msk.f32.vlgmr.msra.gmra.mrb[122].mxu1 %vm4483_vm5, %v4473_v29 }
 0xd97   :  { %6224 = vmatpush3.bf16.msra.mxu1 %v6223_v34  ;;  %6049 = vmatprep.mubr.msk.f32.mxu1 %vm6792_vm4, %v6793_v11  ;;  %v4567_v11 = vld [vmem:[%s7765_s22 + $0x40] sm:$0xff] }
 0xd98   :  { %6225 = vmatprep.subr.bf16.mxu1 %v6790_v43  ;;  %v6235_v58 = vpack.c.bf16 %v4568_v31, %v4567_v11 }
 0xd9b   :  { %6227 = vmatpush3.bf16.msra.mxu1 %v6226_v27 }
 0xd9c   :  { %6228 = vmatprep.subr.bf16.mxu1 %v6790_v43 }
 0xd9f   :  { %6230 = vmatpush3.bf16.msra.mxu1 %v6229_v56 }
 0xda0   :  { %6231 = vmatprep.subr.bf16.mxu1 %v6790_v43 }
 0xda3   :  { %6233 = vmatpush3.bf16.msra.mxu1 %v6232_v15 }
 0xda4   :  { %6234 = vmatprep.subr.bf16.mxu1 %v6790_v43 }
 0xda7   :  { %6236 = vmatpush3.bf16.msra.mxu1 %v6235_v58 }
 0xda8   :  { %6237 = vmatprep.subr.bf16.mxu1 %v6790_v43 }
 0xdab   :  { %6239 = vmatpush3.bf16.msra.mxu1 %v6238_v32 }
 0xdac   :  { %6240 = vmatprep.subr.bf16.mxu1 %v6790_v43 }
 0xdaf   :  { %6242 = vmatpush3.bf16.msra.mxu1 %v6241_v48 }
 0xdb0   :  { %6243 = vmatprep.subr.bf16.mxu1 %v6790_v43  ;;  %v5052_v43 = vld [vmem:[%s4774_s8] ss:$0 sm:$0xff] }
 0xdb3   :  { %6245 = vmatpush3.bf16.msra.mxu1 %v6244_v20 }
 0xdb6   :  { %6050 = vmatmul.mubr.f32.vlgmr.msra.gmra.mrb[124].mxu1 %v7732_v63 }
 0xe69   :  { %v4553_v7 = vpop.f32.mrb[122].mxu1 }
 0xe6a   :  { %v4554_v55 = vadd.f32 %v5050_v13, %v4553_v7  ;;  %v6016_v62 = vpop.f32.mrb[123].mxu1 }
 0xe6c   :  { %4558 = vst.msk [vmem:[%s4777_s4] sm:$0xf] %vm4557_vm6, %v4554_v55 }
 0xe89   :  { %v4648_v6 = vpop.f32.mrb[124].mxu1 }
 0xe8a   :  { %v4649_v63 = vadd.f32 %v5052_v43, %v4648_v6  ;;  %v6051_v47 = vpop.f32.mrb[125].mxu1 }
 0xe8c   :  { %v4652_v24 = vmax.f32 %v4649_v63, 0.0 }
 0xe8e   :  { %6061 = vmatmul.mubr.msk.f32.vlgmr.msra.gmra.mrb[128].mxu0 %vm219_vm0, %v4652_v24 }
 0xf61   :  { %v4733_v10 = vpop.f32.mrb[128].mxu0 }
 0xf62   :  { %v4734_v0 = vadd.f32 %v5053_v49, %v4733_v10  ;;  %v6062_v2 = vpop.f32.mrb[129].mxu0 }
 0xf64   :  { %4738 = vst.msk [vmem:[%s4778_s16] sm:$0xff] %vm4737_vm7, %v4734_v0 }

</bundles_post_ra>
